<compile_context>
chip_gen: v7x
topology: tpu7x:2x2x1
jax: 0.10.0
libtpu: 0.0.40
codegen_flags: <defaults>
</compile_context>

<pallas_src>
import functools
import math

import jax
import jax.numpy as jnp
from jax.experimental import pallas as pl
from jax.experimental.pallas import tpu as pltpu


def _arm_kernel(x_ref, w_ref, bconv_ref, watt_ref, batt_ref, o_ref, *, K, H, W):
    """Fused ARM forward for ONE batch element.

    x_ref    : (1, H+2p, W+2p, Cin)  zero-padded input image (bf16), p=(K-1)//2
    w_ref    : (K, K, Cin, Cp)       conv weights, BN scale pre-folded (bf16)
    bconv_ref: (1, Cp)               folded conv-BN bias (f32)
    watt_ref : (Cp, Cp)              1x1 attention conv weights, BN scale folded (bf16)
    batt_ref : (1, Cp)               folded attention-BN bias (f32)
    o_ref    : (1, H, W, Cp)         output (f32)
    """
    Cp = o_ref.shape[-1]
    HW = H * W

    # --- 3x3 conv as K*K tap matmuls, M = H*W, f32 accumulation --------------
    acc = jnp.zeros((HW, Cp), jnp.float32)
    for ky in range(K):
        for kx in range(K):
            patch = x_ref[0, ky:ky + H, kx:kx + W, :].reshape(HW, -1)  # (HW, Cin)
            acc = acc + jnp.dot(patch, w_ref[ky, kx],
                                preferred_element_type=jnp.float32)

    # --- folded BN bias + ReLU ------------------------------------------------
    feat = jnp.maximum(acc + bconv_ref[...], 0.0)                      # (HW, Cp) f32

    # --- global average pool -> 1x1 conv (BN folded) -> sigmoid ---------------
    mean = jnp.sum(feat, axis=0, keepdims=True) * (1.0 / HW)           # (1, Cp)
    att = jnp.dot(mean.astype(watt_ref.dtype), watt_ref[...],
                  preferred_element_type=jnp.float32) + batt_ref[...]
    att = 1.0 / (1.0 + jnp.exp(-att))                                  # sigmoid

    # --- channel re-weighting + lane-dense store -------------------------------
    o_ref[0] = (feat * att).reshape(H, W, Cp).astype(o_ref.dtype)


def attention_refinement_module(x_nchw, params, *, compute_dtype=jnp.bfloat16):
    """Forward pass equivalent to AttentionRefinementModule (NCHW in, NCHW out)."""
    w_conv = params["w_conv"]            # (K, K, Cin, Cout)  HWIO
    w_att = params["w_atten"]            # (Cout, Cout)       (in, out)
    scale_c, bias_c = params["conv_bn_scale"], params["conv_bn_bias"]
    scale_a, bias_a = params["atten_bn_scale"], params["atten_bn_bias"]

    N, Cin, H, W = x_nchw.shape
    K = w_conv.shape[0]
    Cout = w_conv.shape[-1]
    pad = (K - 1) // 2
    Hp, Wp = H + 2 * pad, W + 2 * pad
    Cp = ((Cout + 127) // 128) * 128     # lane-dense output channel count

    # NCHW -> NHWC, zero-pad spatially once, cast activations to bf16.
    x = jnp.transpose(x_nchw, (0, 2, 3, 1))
    xp = jnp.pad(x, ((0, 0), (pad, pad), (pad, pad), (0, 0))).astype(compute_dtype)

    # Fold BN scales into the weights; pad Cout to Cp (zero channels are inert).
    wc = w_conv * scale_c[None, None, None, :]
    wc = jnp.pad(wc, ((0, 0), (0, 0), (0, 0), (0, Cp - Cout))).astype(compute_dtype)
    bc = jnp.pad(bias_c, (0, Cp - Cout)).reshape(1, Cp).astype(jnp.float32)

    wa = w_att * scale_a[None, :]
    wa = jnp.pad(wa, ((0, Cp - Cout), (0, Cp - Cout))).astype(compute_dtype)
    ba = jnp.pad(bias_a, (0, Cp - Cout)).reshape(1, Cp).astype(jnp.float32)

    kernel = functools.partial(_arm_kernel, K=K, H=H, W=W)
    out = pl.pallas_call(
        kernel,
        out_shape=jax.ShapeDtypeStruct((N, H, W, Cp), jnp.float32),
        grid_spec=pltpu.PrefetchScalarGridSpec(
            num_scalar_prefetch=0,
            grid=(N,),
            in_specs=[
                pl.BlockSpec((1, Hp, Wp, Cin), lambda n: (n, 0, 0, 0)),
                pl.BlockSpec((K, K, Cin, Cp), lambda n: (0, 0, 0, 0)),
                pl.BlockSpec((1, Cp), lambda n: (0, 0)),
                pl.BlockSpec((Cp, Cp), lambda n: (0, 0)),
                pl.BlockSpec((1, Cp), lambda n: (0, 0)),
            ],
            out_specs=pl.BlockSpec((1, H, W, Cp), lambda n: (n, 0, 0, 0)),
        ),
        compiler_params=pltpu.CompilerParams(
            dimension_semantics=("parallel",)),   # batch shards across v7x's 2 TCs
    )(xp, wc, bc, wa, ba)

    out = out[..., :Cout]                         # drop padded channels
    return jnp.transpose(out, (0, 3, 1, 2))       # NHWC -> NCHW


def init_arm_params(key, in_chan, out_chan, ks=3, eps=1e-5):
    """Deterministic init matching the PyTorch module.

    Conv weights: kaiming_normal_(a=1) -> std = 1/sqrt(fan_in), no bias.
    BN: default init (gamma=1, beta=0, running_mean=0, running_var=1),
        eval-mode stats folded into per-channel scale / bias with eps=1e-5.
    """
    k1, k2 = jax.random.split(key)
    std_c = 1.0 / math.sqrt(in_chan * ks * ks)
    w_conv = std_c * jax.random.normal(k1, (ks, ks, in_chan, out_chan), jnp.float32)
    std_a = 1.0 / math.sqrt(out_chan)
    w_atten = std_a * jax.random.normal(k2, (out_chan, out_chan), jnp.float32)

    scale = jnp.full((out_chan,), 1.0 / math.sqrt(1.0 + eps), jnp.float32)
    bias = jnp.zeros((out_chan,), jnp.float32)
    return dict(w_conv=w_conv, conv_bn_scale=scale, conv_bn_bias=bias,
                w_atten=w_atten, atten_bn_scale=scale, atten_bn_bias=bias)


def _arm_reference(x_nchw, params, compute_dtype):
    """Pure-JAX reference using the same bf16-in / f32-accumulate numerics."""
    x = jnp.transpose(x_nchw, (0, 2, 3, 1)).astype(compute_dtype)
    wc = (params["w_conv"] * params["conv_bn_scale"][None, None, None, :]
          ).astype(compute_dtype)
    feat = jax.lax.conv_general_dilated(
        x, wc, window_strides=(1, 1), padding="SAME",
        dimension_numbers=("NHWC", "HWIO", "NHWC"),
        preferred_element_type=jnp.float32)
    feat = jnp.maximum(feat + params["conv_bn_bias"], 0.0)

    mean = jnp.mean(feat, axis=(1, 2))                       # (N, Cout)
    wa = (params["w_atten"] * params["atten_bn_scale"][None, :]).astype(compute_dtype)
    att = jnp.dot(mean.astype(compute_dtype), wa,
                  preferred_element_type=jnp.float32) + params["atten_bn_bias"]
    att = jax.nn.sigmoid(att)
    out = feat * att[:, None, None, :]
    return jnp.transpose(out, (0, 3, 1, 2))


if __name__ == "__main__":
    key = jax.random.PRNGKey(0)
    xkey, pkey = jax.random.split(key)

    # Small shapes consistent with the module: N=2, in_chan=4, H=W=16,
    # out_chan=128 (ARM's usual output width; also lane-dense on TPU).
    N, Cin, H, W, Cout = 2, 4, 16, 16, 128
    x = jax.random.normal(xkey, (N, Cin, H, W), jnp.float32)
    params = init_arm_params(pkey, Cin, Cout)

    out = attention_refinement_module(x, params, compute_dtype=jnp.bfloat16)
    out = jax.block_until_ready(out)

    assert out.shape == (N, Cout, H, W), out.shape
    assert out.dtype == jnp.float32
    assert bool(jnp.all(jnp.isfinite(out)))
    assert bool(jnp.all(out >= 0.0))          # ReLU(feat) * sigmoid(.) >= 0

    ref = _arm_reference(x, params, jnp.bfloat16)
    max_err = float(jnp.max(jnp.abs(out - ref)))
    assert jnp.allclose(out, ref, rtol=2e-2, atol=2e-2), max_err

    print("KERNEL_OK")
</pallas_src>

<mosaic_0001>
module attributes {stable_mosaic.version = 11 : i64} {
  func.func @_arm_kernel(%arg0: i32, %arg1: memref<1x18x18x4xbf16, #tpu.memory_space<vmem>>, %arg2: memref<3x3x4x128xbf16, #tpu.memory_space<vmem>>, %arg3: memref<1x128xf32, #tpu.memory_space<vmem>>, %arg4: memref<128x128xbf16, #tpu.memory_space<vmem>>, %arg5: memref<1x128xf32, #tpu.memory_space<vmem>>, %arg6: memref<1x16x16x128xf32, #tpu.memory_space<vmem>>) attributes {dimension_semantics = [#tpu.dimension_semantics<parallel>], iteration_bounds = array<i64: 2>, scalar_prefetch = 0 : i64, scratch_operands = 0 : i64, tpu.core_type = #tpu.core_type<tc>, window_params = [{transform_indices = @transform_0, window_bounds = array<i64: 1, 18, 18, 4>}, {pipeline_mode = #tpu.pipeline_mode<synchronous>, transform_indices = @transform_1, window_bounds = array<i64: 3, 3, 4, 128>}, {pipeline_mode = #tpu.pipeline_mode<synchronous>, transform_indices = @transform_2, window_bounds = array<i64: 1, 128>}, {pipeline_mode = #tpu.pipeline_mode<synchronous>, transform_indices = @transform_3, window_bounds = array<i64: 128, 128>}, {pipeline_mode = #tpu.pipeline_mode<synchronous>, transform_indices = @transform_4, window_bounds = array<i64: 1, 128>}, {transform_indices = @transform_5, window_bounds = array<i64: 1, 16, 16, 128>}]} {
    %cst = arith.constant 0.000000e+00 : f32
    %0 = vector.broadcast %cst : f32 to vector<256x128xf32>
    %c0 = arith.constant 0 : index
    %c0_0 = arith.constant 0 : index
    %c0_1 = arith.constant 0 : index
    %c0_2 = arith.constant 0 : index
    %1 = vector.load %arg1[%c0, %c0_0, %c0_1, %c0_2] : memref<1x18x18x4xbf16, #tpu.memory_space<vmem>>, vector<1x16x16x4xbf16>
    %2 = vector.shape_cast %1 : vector<1x16x16x4xbf16> to vector<16x16x4xbf16>
    %3 = vector.shape_cast %2 : vector<16x16x4xbf16> to vector<256x4xbf16>
    %c0_3 = arith.constant 0 : index
    %c0_4 = arith.constant 0 : index
    %c0_5 = arith.constant 0 : index
    %c0_6 = arith.constant 0 : index
    %4 = vector.load %arg2[%c0_3, %c0_4, %c0_5, %c0_6] : memref<3x3x4x128xbf16, #tpu.memory_space<vmem>>, vector<1x1x4x128xbf16>
    %5 = vector.shape_cast %4 : vector<1x1x4x128xbf16> to vector<4x128xbf16>
    %cst_7 = arith.constant dense<0.000000e+00> : vector<256x128xf32>
    %6 = tpu.matmul %3, %5, %cst_7 {dimension_numbers = #tpu.dot_dimension_numbers<[1], [0], [0], [1], [0, 0, 1, 1], [], []>} : vector<256x4xbf16>, vector<4x128xbf16>, vector<256x128xf32> -> vector<256x128xf32>
    %7 = arith.addf %0, %6 : vector<256x128xf32>
    %c0_8 = arith.constant 0 : index
    %c0_9 = arith.constant 0 : index
    %c1 = arith.constant 1 : index
    %c0_10 = arith.constant 0 : index
    %8 = vector.load %arg1[%c0_8, %c0_9, %c1, %c0_10] : memref<1x18x18x4xbf16, #tpu.memory_space<vmem>>, vector<1x16x16x4xbf16>
    %9 = vector.shape_cast %8 : vector<1x16x16x4xbf16> to vector<16x16x4xbf16>
    %10 = vector.shape_cast %9 : vector<16x16x4xbf16> to vector<256x4xbf16>
    %c0_11 = arith.constant 0 : index
    %c1_12 = arith.constant 1 : index
    %c0_13 = arith.constant 0 : index
    %c0_14 = arith.constant 0 : index
    %11 = vector.load %arg2[%c0_11, %c1_12, %c0_13, %c0_14] : memref<3x3x4x128xbf16, #tpu.memory_space<vmem>>, vector<1x1x4x128xbf16>
    %12 = vector.shape_cast %11 : vector<1x1x4x128xbf16> to vector<4x128xbf16>
    %cst_15 = arith.constant dense<0.000000e+00> : vector<256x128xf32>
    %13 = tpu.matmul %10, %12, %cst_15 {dimension_numbers = #tpu.dot_dimension_numbers<[1], [0], [0], [1], [0, 0, 1, 1], [], []>} : vector<256x4xbf16>, vector<4x128xbf16>, vector<256x128xf32> -> vector<256x128xf32>
    %14 = arith.addf %7, %13 : vector<256x128xf32>
    %c0_16 = arith.constant 0 : index
    %c0_17 = arith.constant 0 : index
    %c2 = arith.constant 2 : index
    %c0_18 = arith.constant 0 : index
    %15 = vector.load %arg1[%c0_16, %c0_17, %c2, %c0_18] : memref<1x18x18x4xbf16, #tpu.memory_space<vmem>>, vector<1x16x16x4xbf16>
    %16 = vector.shape_cast %15 : vector<1x16x16x4xbf16> to vector<16x16x4xbf16>
    %17 = vector.shape_cast %16 : vector<16x16x4xbf16> to vector<256x4xbf16>
    %c0_19 = arith.constant 0 : index
    %c2_20 = arith.constant 2 : index
    %c0_21 = arith.constant 0 : index
    %c0_22 = arith.constant 0 : index
    %18 = vector.load %arg2[%c0_19, %c2_20, %c0_21, %c0_22] : memref<3x3x4x128xbf16, #tpu.memory_space<vmem>>, vector<1x1x4x128xbf16>
    %19 = vector.shape_cast %18 : vector<1x1x4x128xbf16> to vector<4x128xbf16>
    %cst_23 = arith.constant dense<0.000000e+00> : vector<256x128xf32>
    %20 = tpu.matmul %17, %19, %cst_23 {dimension_numbers = #tpu.dot_dimension_numbers<[1], [0], [0], [1], [0, 0, 1, 1], [], []>} : vector<256x4xbf16>, vector<4x128xbf16>, vector<256x128xf32> -> vector<256x128xf32>
    %21 = arith.addf %14, %20 : vector<256x128xf32>
    %c0_24 = arith.constant 0 : index
    %c1_25 = arith.constant 1 : index
    %c0_26 = arith.constant 0 : index
    %c0_27 = arith.constant 0 : index
    %22 = vector.load %arg1[%c0_24, %c1_25, %c0_26, %c0_27] : memref<1x18x18x4xbf16, #tpu.memory_space<vmem>>, vector<1x16x16x4xbf16>
    %23 = vector.shape_cast %22 : vector<1x16x16x4xbf16> to vector<16x16x4xbf16>
    %24 = vector.shape_cast %23 : vector<16x16x4xbf16> to vector<256x4xbf16>
    %c1_28 = arith.constant 1 : index
    %c0_29 = arith.constant 0 : index
    %c0_30 = arith.constant 0 : index
    %c0_31 = arith.constant 0 : index
    %25 = vector.load %arg2[%c1_28, %c0_29, %c0_30, %c0_31] : memref<3x3x4x128xbf16, #tpu.memory_space<vmem>>, vector<1x1x4x128xbf16>
    %26 = vector.shape_cast %25 : vector<1x1x4x128xbf16> to vector<4x128xbf16>
    %cst_32 = arith.constant dense<0.000000e+00> : vector<256x128xf32>
    %27 = tpu.matmul %24, %26, %cst_32 {dimension_numbers = #tpu.dot_dimension_numbers<[1], [0], [0], [1], [0, 0, 1, 1], [], []>} : vector<256x4xbf16>, vector<4x128xbf16>, vector<256x128xf32> -> vector<256x128xf32>
    %28 = arith.addf %21, %27 : vector<256x128xf32>
    %c0_33 = arith.constant 0 : index
    %c1_34 = arith.constant 1 : index
    %c1_35 = arith.constant 1 : index
    %c0_36 = arith.constant 0 : index
    %29 = vector.load %arg1[%c0_33, %c1_34, %c1_35, %c0_36] : memref<1x18x18x4xbf16, #tpu.memory_space<vmem>>, vector<1x16x16x4xbf16>
    %30 = vector.shape_cast %29 : vector<1x16x16x4xbf16> to vector<16x16x4xbf16>
    %31 = vector.shape_cast %30 : vector<16x16x4xbf16> to vector<256x4xbf16>
    %c1_37 = arith.constant 1 : index
    %c1_38 = arith.constant 1 : index
    %c0_39 = arith.constant 0 : index
    %c0_40 = arith.constant 0 : index
    %32 = vector.load %arg2[%c1_37, %c1_38, %c0_39, %c0_40] : memref<3x3x4x128xbf16, #tpu.memory_space<vmem>>, vector<1x1x4x128xbf16>
    %33 = vector.shape_cast %32 : vector<1x1x4x128xbf16> to vector<4x128xbf16>
    %cst_41 = arith.constant dense<0.000000e+00> : vector<256x128xf32>
    %34 = tpu.matmul %31, %33, %cst_41 {dimension_numbers = #tpu.dot_dimension_numbers<[1], [0], [0], [1], [0, 0, 1, 1], [], []>} : vector<256x4xbf16>, vector<4x128xbf16>, vector<256x128xf32> -> vector<256x128xf32>
    %35 = arith.addf %28, %34 : vector<256x128xf32>
    %c0_42 = arith.constant 0 : index
    %c1_43 = arith.constant 1 : index
    %c2_44 = arith.constant 2 : index
    %c0_45 = arith.constant 0 : index
    %36 = vector.load %arg1[%c0_42, %c1_43, %c2_44, %c0_45] : memref<1x18x18x4xbf16, #tpu.memory_space<vmem>>, vector<1x16x16x4xbf16>
    %37 = vector.shape_cast %36 : vector<1x16x16x4xbf16> to vector<16x16x4xbf16>
    %38 = vector.shape_cast %37 : vector<16x16x4xbf16> to vector<256x4xbf16>
    %c1_46 = arith.constant 1 : index
    %c2_47 = arith.constant 2 : index
    %c0_48 = arith.constant 0 : index
    %c0_49 = arith.constant 0 : index
    %39 = vector.load %arg2[%c1_46, %c2_47, %c0_48, %c0_49] : memref<3x3x4x128xbf16, #tpu.memory_space<vmem>>, vector<1x1x4x128xbf16>
    %40 = vector.shape_cast %39 : vector<1x1x4x128xbf16> to vector<4x128xbf16>
    %cst_50 = arith.constant dense<0.000000e+00> : vector<256x128xf32>
    %41 = tpu.matmul %38, %40, %cst_50 {dimension_numbers = #tpu.dot_dimension_numbers<[1], [0], [0], [1], [0, 0, 1, 1], [], []>} : vector<256x4xbf16>, vector<4x128xbf16>, vector<256x128xf32> -> vector<256x128xf32>
    %42 = arith.addf %35, %41 : vector<256x128xf32>
    %c0_51 = arith.constant 0 : index
    %c2_52 = arith.constant 2 : index
    %c0_53 = arith.constant 0 : index
    %c0_54 = arith.constant 0 : index
    %43 = vector.load %arg1[%c0_51, %c2_52, %c0_53, %c0_54] : memref<1x18x18x4xbf16, #tpu.memory_space<vmem>>, vector<1x16x16x4xbf16>
    %44 = vector.shape_cast %43 : vector<1x16x16x4xbf16> to vector<16x16x4xbf16>
    %45 = vector.shape_cast %44 : vector<16x16x4xbf16> to vector<256x4xbf16>
    %c2_55 = arith.constant 2 : index
    %c0_56 = arith.constant 0 : index
    %c0_57 = arith.constant 0 : index
    %c0_58 = arith.constant 0 : index
    %46 = vector.load %arg2[%c2_55, %c0_56, %c0_57, %c0_58] : memref<3x3x4x128xbf16, #tpu.memory_space<vmem>>, vector<1x1x4x128xbf16>
    %47 = vector.shape_cast %46 : vector<1x1x4x128xbf16> to vector<4x128xbf16>
    %cst_59 = arith.constant dense<0.000000e+00> : vector<256x128xf32>
    %48 = tpu.matmul %45, %47, %cst_59 {dimension_numbers = #tpu.dot_dimension_numbers<[1], [0], [0], [1], [0, 0, 1, 1], [], []>} : vector<256x4xbf16>, vector<4x128xbf16>, vector<256x128xf32> -> vector<256x128xf32>
    %49 = arith.addf %42, %48 : vector<256x128xf32>
    %c0_60 = arith.constant 0 : index
    %c2_61 = arith.constant 2 : index
    %c1_62 = arith.constant 1 : index
    %c0_63 = arith.constant 0 : index
    %50 = vector.load %arg1[%c0_60, %c2_61, %c1_62, %c0_63] : memref<1x18x18x4xbf16, #tpu.memory_space<vmem>>, vector<1x16x16x4xbf16>
    %51 = vector.shape_cast %50 : vector<1x16x16x4xbf16> to vector<16x16x4xbf16>
    %52 = vector.shape_cast %51 : vector<16x16x4xbf16> to vector<256x4xbf16>
    %c2_64 = arith.constant 2 : index
    %c1_65 = arith.constant 1 : index
    %c0_66 = arith.constant 0 : index
    %c0_67 = arith.constant 0 : index
    %53 = vector.load %arg2[%c2_64, %c1_65, %c0_66, %c0_67] : memref<3x3x4x128xbf16, #tpu.memory_space<vmem>>, vector<1x1x4x128xbf16>
    %54 = vector.shape_cast %53 : vector<1x1x4x128xbf16> to vector<4x128xbf16>
    %cst_68 = arith.constant dense<0.000000e+00> : vector<256x128xf32>
    %55 = tpu.matmul %52, %54, %cst_68 {dimension_numbers = #tpu.dot_dimension_numbers<[1], [0], [0], [1], [0, 0, 1, 1], [], []>} : vector<256x4xbf16>, vector<4x128xbf16>, vector<256x128xf32> -> vector<256x128xf32>
    %56 = arith.addf %49, %55 : vector<256x128xf32>
    %c0_69 = arith.constant 0 : index
    %c2_70 = arith.constant 2 : index
    %c2_71 = arith.constant 2 : index
    %c0_72 = arith.constant 0 : index
    %57 = vector.load %arg1[%c0_69, %c2_70, %c2_71, %c0_72] : memref<1x18x18x4xbf16, #tpu.memory_space<vmem>>, vector<1x16x16x4xbf16>
    %58 = vector.shape_cast %57 : vector<1x16x16x4xbf16> to vector<16x16x4xbf16>
    %59 = vector.shape_cast %58 : vector<16x16x4xbf16> to vector<256x4xbf16>
    %c2_73 = arith.constant 2 : index
    %c2_74 = arith.constant 2 : index
    %c0_75 = arith.constant 0 : index
    %c0_76 = arith.constant 0 : index
    %60 = vector.load %arg2[%c2_73, %c2_74, %c0_75, %c0_76] : memref<3x3x4x128xbf16, #tpu.memory_space<vmem>>, vector<1x1x4x128xbf16>
    %61 = vector.shape_cast %60 : vector<1x1x4x128xbf16> to vector<4x128xbf16>
    %cst_77 = arith.constant dense<0.000000e+00> : vector<256x128xf32>
    %62 = tpu.matmul %59, %61, %cst_77 {dimension_numbers = #tpu.dot_dimension_numbers<[1], [0], [0], [1], [0, 0, 1, 1], [], []>} : vector<256x4xbf16>, vector<4x128xbf16>, vector<256x128xf32> -> vector<256x128xf32>
    %63 = arith.addf %56, %62 : vector<256x128xf32>
    %c0_78 = arith.constant 0 : index
    %c0_79 = arith.constant 0 : index
    %64 = vector.load %arg3[%c0_78, %c0_79] : memref<1x128xf32, #tpu.memory_space<vmem>>, vector<1x128xf32>
    %65 = vector.broadcast %64 : vector<1x128xf32> to vector<256x128xf32>
    %66 = arith.addf %63, %65 : vector<256x128xf32>
    %cst_80 = arith.constant 0.000000e+00 : f32
    %67 = vector.broadcast %cst_80 : f32 to vector<256x128xf32>
    %68 = arith.maximumf %66, %67 : vector<256x128xf32>
    %cst_81 = arith.constant dense<0.000000e+00> : vector<128xf32>
    %69 = vector.multi_reduction <add>, %68, %cst_81 [0] : vector<256x128xf32> to vector<128xf32>
    %70 = vector.shape_cast %69 : vector<128xf32> to vector<1x128xf32>
    %cst_82 = arith.constant 3.906250e-03 : f32
    %71 = vector.broadcast %cst_82 : f32 to vector<1x128xf32>
    %72 = arith.mulf %70, %71 : vector<1x128xf32>
    %73 = arith.truncf %72 : vector<1x128xf32> to vector<1x128xbf16>
    %c0_83 = arith.constant 0 : index
    %c0_84 = arith.constant 0 : index
    %74 = vector.load %arg4[%c0_83, %c0_84] : memref<128x128xbf16, #tpu.memory_space<vmem>>, vector<128x128xbf16>
    %cst_85 = arith.constant dense<0.000000e+00> : vector<1x128xf32>
    %75 = tpu.matmul %73, %74, %cst_85 {dimension_numbers = #tpu.dot_dimension_numbers<[1], [0], [0], [1], [0, 0, 1, 1], [], []>} : vector<1x128xbf16>, vector<128x128xbf16>, vector<1x128xf32> -> vector<1x128xf32>
    %c0_86 = arith.constant 0 : index
    %c0_87 = arith.constant 0 : index
    %76 = vector.load %arg5[%c0_86, %c0_87] : memref<1x128xf32, #tpu.memory_space<vmem>>, vector<1x128xf32>
    %77 = arith.addf %75, %76 : vector<1x128xf32>
    %cst_88 = arith.constant 0.000000e+00 : f32
    %78 = vector.broadcast %cst_88 : f32 to vector<1x128xf32>
    %79 = arith.subf %78, %77 : vector<1x128xf32>
    %80 = math.exp %79 : vector<1x128xf32>
    %cst_89 = arith.constant 1.000000e+00 : f32
    %81 = vector.broadcast %cst_89 : f32 to vector<1x128xf32>
    %82 = arith.addf %81, %80 : vector<1x128xf32>
    %cst_90 = arith.constant 1.000000e+00 : f32
    %83 = vector.broadcast %cst_90 : f32 to vector<1x128xf32>
    %84 = arith.divf %83, %82 : vector<1x128xf32>
    %85 = vector.broadcast %84 : vector<1x128xf32> to vector<256x128xf32>
    %86 = arith.mulf %68, %85 : vector<256x128xf32>
    %87 = vector.shape_cast %86 : vector<256x128xf32> to vector<16x16x128xf32>
    %c0_91 = arith.constant 0 : index
    %c0_92 = arith.constant 0 : index
    %c0_93 = arith.constant 0 : index
    %c0_94 = arith.constant 0 : index
    %88 = vector.load %arg6[%c0_91, %c0_92, %c0_93, %c0_94] : memref<1x16x16x128xf32, #tpu.memory_space<vmem>>, vector<1x16x16x128xf32>
    %89 = vector.shape_cast %88 : vector<1x16x16x128xf32> to vector<16x16x128xf32>
    %90 = vector.shape_cast %87 : vector<16x16x128xf32> to vector<1x16x16x128xf32>
    tpu.vector_store %arg6[%c0_91, %c0_92, %c0_93, %c0_94], %90 {strides = array<i32>} : memref<1x16x16x128xf32, #tpu.memory_space<vmem>>, vector<1x16x16x128xf32>,
    return
  }
  func.func @transform_0(%arg0: i32) -> (i32, i32, i32, i32) {
    %c0_i32 = arith.constant 0 : i32
    %c0_i32_0 = arith.constant 0 : i32
    %c0_i32_1 = arith.constant 0 : i32
    %c0_i32_2 = arith.constant 0 : i32
    return %arg0, %c0_i32, %c0_i32_0, %c0_i32_1 : i32, i32, i32, i32
  }
  func.func @transform_1(%arg0: i32) -> (i32, i32, i32, i32) {
    %c0_i32 = arith.constant 0 : i32
    %c0_i32_0 = arith.constant 0 : i32
    %c0_i32_1 = arith.constant 0 : i32
    %c0_i32_2 = arith.constant 0 : i32
    %c0_i32_3 = arith.constant 0 : i32
    return %c0_i32, %c0_i32_0, %c0_i32_1, %c0_i32_2 : i32, i32, i32, i32
  }
  func.func @transform_2(%arg0: i32) -> (i32, i32) {
    %c0_i32 = arith.constant 0 : i32
    %c0_i32_0 = arith.constant 0 : i32
    %c0_i32_1 = arith.constant 0 : i32
    return %c0_i32, %c0_i32_0 : i32, i32
  }
  func.func @transform_3(%arg0: i32) -> (i32, i32) {
    %c0_i32 = arith.constant 0 : i32
    %c0_i32_0 = arith.constant 0 : i32
    %c0_i32_1 = arith.constant 0 : i32
    return %c0_i32, %c0_i32_0 : i32, i32
  }
  func.func @transform_4(%arg0: i32) -> (i32, i32) {
    %c0_i32 = arith.constant 0 : i32
    %c0_i32_0 = arith.constant 0 : i32
    %c0_i32_1 = arith.constant 0 : i32
    return %c0_i32, %c0_i32_0 : i32, i32
  }
  func.func @transform_5(%arg0: i32) -> (i32, i32, i32, i32) {
    %c0_i32 = arith.constant 0 : i32
    %c0_i32_0 = arith.constant 0 : i32
    %c0_i32_1 = arith.constant 0 : i32
    %c0_i32_2 = arith.constant 0 : i32
    return %arg0, %c0_i32, %c0_i32_0, %c0_i32_1 : i32, i32, i32, i32
  }
}

</mosaic_0001>

<bundles_post_ra>
// kernel: tpu_custom_call.1
= control target key start
LH: loop header
LB: loop body
LE: loop exit
PB: predicated region body
PF: predicated region fallthrough
CT: control target
= control target key end

     0   :  { %10 = vsyncpa [#allocation3], 0  ;;  %s8921_s0 = inlined_call_operand.vmem [shape: bf16[2,18,18,4], index: 0, kind: input, shape index: {}]   ;;  %s8922_s1 = inlined_call_operand.vmem [shape: bf16[3,3,4,128], index: 1, kind: input, shape index: {}]   ;;  %s8923_s2 = inlined_call_operand.vmem [shape: f32[1,128], index: 2, kind: input, shape index: {}]   ;;  %s8924_s3 = inlined_call_operand.vmem [shape: bf16[128,128], index: 3, kind: input, shape index: {}]   ;;  %s8925_s4 = inlined_call_operand.vmem [shape: f32[1,128], index: 4, kind: input, shape index: {}]   ;;  %s8926_s5 = inlined_call_operand.hbm [shape: f32[2,16,16,128], index: 5, kind: output, shape index: {}]  }
   0x1   :  { %12 = vsyncpa [#allocation3 + $0x1], 0  ;;  %s6713_s18 = smov 0   ;;  %s6715_s19 = smov 0  }
   0x2   :  { %s6717_s20 = smov 0   ;;  %s6719_s21 = smov 0  }
   0x3 LB: > { %s6734_s22 = sadd.s32 4294967295, %s6676_s21   ;;  %s5148_s23 = sadd.s32 4294967294, %s6676_s21   ;;  %s6676_s21 = sphi %s6719_s21, %s9044_s21   ;;  %s6672_s20 = sphi %s6717_s20, %s9043_s20   ;;  %s6668_s19 = sphi %s6715_s19, %s9042_s19   ;;  %s6664_s18 = sphi %s6713_s18, %s9041_s18  }
   0x4   : > { %s6738_s24 = sadd.s32 1, %s6676_s21   ;;  %s135_s25 = sadd.s32 1, %s6672_s20 }
   0x5   : > { %s132_s26 = ssub.s32 %s6676_s21, %s6738_s24  ;;  %p145_p0 = scmp.ne.s32.totalorder %s6672_s20, %s6668_s19 }
   0x6   : > { %p133_p1 = scmp.eq.s32.totalorder %s132_s26, 0  ;;  %p146_p2 = scmp.eq.s32.totalorder %s6734_s22, 1 }
   0x7   : > { %p151_p3 = scmp.ne.s32.totalorder %s6668_s19, %s6664_s18  ;;  %p152_p4 = scmp.eq.s32.totalorder %s5148_s23, 1 }
   0x8   : > { %s6749_s27 = scalar_select %p133_p1, %s6672_s20, %s135_s25  }
   0x9   : > { %p6751_p5 = por %p146_p2, %p145_p0  ;;  %p6755_p6 = por %p152_p4, %p151_p3 }
   0xa   : > { %p5151_p7 = scmp.ge.s32.totalorder %s6676_s21, 1  ;;  %p190_p8 = scmp.lt.s32.totalorder %s6676_s21, 3 }
   0xc   : > { %p191_p9 = pnand %p5151_p7, %p190_p8 }
   0xe   : > { %194 = sbr.rel (%p191_p9) target bundleno = 947 (0x3b3), region = 40 }
  0x15   : > { %vm759_vm0 = vcmask 1041408   ;;  %v5381_v0 = vld [vmem:[%s8922_s1 + $0x8] sm:$0x3]  ;;  %v5154_v1 = vld [vmem:[%s8922_s1 + $0x2] sm:$0x3]  ;;  %p218_p10 = scmp.lt.s32.totalorder %s6734_s22, 1 }
  0x16   : > { %6453 = vmatprep.subr.msk.bf16.mxu0 %vm759_vm0, %v5381_v0  ;;  %6449 = vmatprep.subr.msk.bf16.mxu1 %vm759_vm0, %v5154_v1  ;;  %v2563_v2 = vsel %vm759_vm0, %v5381_v0, 0  ;;  %v761_v3 = vsel %vm759_vm0, %v5154_v1, 0  ;;  %vm273_vm1 = vsmask.f32 3328  ;;  %v5446_v4 = vld [vmem:[%s8922_s1 + $0xa] sm:$0x3] }
  0x17   : > { %6004 = vmatpush3.bf16.msra.mxu0 %v2563_v2  ;;  %5868 = vmatpush3.bf16.msra.mxu1 %v761_v3  ;;  %s219_s9 = scalar_select %p218_p10, %s6734_s22, 1  ;;  %vm274_vm2 = vsmask.f32 7440  ;;  %v8961_v29 = vmov 0  ;;  %vm710_vm4 = vcmask 31744   ;;  %v6820_v60 = vsel %vm759_vm0, %v5446_v4, 0 }
  0x18   : > { %6454 = vmatprep.subr.msk.bf16.mxu0 %vm759_vm0, %v5446_v4  ;;  %vm6798_vm3 = vmor %vm273_vm1, %vm274_vm2  ;;  %vm1264_vm5 = vcmask 1042432   ;;  %vm1265_vm6 = vcmask 1046532   ;;  %vm6679_vm8 = vmmov 0   ;;  %s215_s16 = sand.u32 1, %s6668_s19   ;;  %s5704_s25 = sshll.u32 %s6734_s22, 12 }
  0x19   : > { %s6458_s12 = smul.u32 216, %s219_s9  ;;  %v8962_v29 = vsel %vm6798_vm3, 4294967295, %v8961_v29  ;;  %vm7209_vm7 = vmor %vm1264_vm5, %vm1265_vm6  ;;  %s5152_s17 = sshll.u32 %s215_s16, 8 }
  0x1a   : > { %8963 = vst [vmem:[#allocation5_spill] sm:$0xff] %v8962_v29  ;;  %s8795_s23 = scalar_lea.vmem [#allocation2], %s5152_s17  ;;  %s8854_s6 = scalar_lea.hbm %s8926_s5, %s5704_s25 }
  0x1b   : > { %s6780_s15 = scalar_lea.vmem %s8921_s0, %s6458_s12  ;;  %s5086_s26 = sshll.u32 %s8795_s23, 4  ;;  %s8856_s26 = int_to_ptr.vmem [resolvable:$true] %s5086_s26 }
  0x1c   : > { %v224_v5 = vld [vmem:[%s6780_s15] sm:$0xf]  ;;  %v225_v6 = vld [vmem:[%s6780_s15 + $0x4] sm:$0xf]  ;;  %v257_v7 = vld [vmem:[%s6780_s15 + $0x8] sm:$0x1] }
  0x1d   : > { %v277_v8 = vshrl.u32 %v224_v5, 16  ;;  %v280_v9 = vshll.u32 %v224_v5, 16  ;;  %v286_v10 = vshll.u32 %v225_v6, 16  ;;  %v290_v11 = vshrl.u32 %v225_v6, 16  ;;  %v5333_v12 = vld [vmem:[%s6780_s15 + $0xc] sm:$0xf] }
  0x1e   : > { %v296_v13 = vshll.u32 %v257_v7, 16  ;;  %v6787_v14 = vld [vmem:[%s6780_s15 + $0x10] sm:$0xf]  ;;  %v6790_v15 = vld [vmem:[%s6780_s15 + $0x14] sm:$0x1]  ;;  %v2081_v21 = vshrl.u32 %v5333_v12, 16 }
  0x1f   : > { %v279_v16 = vrot.slane %v277_v8, 4  ;;  %v282_v17 = vrot.slane %v280_v9, 5  ;;  %v288_v18 = vrot.slane %v286_v10, 5  ;;  %v292_v19 = vrot.slane %v290_v11, 4  ;;  %v226_v28 = vld [vmem:[%s6780_s15 + $0xc] sm:$0xf] }
  0x20   : > { %v298_v20 = vrot.slane %v296_v13, 5  ;;  %v2084_v22 = vshll.u32 %v5333_v12, 16  ;;  %v2090_v23 = vshll.u32 %v6787_v14, 16  ;;  %v2094_v26 = vshrl.u32 %v6787_v14, 16  ;;  %v227_v33 = vld [vmem:[%s6780_s15 + $0x10] sm:$0xf] }
  0x21   : > { %v283_v24 = vor.u32 %v282_v17, %v279_v16  ;;  %v293_v25 = vor.u32 %v292_v19, %v288_v18  ;;  %v2100_v27 = vshll.u32 %v6790_v15, 16  ;;  %v2083_v30 = vrot.slane %v2081_v21, 4  ;;  %v258_v39 = vld [vmem:[%s6780_s15 + $0x14] sm:$0x1]  ;;  %v5336_v50 = vld [vmem:[%s6780_s15 + $0x18] sm:$0xf] }
  0x22   : > { %v2086_v31 = vrot.slane %v2084_v22, 5  ;;  %v2092_v32 = vrot.slane %v2090_v23, 5  ;;  %v2096_v36 = vrot.slane %v2094_v26, 4  ;;  %v301_v40 = vshrl.u32 %v226_v28, 16  ;;  %v6810_v55 = vld [vmem:[%s6780_s15 + $0x1c] sm:$0xf] }
  0x23   : > { %v284_v34 = vrot.slane %v283_v24, 4  ;;  %v294_v35 = vrot.slane %v293_v25, 4  ;;  %v2102_v38 = vrot.slane %v2100_v27, 5  ;;  %v304_v41 = vshll.u32 %v226_v28, 16  ;;  %v6817_v59 = vld [vmem:[%s6780_s15 + $0x20] sm:$0x1] }
  0x24   : > { %v2087_v37 = vor.u32 %v2086_v31, %v2083_v30  ;;  %v2097_v44 = vor.u32 %v2096_v36, %v2092_v32  ;;  %v310_v45 = vshll.u32 %v227_v33, 16  ;;  %v303_v48 = vrot.slane %v301_v40, 4  ;;  %v228_v9 = vld [vmem:[%s6780_s15 + $0x18] sm:$0xf]  ;;  %v229_v16 = vld [vmem:[%s6780_s15 + $0x1c] sm:$0xf] }
  0x25   : > { %v289_v42 = vsel %vm6798_vm3, %v284_v34, %v288_v18  ;;  %v299_v43 = vsel %vm6798_vm3, %v294_v35, %v298_v20  ;;  %v306_v49 = vrot.slane %v304_v41, 5  ;;  %v314_v53 = vshrl.u32 %v227_v33, 16  ;;  %v259_v23 = vld [vmem:[%s6780_s15 + $0x20] sm:$0x1]  ;;  %v5339_v31 = vld [vmem:[%s6780_s15 + $0x24] sm:$0xf] }
  0x26   : > { %v5155_v46 = vcombine.low %v289_v42, %v299_v43  ;;  %v2088_v47 = vrot.slane %v2087_v37, 4  ;;  %v2098_v51 = vrot.slane %v2097_v44, 4  ;;  %v312_v52 = vrot.slane %v310_v45, 5  ;;  %v5340_v36 = vld [vmem:[%s6780_s15 + $0x28] sm:$0xf]  ;;  %s8880_s7 = scalar_lea.sflag [#allocation3], %s215_s16 }
  0x27   : > { %v320_v54 = vshll.u32 %v258_v39, 16  ;;  %v307_v58 = vor.u32 %v306_v49, %v303_v48  ;;  %v316_v62 = vrot.slane %v314_v53, 4  ;;  %v2105_v0 = vshrl.u32 %v5336_v50, 16  ;;  %v5341_v43 = vld [vmem:[%s6780_s15 + $0x2c] sm:$0x1]  ;;  %s6614_s8 = scalar_lea.vmem %s8856_s26, 4096 }
  0x28   : > { %5869 = vmatprep.mubr.msk.bf16.mxu1 %vm710_vm4, %v5155_v46  ;;  %v2093_v56 = vsel %vm6798_vm3, %v2088_v47, %v2092_v32  ;;  %v2103_v61 = vsel %vm6798_vm3, %v2098_v51, %v2102_v38  ;;  %v2108_v3 = vshll.u32 %v5336_v50, 16  ;;  %v2114_v5 = vshll.u32 %v6810_v55, 16  ;;  %v230_v50 = vld [vmem:[%s6780_s15 + $0x24] sm:$0xf]  ;;  %p6615_p11 = scmp.ne.s32.totalorder %s8856_s26, %s6614_s8  ;;  %s6680_s9 = smov [#allocation2]  }
  0x29   : > { %v322_v63 = vrot.slane %v320_v54, 5  ;;  %v5382_v1 = vcombine.low %v2093_v56, %v2103_v61  ;;  %v308_v2 = vrot.slane %v307_v58, 4  ;;  %v317_v6 = vor.u32 %v316_v62, %v312_v52  ;;  %v231_v56 = vld [vmem:[%s6780_s15 + $0x28] sm:$0xf]  ;;  %s6618_s10 = sshll.u32 %s6680_s9, 4  ;;  %s6619_s10 = int_to_ptr.vmem [resolvable:$false] %s6618_s10 }
  0x2a   : > { %v2107_v7 = vrot.slane %v2105_v0, 4  ;;  %v2118_v8 = vshrl.u32 %v6810_v55, 16  ;;  %v2124_v4 = vshll.u32 %v6817_v59, 16  ;;  %v2110_v12 = vrot.slane %v2108_v3, 5  ;;  %p6616_p12 = pnand %p6615_p11, %p6751_p5  ;;  %s6620_s11 = scalar_lea.vmem %s6619_s10, 8192 }
  0x2b   : > { %6005 = vmatprep.mubr.msk.bf16.mxu0 %vm710_vm4, %v5382_v1  ;;  %v313_v11 = vsel %vm6798_vm3, %v308_v2, %v312_v52  ;;  %v2116_v13 = vrot.slane %v2114_v5, 5  ;;  %v318_v17 = vrot.slane %v317_v6, 4  ;;  %v2831_v20 = vrot.slane %v6810_v55, 5  ;;  %v260_v2 = vld [vmem:[%s6780_s15 + $0x2c] sm:$0x1]  ;;  %p6621_p0 = scmp.lt.s32.totalorder %s8856_s26, %s6619_s10  ;;  %p6622_p1 = scmp.lt.s32.totalorder %s6620_s11, %s6614_s8 }
  0x2c   : > { %v2120_v18 = vrot.slane %v2118_v8, 4  ;;  %v2126_v19 = vrot.slane %v2124_v4, 5  ;;  %v2111_v21 = vor.u32 %v2110_v12, %v2107_v7  ;;  %v325_v24 = vshrl.u32 %v228_v9, 16  ;;  %p6617_p13 = pneg %p6616_p12 }
  0x2d   : > { %v328_v25 = vshll.u32 %v228_v9, 16  ;;  %v323_v26 = vsel %vm6798_vm3, %v318_v17, %v322_v63  ;;  %v334_v28 = vshll.u32 %v229_v16, 16  ;;  %v338_v30 = vshrl.u32 %v229_v16, 16  ;;  %v5342_v9 = vld [vmem:[%s6780_s15 + $0x30] sm:$0xf]  ;;  %p6623_p2 = por %p6622_p1, %p6621_p0 }
  0x2e   : > { %v2121_v27 = vor.u32 %v2120_v18, %v2116_v13  ;;  %v5156_v32 = vcombine.low %v313_v11, %v323_v26  ;;  %v2112_v33 = vrot.slane %v2111_v21, 4  ;;  %v327_v34 = vrot.slane %v325_v24, 4  ;;  %v5343_v17 = vld [vmem:[%s6780_s15 + $0x34] sm:$0xf] }
  0x2f   : > { %v330_v35 = vrot.slane %v328_v25, 5  ;;  %v336_v38 = vrot.slane %v334_v28, 5  ;;  %v340_v39 = vrot.slane %v338_v30, 4  ;;  %v344_v40 = vshll.u32 %v259_v23, 16  ;;  %v5344_v25 = vld [vmem:[%s6780_s15 + $0x38] sm:$0x1]  ;;  %p6624_p3 = pnand %p6623_p2, %p6617_p13 }
  0x30   : > { %v2122_v37 = vrot.slane %v2121_v27, 4  ;;  %5870 = vmatmul.mubr.msk.bf16.vlgmr.msra.gmra.mrb[0].mxu1 %vm710_vm4, %v5156_v32  ;;  %v2117_v41 = vsel %vm6798_vm3, %v2112_v33, %v2116_v13  ;;  %v2129_v44 = vshrl.u32 %v5339_v31, 16  ;;  %v2132_v45 = vshll.u32 %v5339_v31, 16 }
  0x31   : > { %v331_v42 = vor.u32 %v330_v35, %v327_v34  ;;  %v341_v47 = vor.u32 %v340_v39, %v336_v38  ;;  %v346_v48 = vrot.slane %v344_v40, 5  ;;  %v2138_v49 = vshll.u32 %v5340_v36, 16 }
  0x32   : > { %v2127_v46 = vsel %vm6798_vm3, %v2122_v37, %v2126_v19  ;;  %v2131_v53 = vrot.slane %v2129_v44, 4  ;;  %v2134_v54 = vrot.slane %v2132_v45, 5  ;;  %v2142_v62 = vshrl.u32 %v5340_v36, 16  ;;  %v232_v37 = vld [vmem:[%s6780_s15 + $0x30] sm:$0xf] }
  0x33   : > { %v5383_v51 = vcombine.low %v2117_v41, %v2127_v46  ;;  %v332_v52 = vrot.slane %v331_v42, 4  ;;  %v342_v58 = vrot.slane %v341_v47, 4  ;;  %v2140_v61 = vrot.slane %v2138_v49, 5  ;;  %v233_v42 = vld [vmem:[%s6780_s15 + $0x34] sm:$0xf] }
  0x34   : > { %v2148_v63 = vshll.u32 %v5341_v43, 16  ;;  %v2135_v1 = vor.u32 %v2134_v54, %v2131_v53  ;;  %v349_v3 = vshrl.u32 %v230_v50, 16  ;;  %v352_v5 = vshll.u32 %v230_v50, 16  ;;  %v261_v47 = vld [vmem:[%s6780_s15 + $0x38] sm:$0x1] }
  0x35   : > { %6006 = vmatmul.mubr.msk.bf16.vlgmr.msra.gmra.mrb[0].mxu0 %vm710_vm4, %v5383_v51  ;;  %v337_v0 = vsel %vm6798_vm3, %v332_v52, %v336_v38  ;;  %v347_v6 = vsel %vm6798_vm3, %v342_v58, %v346_v48  ;;  %v2144_v7 = vrot.slane %v2142_v62, 4  ;;  %v358_v4 = vshll.u32 %v231_v56, 16  ;;  %v5345_v58 = vld [vmem:[%s6780_s15 + $0x3c] sm:$0xf] }
  0x36   : > { %6038 = vmatpush3.bf16.msra.mxu0 %v6820_v60  ;;  %v2150_v8 = vrot.slane %v2148_v63, 5  ;;  %v5157_v11 = vcombine.low %v337_v0, %v347_v6  ;;  %v2136_v12 = vrot.slane %v2135_v1, 4  ;;  %v351_v13 = vrot.slane %v349_v3, 4  ;;  %v5346_v1 = vld [vmem:[%s6780_s15 + $0x40] sm:$0xf] }
  0x37   : > { %v354_v16 = vrot.slane %v352_v5, 5  ;;  %v2145_v18 = vor.u32 %v2144_v7, %v2140_v61  ;;  %v360_v19 = vrot.slane %v358_v4, 5  ;;  %v362_v21 = vshrl.u32 %v231_v56, 16 }
  0x38   : > { %v368_v23 = vshll.u32 %v260_v2, 16  ;;  %5873 = vmatprep.mubr.msk.bf16.mxu1 %vm710_vm4, %v5157_v11  ;;  %v2141_v60 = vsel %vm6798_vm3, %v2136_v12, %v2140_v61  ;;  %v2153_v26 = vshrl.u32 %v5342_v9, 16  ;;  %v2156_v27 = vshll.u32 %v5342_v9, 16  ;;  %v5347_v9 = vld [vmem:[%s6780_s15 + $0x44] sm:$0x1] }
  0x39   : > { %v355_v24 = vor.u32 %v354_v16, %v351_v13  ;;  %v2146_v28 = vrot.slane %v2145_v18, 4  ;;  %v364_v30 = vrot.slane %v362_v21, 4  ;;  %v2162_v32 = vshll.u32 %v5343_v17, 16  ;;  %v234_v18 = vld [vmem:[%s6780_s15 + $0x3c] sm:$0xf] }
  0x3a   : > { %v370_v31 = vrot.slane %v368_v23, 5  ;;  %v2155_v34 = vrot.slane %v2153_v26, 4  ;;  %v2158_v35 = vrot.slane %v2156_v27, 5  ;;  %v2166_v36 = vshrl.u32 %v5343_v17, 16 }
  0x3b   : > { %v356_v33 = vrot.slane %v355_v24, 4  ;;  %v2151_v38 = vsel %vm6798_vm3, %v2146_v28, %v2150_v8  ;;  %v365_v39 = vor.u32 %v364_v30, %v360_v19  ;;  %v2164_v40 = vrot.slane %v2162_v32, 5  ;;  %v235_v24 = vld [vmem:[%s6780_s15 + $0x40] sm:$0xf] }
  0x3c   : > { %v2172_v41 = vshll.u32 %v5344_v25, 16  ;;  %v5384_v43 = vcombine.low %v2141_v60, %v2151_v38  ;;  %v2159_v45 = vor.u32 %v2158_v35, %v2155_v34  ;;  %v2168_v46 = vrot.slane %v2166_v36, 4 }
  0x3d   : > { %v361_v44 = vsel %vm6798_vm3, %v356_v33, %v360_v19  ;;  %v366_v48 = vrot.slane %v365_v39, 4  ;;  %v373_v50 = vshrl.u32 %v232_v37, 16  ;;  %v376_v51 = vshll.u32 %v232_v37, 16  ;;  %v262_v37 = vld [vmem:[%s6780_s15 + $0x44] sm:$0x1] }
  0x3e   : > { %v2174_v49 = vrot.slane %v2172_v41, 5  ;;  %6009 = vmatprep.mubr.msk.bf16.mxu0 %vm710_vm4, %v5384_v43  ;;  %v2160_v52 = vrot.slane %v2159_v45, 4  ;;  %v2169_v53 = vor.u32 %v2168_v46, %v2164_v40  ;;  %v382_v54 = vshll.u32 %v233_v42, 16  ;;  %v5348_v39 = vld [vmem:[%s6780_s15 + $0x48] sm:$0xf] }
  0x3f   : > { %v386_v56 = vshrl.u32 %v233_v42, 16  ;;  %v371_v61 = vsel %vm6798_vm3, %v366_v48, %v370_v31  ;;  %v375_v62 = vrot.slane %v373_v50, 4  ;;  %v378_v63 = vrot.slane %v376_v51, 5 }
  0x40   : > { %v392_v0 = vshll.u32 %v261_v47, 16  ;;  %v5158_v2 = vcombine.low %v361_v44, %v371_v61  ;;  %v2165_v3 = vsel %vm6798_vm3, %v2160_v52, %v2164_v40  ;;  %v2170_v5 = vrot.slane %v2169_v53, 4  ;;  %v5349_v44 = vld [vmem:[%s6780_s15 + $0x4c] sm:$0xf] }
  0x41   : > { %v384_v6 = vrot.slane %v382_v54, 5  ;;  %v379_v7 = vor.u32 %v378_v63, %v375_v62  ;;  %v388_v8 = vrot.slane %v386_v56, 4  ;;  %v2177_v11 = vshrl.u32 %v5345_v58, 16  ;;  %v5350_v56 = vld [vmem:[%s6780_s15 + $0x50] sm:$0x1] }
  0x42   : > { %v394_v4 = vrot.slane %v392_v0, 5  ;;  %5874 = vmatmul.mubr.msk.bf16.gmra.mrb[4].mxu1 %vm710_vm4, %v5158_v2  ;;  %v2175_v12 = vsel %vm6798_vm3, %v2170_v5, %v2174_v49  ;;  %v2180_v13 = vshll.u32 %v5345_v58, 16  ;;  %v2186_v16 = vshll.u32 %v5346_v1, 16  ;;  %v236_v62 = vld [vmem:[%s6780_s15 + $0x48] sm:$0xf] }
  0x43   : > { %v2190_v17 = vshrl.u32 %v5346_v1, 16  ;;  %v5385_v19 = vcombine.low %v2165_v3, %v2175_v12  ;;  %v380_v21 = vrot.slane %v379_v7, 4  ;;  %v389_v23 = vor.u32 %v388_v8, %v384_v6  ;;  %v237_v3 = vld [vmem:[%s6780_s15 + $0x4c] sm:$0xf]  ;;  %v263_v12 = vld [vmem:[%s6780_s15 + $0x50] sm:$0x1] }
  0x44   : > { %v2179_v60 = vrot.slane %v2177_v11, 4  ;;  %v2182_v25 = vrot.slane %v2180_v13, 5  ;;  %v2188_v26 = vrot.slane %v2186_v16, 5  ;;  %v2196_v28 = vshll.u32 %v5347_v9, 16 }
  0x45   : > { %v2192_v27 = vrot.slane %v2190_v17, 4  ;;  %6010 = vmatmul.mubr.msk.bf16.gmra.mrb[4].mxu0 %vm710_vm4, %v5385_v19  ;;  %v385_v30 = vsel %vm6798_vm3, %v380_v21, %v384_v6  ;;  %v390_v31 = vrot.slane %v389_v23, 4  ;;  %v397_v32 = vshrl.u32 %v234_v18, 16  ;;  %v5351_v21 = vld [vmem:[%s6780_s15 + $0x54] sm:$0xf] }
  0x46   : > { %v400_v33 = vshll.u32 %v234_v18, 16  ;;  %v2183_v34 = vor.u32 %v2182_v25, %v2179_v60  ;;  %v2198_v36 = vrot.slane %v2196_v28, 5  ;;  %v406_v38 = vshll.u32 %v235_v24, 16 }
  0x47   : > { %v2193_v35 = vor.u32 %v2192_v27, %v2188_v26  ;;  %v395_v40 = vsel %vm6798_vm3, %v390_v31, %v394_v4  ;;  %v399_v41 = vrot.slane %v397_v32, 4  ;;  %v410_v43 = vshrl.u32 %v235_v24, 16  ;;  %v5352_v31 = vld [vmem:[%s6780_s15 + $0x58] sm:$0xf] }
  0x48   : > { %v402_v42 = vrot.slane %v400_v33, 5  ;;  %v5159_v45 = vcombine.low %v385_v30, %v395_v40  ;;  %v2184_v46 = vrot.slane %v2183_v34, 4  ;;  %v408_v48 = vrot.slane %v406_v38, 5 }
  0x49   : > { %v2194_v47 = vrot.slane %v2193_v35, 4  ;;  %v412_v50 = vrot.slane %v410_v43, 4  ;;  %v416_v51 = vshll.u32 %v262_v37, 16  ;;  %v2201_v52 = vshrl.u32 %v5348_v39, 16 }
  0x4a   : > { %v403_v49 = vor.u32 %v402_v42, %v399_v41  ;;  %5877 = vmatprep.mubr.msk.bf16.mxu1 %vm710_vm4, %v5159_v45  ;;  %v2189_v53 = vsel %vm6798_vm3, %v2184_v46, %v2188_v26  ;;  %v2204_v58 = vshll.u32 %v5348_v39, 16  ;;  %v2210_v61 = vshll.u32 %v5349_v44, 16  ;;  %v5353_v39 = vld [vmem:[%s6780_s15 + $0x5c] sm:$0x1]  ;;  %v238_v45 = vld [vmem:[%s6780_s15 + $0x54] sm:$0xf] }
  0x4b   : > { %v2199_v54 = vsel %vm6798_vm3, %v2194_v47, %v2198_v36  ;;  %v413_v1 = vor.u32 %v412_v50, %v408_v48  ;;  %v418_v2 = vrot.slane %v416_v51, 5  ;;  %v2203_v5 = vrot.slane %v2201_v52, 4  ;;  %v239_v50 = vld [vmem:[%s6780_s15 + $0x58] sm:$0xf] }
  0x4c   : > { %v5386_v63 = vcombine.low %v2189_v53, %v2199_v54  ;;  %v404_v0 = vrot.slane %v403_v49, 4  ;;  %v2206_v6 = vrot.slane %v2204_v58, 5  ;;  %v2212_v7 = vrot.slane %v2210_v61, 5 }
  0x4d   : > { %v2214_v8 = vshrl.u32 %v5349_v44, 16  ;;  %v414_v9 = vrot.slane %v413_v1, 4  ;;  %v2220_v11 = vshll.u32 %v5350_v56, 16  ;;  %v421_v13 = vshrl.u32 %v236_v62, 16 }
  0x4e   : > { %6013 = vmatprep.mubr.msk.bf16.mxu0 %vm710_vm4, %v5386_v63  ;;  %v409_v4 = vsel %vm6798_vm3, %v404_v0, %v408_v48  ;;  %v2207_v16 = vor.u32 %v2206_v6, %v2203_v5  ;;  %v424_v18 = vshll.u32 %v236_v62, 16  ;;  %v430_v19 = vshll.u32 %v237_v3, 16  ;;  %v264_v62 = vld [vmem:[%s6780_s15 + $0x5c] sm:$0x1]  ;;  %v5354_v5 = vld [vmem:[%s6780_s15 + $0x60] sm:$0xf] }
  0x4f   : > { %v2216_v17 = vrot.slane %v2214_v8, 4  ;;  %v419_v23 = vsel %vm6798_vm3, %v414_v9, %v418_v2  ;;  %v2222_v60 = vrot.slane %v2220_v11, 5  ;;  %v423_v24 = vrot.slane %v421_v13, 4  ;;  %v5355_v9 = vld [vmem:[%s6780_s15 + $0x64] sm:$0xf] }
  0x50   : > { %v434_v25 = vshrl.u32 %v237_v3, 16  ;;  %v5160_v26 = vcombine.low %v409_v4, %v419_v23  ;;  %v2208_v27 = vrot.slane %v2207_v16, 4  ;;  %v426_v30 = vrot.slane %v424_v18, 5 }
  0x51   : > { %v2217_v28 = vor.u32 %v2216_v17, %v2212_v7  ;;  %v432_v32 = vrot.slane %v430_v19, 5  ;;  %v440_v34 = vshll.u32 %v263_v12, 16  ;;  %v2225_v35 = vshrl.u32 %v5351_v21, 16  ;;  %v5356_v19 = vld [vmem:[%s6780_s15 + $0x68] sm:$0x1] }
  0x52   : > { %v436_v33 = vrot.slane %v434_v25, 4  ;;  %5878 = vmatmul.mubr.msk.bf16.gmra.mrb[8].mxu1 %vm710_vm4, %v5160_v26  ;;  %v2213_v36 = vsel %vm6798_vm3, %v2208_v27, %v2212_v7  ;;  %v427_v38 = vor.u32 %v426_v30, %v423_v24  ;;  %v2228_v40 = vshll.u32 %v5351_v21, 16  ;;  %v240_v27 = vld [vmem:[%s6780_s15 + $0x60] sm:$0xf] }
  0x53   : > { %v2218_v37 = vrot.slane %v2217_v28, 4  ;;  %v442_v42 = vrot.slane %v440_v34, 5  ;;  %v2227_v43 = vrot.slane %v2225_v35, 4  ;;  %v2234_v44 = vshll.u32 %v5352_v31, 16 }
  0x54   : > { %v437_v41 = vor.u32 %v436_v33, %v432_v32  ;;  %v428_v47 = vrot.slane %v427_v38, 4  ;;  %v2230_v48 = vrot.slane %v2228_v40, 5  ;;  %v2238_v49 = vshrl.u32 %v5352_v31, 16  ;;  %v6929_v33 = vld [vmem:[%s6780_s15 + $0x64] sm:$0xf] }
  0x55   : > { %v2223_v46 = vsel %vm6798_vm3, %v2218_v37, %v2222_v60  ;;  %v2236_v53 = vrot.slane %v2234_v44, 5  ;;  %v2244_v54 = vshll.u32 %v5353_v39, 16  ;;  %v445_v63 = vshrl.u32 %v238_v45, 16  ;;  %v265_v44 = vld [vmem:[%s6780_s15 + $0x68] sm:$0x1] }
  0x56   : > { %v5387_v51 = vcombine.low %v2213_v36, %v2223_v46  ;;  %v438_v52 = vrot.slane %v437_v41, 4  ;;  %v433_v56 = vsel %vm6798_vm3, %v428_v47, %v432_v32  ;;  %v2231_v58 = vor.u32 %v2230_v48, %v2227_v43 }
  0x57   : > { %v2240_v61 = vrot.slane %v2238_v49, 4  ;;  %v2246_v1 = vrot.slane %v2244_v54, 5  ;;  %v448_v2 = vshll.u32 %v238_v45, 16  ;;  %v454_v3 = vshll.u32 %v239_v50, 16 }
  0x58   : > { %6014 = vmatmul.mubr.msk.bf16.gmra.mrb[8].mxu0 %vm710_vm4, %v5387_v51  ;;  %v443_v0 = vsel %vm6798_vm3, %v438_v52, %v442_v42  ;;  %v2232_v7 = vrot.slane %v2231_v58, 4  ;;  %v447_v4 = vrot.slane %v445_v63, 4  ;;  %v458_v13 = vshrl.u32 %v239_v50, 16  ;;  %v5357_v51 = vld [vmem:[%s6780_s15 + $0x6c] sm:$0xf] }
  0x59   : > { %v5161_v6 = vcombine.low %v433_v56, %v443_v0  ;;  %v2241_v8 = vor.u32 %v2240_v61, %v2236_v53  ;;  %v450_v11 = vrot.slane %v448_v2, 5  ;;  %v456_v12 = vrot.slane %v454_v3, 5  ;;  %v6941_v58 = vld [vmem:[%s6780_s15 + $0x70] sm:$0xf]  ;;  %v6951_v2 = vld [vmem:[%s8922_s1] sm:$0x3] }
  0x5a   : > { %v464_v16 = vshll.u32 %v264_v62, 16  ;;  %v2237_v17 = vsel %vm6798_vm3, %v2232_v7, %v2236_v53  ;;  %v2249_v21 = vshrl.u32 %v5354_v5, 16  ;;  %v2252_v23 = vshll.u32 %v5354_v5, 16  ;;  %6450 = vmatprep.subr.msk.bf16.mxu1 %vm759_vm0, %v6951_v2 }
  0x5b   : > { %5881 = vmatprep.mubr.msk.bf16.mxu1 %vm710_vm4, %v5161_v6  ;;  %v2242_v18 = vrot.slane %v2241_v8, 4  ;;  %v451_v60 = vor.u32 %v450_v11, %v447_v4  ;;  %v460_v24 = vrot.slane %v458_v13, 4  ;;  %v2258_v26 = vshll.u32 %v5355_v9, 16  ;;  %v242_v8 = vld [vmem:[%s6780_s15 + $0x6c] sm:$0xf] }
  0x5c   : > { %v466_v25 = vrot.slane %v464_v16, 5  ;;  %v2251_v30 = vrot.slane %v2249_v21, 4  ;;  %v2254_v31 = vrot.slane %v2252_v23, 5  ;;  %v2262_v32 = vshrl.u32 %v5355_v9, 16  ;;  %v6964_v13 = vld [vmem:[%s8922_s1 + $0xc] sm:$0x3] }
  0x5d   : > { %v2247_v28 = vsel %vm6798_vm3, %v2242_v18, %v2246_v1  ;;  %v452_v35 = vrot.slane %v451_v60, 4  ;;  %v461_v36 = vor.u32 %v460_v24, %v456_v12  ;;  %v2260_v37 = vrot.slane %v2258_v26, 5  ;;  %v6946_v1 = vld [vmem:[%s6780_s15 + $0x74] sm:$0x1]  ;;  %v243_v21 = vld [vmem:[%s6780_s15 + $0x70] sm:$0xf]  ;;  %6455 = vmatprep.subr.msk.bf16.mxu0 %vm759_vm0, %v6964_v13 }
  0x5e   : > { %v5388_v34 = vcombine.low %v2237_v17, %v2247_v28  ;;  %v2255_v38 = vor.u32 %v2254_v31, %v2251_v30  ;;  %v2264_v39 = vrot.slane %v2262_v32, 4  ;;  %v2268_v40 = vshll.u32 %v5356_v19, 16 }
  0x5f   : > { %v469_v41 = vshrl.u32 %v240_v27, 16  ;;  %v457_v42 = vsel %vm6798_vm3, %v452_v35, %v456_v12  ;;  %v462_v43 = vrot.slane %v461_v36, 4  ;;  %v472_v45 = vshll.u32 %v240_v27, 16  ;;  %v266_v35 = vld [vmem:[%s6780_s15 + $0x74] sm:$0x1] }
  0x60   : > { %6017 = vmatprep.mubr.msk.bf16.mxu0 %vm710_vm4, %v5388_v34  ;;  %v478_v46 = vshll.u32 %v6929_v33, 16  ;;  %v2256_v47 = vrot.slane %v2255_v38, 4  ;;  %v2265_v48 = vor.u32 %v2264_v39, %v2260_v37  ;;  %v2270_v49 = vrot.slane %v2268_v40, 5 }
  0x61   : > { %v471_v50 = vrot.slane %v469_v41, 4  ;;  %v467_v52 = vsel %vm6798_vm3, %v462_v43, %v466_v25  ;;  %v474_v53 = vrot.slane %v472_v45, 5  ;;  %v482_v56 = vshrl.u32 %v6929_v33, 16 }
  0x62   : > { %v480_v54 = vrot.slane %v478_v46, 5  ;;  %v5162_v61 = vcombine.low %v457_v42, %v467_v52  ;;  %v2261_v62 = vsel %vm6798_vm3, %v2256_v47, %v2260_v37  ;;  %v2266_v63 = vrot.slane %v2265_v48, 4  ;;  %v5360_v37 = vld [vmem:[%s6780_s15 + $0x78] sm:$0xf]  ;;  %v6978_v42 = vld [vmem:[%s6780_s15 + $0x7c] sm:$0xf] }
  0x63   : > { %v488_v0 = vshll.u32 %v265_v44, 16  ;;  %v475_v3 = vor.u32 %v474_v53, %v471_v50  ;;  %v484_v5 = vrot.slane %v482_v56, 4  ;;  %v2273_v6 = vshrl.u32 %v5357_v51, 16  ;;  %v6986_v53 = vld [vmem:[%s6780_s15 + $0x80] sm:$0x1] }
  0x64   : > { %v2276_v7 = vshll.u32 %v5357_v51, 16  ;;  %5882 = vmatmul.mubr.msk.bf16.gmra.mrb[12].mxu1 %vm710_vm4, %v5162_v61  ;;  %v2271_v4 = vsel %vm6798_vm3, %v2266_v63, %v2270_v49  ;;  %v2282_v11 = vshll.u32 %v6941_v58, 16  ;;  %v2286_v12 = vshrl.u32 %v6941_v58, 16  ;;  %v6990_v61 = vld [vmem:[%s6780_s15 + $0x78] sm:$0xf] }
  0x65   : > { %v490_v9 = vrot.slane %v488_v0, 5  ;;  %v5389_v16 = vcombine.low %v2261_v62, %v2271_v4  ;;  %v476_v17 = vrot.slane %v475_v3, 4  ;;  %v485_v18 = vor.u32 %v484_v5, %v480_v54  ;;  %v6993_v5 = vld [vmem:[%s6780_s15 + $0x7c] sm:$0xf] }
  0x66   : > { %v2275_v19 = vrot.slane %v2273_v6, 4  ;;  %v2278_v23 = vrot.slane %v2276_v7, 5  ;;  %v2284_v60 = vrot.slane %v2282_v11, 5  ;;  %v2288_v24 = vrot.slane %v2286_v12, 4 }
  0x67   : > { %v2292_v25 = vshll.u32 %v6946_v1, 16  ;;  %6018 = vmatmul.mubr.msk.bf16.gmra.mrb[12].mxu0 %vm710_vm4, %v5389_v16  ;;  %v481_v26 = vsel %vm6798_vm3, %v476_v17, %v480_v54  ;;  %v486_v27 = vrot.slane %v485_v18, 4  ;;  %v493_v28 = vshrl.u32 %v242_v8, 16  ;;  %v267_v16 = vld [vmem:[%s6780_s15 + $0x80] sm:$0x1] }
  0x68   : > { %v496_v30 = vshll.u32 %v242_v8, 16  ;;  %v2279_v31 = vor.u32 %v2278_v23, %v2275_v19  ;;  %v2289_v32 = vor.u32 %v2288_v24, %v2284_v60  ;;  %v502_v36 = vshll.u32 %v243_v21, 16 }
  0x69   : > { %v2294_v34 = vrot.slane %v2292_v25, 5  ;;  %v491_v38 = vsel %vm6798_vm3, %v486_v27, %v490_v9  ;;  %v495_v39 = vrot.slane %v493_v28, 4  ;;  %v506_v41 = vshrl.u32 %v243_v21, 16  ;;  %v7009_v28 = vld [vmem:[%s6780_s15 + $0x88] sm:$0xf] }
  0x6a   : > { %v498_v40 = vrot.slane %v496_v30, 5  ;;  %v5163_v43 = vcombine.low %v481_v26, %v491_v38  ;;  %v2280_v44 = vrot.slane %v2279_v31, 4  ;;  %v2290_v45 = vrot.slane %v2289_v32, 4 }
  0x6b   : > { %v504_v46 = vrot.slane %v502_v36, 5  ;;  %v508_v48 = vrot.slane %v506_v41, 4  ;;  %v512_v49 = vshll.u32 %v266_v35, 16  ;;  %v2297_v50 = vshrl.u32 %v5360_v37, 16  ;;  %v7012_v35 = vld [vmem:[%s6780_s15 + $0x8c] sm:$0x1] }
  0x6c   : > { %v499_v47 = vor.u32 %v498_v40, %v495_v39  ;;  %5885 = vmatprep.mubr.msk.bf16.mxu1 %vm710_vm4, %v5163_v43  ;;  %v2285_v51 = vsel %vm6798_vm3, %v2280_v44, %v2284_v60  ;;  %v2295_v52 = vsel %vm6798_vm3, %v2290_v45, %v2294_v34  ;;  %v2300_v54 = vshll.u32 %v5360_v37, 16  ;;  %v5363_v60 = vld [vmem:[%s6780_s15 + $0x84] sm:$0xf] }
  0x6d   : > { %v2306_v56 = vshll.u32 %v6978_v42, 16  ;;  %v5390_v62 = vcombine.low %v2285_v51, %v2295_v52  ;;  %v509_v0 = vor.u32 %v508_v48, %v504_v46  ;;  %v514_v3 = vrot.slane %v512_v49, 5  ;;  %v7015_v40 = vld [vmem:[%s6780_s15 + $0x84] sm:$0xf] }
  0x6e   : > { %v500_v63 = vrot.slane %v499_v47, 4  ;;  %v2299_v6 = vrot.slane %v2297_v50, 4  ;;  %v2302_v7 = vrot.slane %v2300_v54, 5  ;;  %v2310_v4 = vshrl.u32 %v6978_v42, 16 }
  0x6f   : > { %v2308_v8 = vrot.slane %v2306_v56, 5  ;;  %6021 = vmatprep.mubr.msk.bf16.mxu0 %vm710_vm4, %v5390_v62  ;;  %v510_v11 = vrot.slane %v509_v0, 4  ;;  %v2316_v12 = vshll.u32 %v6986_v53, 16  ;;  %v517_v17 = vshrl.u32 %v6990_v61, 16  ;;  %v268_v62 = vld [vmem:[%s6780_s15 + $0x8c] sm:$0x1] }
  0x70   : > { %v505_v9 = vsel %vm6798_vm3, %v500_v63, %v504_v46  ;;  %v2303_v18 = vor.u32 %v2302_v7, %v2299_v6  ;;  %v2312_v19 = vrot.slane %v2310_v4, 4  ;;  %v520_v21 = vshll.u32 %v6990_v61, 16  ;;  %v7021_v46 = vld [vmem:[%s6780_s15 + $0x88] sm:$0xf]  ;;  %v5366_v7 = vld [vmem:[%s6780_s15 + $0x90] sm:$0xf] }
  0x71   : > { %v526_v23 = vshll.u32 %v6993_v5, 16  ;;  %v515_v24 = vsel %vm6798_vm3, %v510_v11, %v514_v3  ;;  %v2318_v25 = vrot.slane %v2316_v12, 5  ;;  %v519_v26 = vrot.slane %v517_v17, 4  ;;  %v7034_v12 = vld [vmem:[%s6780_s15 + $0x94] sm:$0xf] }
  0x72   : > { %v530_v27 = vshrl.u32 %v6993_v5, 16  ;;  %v5164_v30 = vcombine.low %v505_v9, %v515_v24  ;;  %v2304_v31 = vrot.slane %v2303_v18, 4  ;;  %v2313_v32 = vor.u32 %v2312_v19, %v2308_v8 }
  0x73   : > { %v522_v34 = vrot.slane %v520_v21, 5  ;;  %v528_v36 = vrot.slane %v526_v23, 5  ;;  %v536_v38 = vshll.u32 %v267_v16, 16  ;;  %v2321_v39 = vshrl.u32 %v5363_v60, 16 }
  0x74   : > { %v532_v37 = vrot.slane %v530_v27, 4  ;;  %5886 = vmatmul.mubr.msk.bf16.gmra.mrb[16].mxu1 %vm710_vm4, %v5164_v30  ;;  %v2309_v41 = vsel %vm6798_vm3, %v2304_v31, %v2308_v8  ;;  %v2314_v43 = vrot.slane %v2313_v32, 4  ;;  %v2324_v45 = vshll.u32 %v5363_v60, 16  ;;  %v7043_v31 = vld [vmem:[%s6780_s15 + $0x98] sm:$0x1] }
  0x75   : > { %v523_v44 = vor.u32 %v522_v34, %v519_v26  ;;  %v538_v48 = vrot.slane %v536_v38, 5  ;;  %v2323_v49 = vrot.slane %v2321_v39, 4  ;;  %v2330_v50 = vshll.u32 %v7009_v28, 16  ;;  %v7046_v32 = vld [vmem:[%s6780_s15 + $0x90] sm:$0xf] }
  0x76   : > { %v533_v47 = vor.u32 %v532_v37, %v528_v36  ;;  %v2319_v51 = vsel %vm6798_vm3, %v2314_v43, %v2318_v25  ;;  %v2326_v54 = vrot.slane %v2324_v45, 5  ;;  %v2334_v56 = vshrl.u32 %v7009_v28, 16  ;;  %v7053_v45 = vld [vmem:[%s6780_s15 + $0x94] sm:$0xf] }
  0x77   : > { %v524_v52 = vrot.slane %v523_v44, 4  ;;  %v5391_v63 = vcombine.low %v2309_v41, %v2319_v51  ;;  %v2332_v3 = vrot.slane %v2330_v50, 5  ;;  %v2340_v6 = vshll.u32 %v7012_v35, 16 }
  0x78   : > { %v534_v0 = vrot.slane %v533_v47, 4  ;;  %v2327_v4 = vor.u32 %v2326_v54, %v2323_v49  ;;  %v2336_v9 = vrot.slane %v2334_v56, 4  ;;  %v541_v11 = vshrl.u32 %v7015_v40, 16 }
  0x79   : > { %v529_v8 = vsel %vm6798_vm3, %v524_v52, %v528_v36  ;;  %6022 = vmatmul.mubr.msk.bf16.gmra.mrb[16].mxu0 %vm710_vm4, %v5391_v63  ;;  %v2342_v17 = vrot.slane %v2340_v6, 5  ;;  %v544_v18 = vshll.u32 %v7015_v40, 16  ;;  %v550_v19 = vshll.u32 %v7021_v46, 16 }
  0x7a   : > { %v539_v16 = vsel %vm6798_vm3, %v534_v0, %v538_v48  ;;  %v2328_v23 = vrot.slane %v2327_v4, 4  ;;  %v2337_v60 = vor.u32 %v2336_v9, %v2332_v3  ;;  %v543_v24 = vrot.slane %v541_v11, 4 }
  0x7b   : > { %v5165_v21 = vcombine.low %v529_v8, %v539_v16  ;;  %v546_v25 = vrot.slane %v544_v18, 5  ;;  %v552_v26 = vrot.slane %v550_v19, 5  ;;  %v554_v27 = vshrl.u32 %v7021_v46, 16  ;;  %v7068_v16 = vld [vmem:[%s6780_s15 + $0xa0] sm:$0xf] }
  0x7c   : > { %v560_v30 = vshll.u32 %v268_v62, 16  ;;  %v2333_v34 = vsel %vm6798_vm3, %v2328_v23, %v2332_v3  ;;  %v2338_v36 = vrot.slane %v2337_v60, 4  ;;  %v2345_v37 = vshrl.u32 %v5366_v7, 16  ;;  %v269_v62 = vld [vmem:[%s6780_s15 + $0x98] sm:$0x1] }
  0x7d   : > { %5889 = vmatprep.mubr.msk.bf16.mxu1 %vm710_vm4, %v5165_v21  ;;  %v2348_v38 = vshll.u32 %v5366_v7, 16  ;;  %v547_v39 = vor.u32 %v546_v25, %v543_v24  ;;  %v556_v41 = vrot.slane %v554_v27, 4  ;;  %v2354_v44 = vshll.u32 %v7034_v12, 16  ;;  %v5369_v7 = vld [vmem:[%s6780_s15 + $0x9c] sm:$0xf] }
  0x7e   : > { %v562_v43 = vrot.slane %v560_v30, 5  ;;  %v2343_v47 = vsel %vm6798_vm3, %v2338_v36, %v2342_v17  ;;  %v2347_v48 = vrot.slane %v2345_v37, 4  ;;  %v2358_v50 = vshrl.u32 %v7034_v12, 16  ;;  %v7079_v37 = vld [vmem:[%s6780_s15 + $0x9c] sm:$0xf] }
  0x7f   : > { %v2350_v49 = vrot.slane %v2348_v38, 5  ;;  %v5392_v51 = vcombine.low %v2333_v34, %v2343_v47  ;;  %v548_v52 = vrot.slane %v547_v39, 4  ;;  %v557_v54 = vor.u32 %v556_v41, %v552_v26 }
  0x80   : > { %v2356_v56 = vrot.slane %v2354_v44, 5  ;;  %v2360_v0 = vrot.slane %v2358_v50, 4  ;;  %v2364_v3 = vshll.u32 %v7043_v31, 16  ;;  %v565_v6 = vshrl.u32 %v7046_v32, 16 }
  0x81   : > { %v2351_v63 = vor.u32 %v2350_v49, %v2347_v48  ;;  %6025 = vmatprep.mubr.msk.bf16.mxu0 %vm710_vm4, %v5392_v51  ;;  %v553_v8 = vsel %vm6798_vm3, %v548_v52, %v552_v26  ;;  %v558_v4 = vrot.slane %v557_v54, 4  ;;  %v568_v9 = vshll.u32 %v7046_v32, 16  ;;  %v7074_v26 = vld [vmem:[%s6780_s15 + $0xa4] sm:$0x1] }
  0x82   : > { %v574_v11 = vshll.u32 %v7053_v45, 16  ;;  %v2361_v18 = vor.u32 %v2360_v0, %v2356_v56  ;;  %v2366_v19 = vrot.slane %v2364_v3, 5  ;;  %v567_v21 = vrot.slane %v565_v6, 4  ;;  %v7091_v6 = vld [vmem:[%s6780_s15 + $0xa4] sm:$0x1] }
  0x83   : > { %v2352_v17 = vrot.slane %v2351_v63, 4  ;;  %v563_v23 = vsel %vm6798_vm3, %v558_v4, %v562_v43  ;;  %v570_v60 = vrot.slane %v568_v9, 5  ;;  %v578_v25 = vshrl.u32 %v7053_v45, 16  ;;  %v7082_v43 = vld [vmem:[%s6780_s15 + $0xa0] sm:$0xf]  ;;  %8964 = vst [vmem:[#allocation6_spill] sm:$0xff] %v7091_v6 }
  0x84   : > { %v576_v24 = vrot.slane %v574_v11, 5  ;;  %v5166_v27 = vcombine.low %v553_v8, %v563_v23  ;;  %v2362_v34 = vrot.slane %v2361_v18, 4  ;;  %v584_v36 = vshll.u32 %v269_v62, 16 }
  0x85   : > { %v2357_v30 = vsel %vm6798_vm3, %v2352_v17, %v2356_v56  ;;  %v571_v38 = vor.u32 %v570_v60, %v567_v21  ;;  %v580_v39 = vrot.slane %v578_v25, 4  ;;  %v2369_v41 = vshrl.u32 %v5369_v7, 16 }
  0x86   : > { %v2372_v44 = vshll.u32 %v5369_v7, 16  ;;  %5890 = vmatmul.mubr.msk.bf16.gmra.mrb[20].mxu1 %vm710_vm4, %v5166_v27  ;;  %v2367_v47 = vsel %vm6798_vm3, %v2362_v34, %v2366_v19  ;;  %v586_v48 = vrot.slane %v584_v36, 5  ;;  %v2378_v49 = vshll.u32 %v7068_v16, 16  ;;  %v5372_v7 = vld [vmem:[%s6780_s15 + $0xa8] sm:$0xf] }
  0x87   : > { %v2382_v50 = vshrl.u32 %v7068_v16, 16  ;;  %v5393_v51 = vcombine.low %v2357_v30, %v2367_v47  ;;  %v572_v52 = vrot.slane %v571_v38, 4  ;;  %v581_v54 = vor.u32 %v580_v39, %v576_v24  ;;  %v7104_v27 = vld [vmem:[%s6780_s15 + $0xac] sm:$0xf]  ;;  %v7107_v39 = vld [vmem:[%s6780_s15 + $0xb0] sm:$0x1] }
  0x88   : > { %v2371_v56 = vrot.slane %v2369_v41, 4  ;;  %v2374_v62 = vrot.slane %v2372_v44, 5  ;;  %v2380_v63 = vrot.slane %v2378_v49, 5  ;;  %v2388_v3 = vshll.u32 %v7074_v26, 16  ;;  %v7110_v41 = vld [vmem:[%s6780_s15 + $0xa8] sm:$0xf] }
  0x89   : > { %v2384_v0 = vrot.slane %v2382_v50, 4  ;;  %6026 = vmatmul.mubr.msk.bf16.gmra.mrb[20].mxu0 %vm710_vm4, %v5393_v51  ;;  %v577_v8 = vsel %vm6798_vm3, %v572_v52, %v576_v24  ;;  %v582_v4 = vrot.slane %v581_v54, 4  ;;  %v589_v9 = vshrl.u32 %v7079_v37, 16  ;;  %v7114_v50 = vld [vmem:[%s6780_s15 + $0xac] sm:$0xf] }
  0x8a   : > { %v592_v11 = vshll.u32 %v7079_v37, 16  ;;  %v2375_v17 = vor.u32 %v2374_v62, %v2371_v56  ;;  %v2390_v19 = vrot.slane %v2388_v3, 5  ;;  %v598_v21 = vshll.u32 %v7082_v43, 16 }
  0x8b   : > { %v2385_v18 = vor.u32 %v2384_v0, %v2380_v63  ;;  %v587_v23 = vsel %vm6798_vm3, %v582_v4, %v586_v48  ;;  %v591_v60 = vrot.slane %v589_v9, 4  ;;  %v602_v24 = vshrl.u32 %v7082_v43, 16 }
  0x8c   : > { %v594_v25 = vrot.slane %v592_v11, 5  ;;  %v5167_v30 = vcombine.low %v577_v8, %v587_v23  ;;  %v2376_v34 = vrot.slane %v2375_v17, 4  ;;  %v600_v38 = vrot.slane %v598_v21, 5  ;;  %v5375_v21 = vld [vmem:[%s6780_s15 + $0xb4] sm:$0xf] }
  0x8d   : > { %v2386_v36 = vrot.slane %v2385_v18, 4  ;;  %v604_v47 = vrot.slane %v602_v24, 4  ;;  %v608_v49 = vshll.u32 %v7091_v6, 16  ;;  %v2393_v48 = vshrl.u32 %v5372_v7, 16  ;;  %v7124_v18 = vld [vmem:[%s6780_s15 + $0xb0] sm:$0x1] }
  0x8e   : > { %v595_v44 = vor.u32 %v594_v25, %v591_v60  ;;  %5893 = vmatprep.mubr.msk.bf16.mxu1 %vm710_vm4, %v5167_v30  ;;  %v2381_v51 = vsel %vm6798_vm3, %v2376_v34, %v2380_v63  ;;  %v2396_v54 = vshll.u32 %v5372_v7, 16  ;;  %v2402_v56 = vshll.u32 %v7104_v27, 16  ;;  %8965 = vst [vmem:[#allocation7_spill] sm:$0xff] %v7124_v18 }
  0x8f   : > { %v2391_v52 = vsel %vm6798_vm3, %v2386_v36, %v2390_v19  ;;  %v605_v3 = vor.u32 %v604_v47, %v600_v38  ;;  %v610_v8 = vrot.slane %v608_v49, 5  ;;  %v2395_v4 = vrot.slane %v2393_v48, 4  ;;  %v7138_v47 = vld [vmem:[%s6780_s15 + $0xb8] sm:$0xf] }
  0x90   : > { %v5394_v62 = vcombine.low %v2381_v51, %v2391_v52  ;;  %v596_v0 = vrot.slane %v595_v44, 4  ;;  %v2398_v9 = vrot.slane %v2396_v54, 5  ;;  %v2404_v11 = vrot.slane %v2402_v56, 5  ;;  %v7141_v54 = vld [vmem:[%s6780_s15 + $0xbc] sm:$0x1] }
  0x91   : > { %v2406_v17 = vshrl.u32 %v7104_v27, 16  ;;  %v606_v7 = vrot.slane %v605_v3, 4  ;;  %v2412_v19 = vshll.u32 %v7107_v39, 16  ;;  %v613_v23 = vshrl.u32 %v7110_v41, 16 }
  0x92   : > { %6029 = vmatprep.mubr.msk.bf16.mxu0 %vm710_vm4, %v5394_v62  ;;  %v601_v63 = vsel %vm6798_vm3, %v596_v0, %v600_v38  ;;  %v2399_v60 = vor.u32 %v2398_v9, %v2395_v4  ;;  %v616_v24 = vshll.u32 %v7110_v41, 16  ;;  %v622_v30 = vshll.u32 %v7114_v50, 16 }
  0x93   : > { %v2408_v25 = vrot.slane %v2406_v17, 4  ;;  %v611_v34 = vsel %vm6798_vm3, %v606_v7, %v610_v8  ;;  %v2414_v36 = vrot.slane %v2412_v19, 5  ;;  %v615_v44 = vrot.slane %v613_v23, 4  ;;  %v7145_v8 = vld [vmem:[%s6780_s15 + $0xb4] sm:$0xf] }
  0x94   : > { %v626_v38 = vshrl.u32 %v7114_v50, 16  ;;  %v5168_v49 = vcombine.low %v601_v63, %v611_v34  ;;  %v2400_v48 = vrot.slane %v2399_v60, 4  ;;  %v618_v52 = vrot.slane %v616_v24, 5  ;;  %v7151_v7 = vld [vmem:[%s6780_s15 + $0xb8] sm:$0xf] }
  0x95   : > { %v2409_v51 = vor.u32 %v2408_v25, %v2404_v11  ;;  %v624_v56 = vrot.slane %v622_v30, 5  ;;  %v632_v0 = vshll.u32 %v7124_v18, 16  ;;  %v2417_v3 = vshrl.u32 %v5375_v21, 16  ;;  %v5426_v18 = vld [vmem:[%s6780_s15 + $0x9c] sm:$0xe] }
  0x96   : > { %v628_v62 = vrot.slane %v626_v38, 4  ;;  %5894 = vmatmul.mubr.msk.bf16.gmra.mrb[24].mxu1 %vm710_vm4, %v5168_v49  ;;  %v2405_v4 = vsel %vm6798_vm3, %v2400_v48, %v2404_v11  ;;  %v619_v17 = vor.u32 %v618_v52, %v615_v44  ;;  %v2420_v63 = vshll.u32 %v5375_v21, 16  ;;  %v7158_v49 = vld [vmem:[%s6780_s15 + $0xbc] sm:$0x1] }
  0x97   : > { %v2410_v9 = vrot.slane %v2409_v51, 4  ;;  %v634_v23 = vrot.slane %v632_v0, 5  ;;  %v2419_v60 = vrot.slane %v2417_v3, 4  ;;  %v2426_v25 = vshll.u32 %v7138_v47, 16  ;;  %8966 = vst [vmem:[#allocation8_spill] sm:$0xff] %v7158_v49 }
  0x98   : > { %v629_v19 = vor.u32 %v628_v62, %v624_v56  ;;  %v620_v30 = vrot.slane %v619_v17, 4  ;;  %v2422_v34 = vrot.slane %v2420_v63, 5  ;;  %v2430_v38 = vshrl.u32 %v7138_v47, 16  ;;  %v5378_v17 = vld [vmem:[%s6780_s15 + $0xc0] sm:$0xf] }
  0x99   : > { %v2415_v24 = vsel %vm6798_vm3, %v2410_v9, %v2414_v36  ;;  %v2428_v21 = vrot.slane %v2426_v25, 5  ;;  %v2436_v48 = vshll.u32 %v7141_v54, 16  ;;  %v637_v36 = vshrl.u32 %v7145_v8, 16 }
  0x9a   : > { %v5395_v11 = vcombine.low %v2405_v4, %v2415_v24  ;;  %v630_v44 = vrot.slane %v629_v19, 4  ;;  %v625_v51 = vsel %vm6798_vm3, %v620_v30, %v624_v56  ;;  %v2423_v52 = vor.u32 %v2422_v34, %v2419_v60  ;;  %v7171_v60 = vld [vmem:[%s6780_s15 + $0xc4] sm:$0xf] }
  0x9b   : > { %v2432_v62 = vrot.slane %v2430_v38, 4  ;;  %v2438_v3 = vrot.slane %v2436_v48, 5  ;;  %v640_v4 = vshll.u32 %v7145_v8, 16  ;;  %v646_v9 = vshll.u32 %v7151_v7, 16 }
  0x9c   : > { %6030 = vmatmul.mubr.msk.bf16.gmra.mrb[24].mxu0 %vm710_vm4, %v5395_v11  ;;  %v635_v0 = vsel %vm6798_vm3, %v630_v44, %v634_v23  ;;  %v2424_v19 = vrot.slane %v2423_v52, 4  ;;  %v639_v56 = vrot.slane %v637_v36, 4  ;;  %v650_v34 = vshrl.u32 %v7151_v7, 16  ;;  %v7176_v23 = vld [vmem:[%s6780_s15 + $0xc8] sm:$0x1] }
  0x9d   : > { %v5169_v63 = vcombine.low %v625_v51, %v635_v0  ;;  %v2433_v25 = vor.u32 %v2432_v62, %v2428_v21  ;;  %v642_v24 = vrot.slane %v640_v4, 5  ;;  %v648_v30 = vrot.slane %v646_v9, 5  ;;  %v7185_v4 = vld [vmem:[%s8922_s1 + $0x4] sm:$0x3] }
  0x9e   : > { %v656_v38 = vshll.u32 %v7158_v49, 16  ;;  %v2429_v11 = vsel %vm6798_vm3, %v2424_v19, %v2428_v21  ;;  %v2441_v48 = vshrl.u32 %v5378_v17, 16  ;;  %v2444_v51 = vshll.u32 %v5378_v17, 16  ;;  %v5414_v19 = vld [vmem:[%s6780_s15 + $0xc] sm:$0xe] }
  0x9f   : > { %5897 = vmatprep.mubr.msk.bf16.mxu1 %vm710_vm4, %v5169_v63  ;;  %v2434_v44 = vrot.slane %v2433_v25, 4  ;;  %v643_v52 = vor.u32 %v642_v24, %v639_v56  ;;  %v652_v62 = vrot.slane %v650_v34, 4  ;;  %v2450_v0 = vshll.u32 %v7171_v60, 16  ;;  %v7303_v49 = vld [vmem:[%s6780_s15 + $0x40] sm:$0xf] }
  0xa0   : > { %v658_v36 = vrot.slane %v656_v38, 5  ;;  %v2443_v63 = vrot.slane %v2441_v48, 4  ;;  %v2446_v22 = vrot.slane %v2444_v51, 5  ;;  %v2454_v21 = vshrl.u32 %v7171_v60, 16 }
  0xa1   : > { %v2439_v9 = vsel %vm6798_vm3, %v2434_v44, %v2438_v3  ;;  %v644_v25 = vrot.slane %v643_v52, 4  ;;  %v653_v56 = vor.u32 %v652_v62, %v648_v30  ;;  %v2452_v24 = vrot.slane %v2450_v0, 5  ;;  %v6562_v62 = vld [vmem:[%s6780_s15] sm:$0xf]  ;;  %v7206_v0 = vld [vmem:[%s6780_s15 + $0x4] sm:$0xf] }
  0xa2   : > { %v5396_v17 = vcombine.low %v2429_v11, %v2439_v9  ;;  %v2447_v34 = vor.u32 %v2446_v22, %v2443_v63  ;;  %v2456_v38 = vrot.slane %v2454_v21, 4  ;;  %v2460_v10 = vshll.u32 %v7176_v23, 16  ;;  %v5415_v22 = vld [vmem:[%s6780_s15 + $0x18] sm:$0xe] }
  0xa3   : > { %v1053_v57 = vsel %vm759_vm0, %v6951_v2, 0  ;;  %v2833_v3 = vrot.slane %v2831_v20, 4  ;;  %v649_v11 = vsel %vm6798_vm3, %v644_v25, %v648_v30  ;;  %v654_v44 = vrot.slane %v653_v56, 4  ;;  %v5416_v56 = vld [vmem:[%s6780_s15 + $0x24] sm:$0xe] }
  0xa4   : > { %6033 = vmatprep.mubr.msk.bf16.mxu0 %vm710_vm4, %v5396_v17  ;;  %5902 = vmatpush3.bf16.msra.mxu1 %v1053_v57  ;;  %v2448_v48 = vrot.slane %v2447_v34, 4  ;;  %v2457_v51 = vor.u32 %v2456_v38, %v2452_v24  ;;  %v2462_v52 = vrot.slane %v2460_v10, 5  ;;  %v5187_v30 = vcombine.low %v6562_v62, %v7206_v0  ;;  %v6565_v62 = vld [vmem:[%s6780_s15 + $0x2c] sm:$0x1] }
  0xa5   : > { %6451 = vmatprep.subr.msk.bf16.mxu1 %vm759_vm0, %v7185_v4  ;;  %v659_v2 = vsel %vm6798_vm3, %v654_v44, %v658_v36  ;;  %v5430_v9 = vrot.slane %v5414_v19, 9  ;;  %v8969_v63 = vrot.slane %v6787_v14, 5  ;;  %v5431_v36 = vrot.slane %v5415_v22, 9 }
  0xa6   : > { %v5170_v21 = vcombine.low %v649_v11, %v659_v2  ;;  %v2453_v17 = vsel %vm6798_vm3, %v2448_v48, %v2452_v24  ;;  %v2458_v25 = vrot.slane %v2457_v51, 4  ;;  %v8971_v44 = vrot.slane %v6790_v15, 5  ;;  %v6564_v48 = vld [vmem:[%s6780_s15 + $0x28] sm:$0xf] }
  0xa7   : > { %v2826_v10 = vrot.slane %v8969_v63, 4  ;;  %v8970_v34 = vmov %v8969_v63  ;;  %v8972_v11 = vrot.slane %v6817_v59, 5  ;;  %v2832_v15 = vsel %vm7209_vm7, %v5431_v36, %v2831_v20  ;;  %v6566_v20 = vld [vmem:[%s6780_s15 + $0xc] sm:$0xf]  ;;  %v5417_v63 = vld [vmem:[%s6780_s15 + $0x30] sm:$0xe] }
  0xa8   : > { %v2825_v38 = vsel %vm7209_vm7, %v5430_v9, %v8970_v34  ;;  %5898 = vmatmul.mubr.msk.bf16.gmra.mrb[28].mxu1 %vm710_vm4, %v5170_v21  ;;  %v2463_v14 = vsel %vm6798_vm3, %v2458_v25, %v2462_v52  ;;  %v2838_v51 = vrot.slane %v6564_v48, 5  ;;  %v2841_v52 = vrot.slane %v6565_v62, 5  ;;  %v7244_v9 = vld [vmem:[%s6780_s15 + $0x10] sm:$0xf]  ;;  %v7251_v25 = vld [vmem:[%s6780_s15 + $0x1c] sm:$0xf] }
  0xa9   : > { %v2828_v19 = vsel %vm7209_vm7, %v2826_v10, %v8971_v44  ;;  %v2835_v2 = vsel %vm7209_vm7, %v2833_v3, %v8972_v11  ;;  %v5397_v22 = vcombine.low %v2453_v17, %v2463_v14  ;;  %5903 = vmatprep.mubr.msk.bf16.mxu1 %vm710_vm4, %v5187_v30  ;;  %v5432_v3 = vrot.slane %v5416_v56, 9  ;;  %v6568_v10 = vld [vmem:[%s6780_s15 + $0x34] sm:$0xf]  ;;  %v6569_v17 = vld [vmem:[%s6780_s15 + $0x18] sm:$0xf] }
  0xaa   : > { %v5447_v24 = vcombine.low %v2825_v38, %v2828_v19  ;;  %v5448_v59 = vcombine.low %v2832_v15, %v2835_v2  ;;  %v2840_v55 = vrot.slane %v2838_v51, 4  ;;  %v5188_v30 = vcombine.low %v6566_v20, %v7244_v9  ;;  %v5418_v38 = vld [vmem:[%s6780_s15 + $0x3c] sm:$0xe]  ;;  %v6571_v44 = vld [vmem:[%s6780_s15 + $0x40] sm:$0xf] }
  0xab   : > { %6034 = vmatmul.mubr.msk.bf16.gmra.mrb[28].mxu0 %vm710_vm4, %v5397_v22  ;;  %v2845_v21 = vrot.slane %v6568_v10, 5  ;;  %v5189_v36 = vcombine.low %v6569_v17, %v7251_v25  ;;  %v2839_v56 = vsel %vm7209_vm7, %v5432_v3, %v2838_v51  ;;  %v2852_v19 = vrot.slane %v6571_v44, 5  ;;  %v6572_v14 = vld [vmem:[%s6780_s15 + $0x38] sm:$0x1]  ;;  %v5419_v15 = vld [vmem:[%s6780_s15 + $0x48] sm:$0xe] }
  0xac   : > { %6039 = vmatprep.mubr.msk.bf16.mxu0 %vm710_vm4, %v5447_v24  ;;  %v2842_v34 = vsel %vm7209_vm7, %v2840_v55, %v2841_v52  ;;  %v3392_v11 = vsel %vm759_vm0, %v6964_v13, 0  ;;  %v5433_v2 = vrot.slane %v5417_v63, 9  ;;  %v2848_v24 = vrot.slane %v6572_v14, 5  ;;  %v6573_v51 = vld [vmem:[%s6780_s15 + $0x4c] sm:$0xf] }
  0xad   : > { %v5449_v22 = vcombine.low %v2839_v56, %v2842_v34  ;;  %v2847_v3 = vrot.slane %v2845_v21, 4  ;;  %v5434_v48 = vrot.slane %v5418_v38, 9  ;;  %v2859_v62 = vrot.slane %v6573_v51, 5  ;;  %v6574_v55 = vld [vmem:[%s6780_s15 + $0x44] sm:$0x1] }
  0xae   : > { %v2854_v52 = vrot.slane %v2852_v19, 4  ;;  %v2855_v13 = vrot.slane %v6574_v55, 5  ;;  %v5420_v20 = vld [vmem:[%s6780_s15 + $0x54] sm:$0xe]  ;;  %v6575_v63 = vld [vmem:[%s6780_s15 + $0x58] sm:$0xf]  ;;  %v2846_v34 = vsel %vm7209_vm7, %v5433_v2, %v2845_v21 }
  0xaf   : > { %v2866_v10 = vrot.slane %v6575_v63, 5  ;;  %v6576_v17 = vld [vmem:[%s6780_s15 + $0x24] sm:$0xf]  ;;  %v7278_v56 = vld [vmem:[%s6780_s15 + $0x28] sm:$0xf]  ;;  %v2849_v44 = vsel %vm7209_vm7, %v2847_v3, %v2848_v24  ;;  %v5435_v14 = vrot.slane %v5419_v15, 9 }
  0xb0   : > { %5904 = vmatmul.mubr.msk.bf16.vlgmr.msra.gmra.mrb[0].mxu1 %vm710_vm4, %v5188_v30  ;;  %v7273_v30 = vld [vmem:[%s8922_s1 + $0xe] sm:$0x3]  ;;  %v5421_v38 = vld [vmem:[%s6780_s15 + $0x60] sm:$0xe]  ;;  %v6578_v51 = vld [vmem:[%s6780_s15 + $0x50] sm:$0x1]  ;;  %v2856_v2 = vsel %vm7209_vm7, %v2854_v52, %v2855_v13  ;;  %v5450_v29 = vcombine.low %v2846_v34, %v2849_v44 }
  0xb1   : > { %5907 = vmatprep.mubr.msk.bf16.mxu1 %vm710_vm4, %v5189_v36  ;;  %v5190_v36 = vcombine.low %v6576_v17, %v7278_v56  ;;  %v2862_v55 = vrot.slane %v6578_v51, 5  ;;  %v6579_v63 = vld [vmem:[%s6780_s15 + $0x30] sm:$0xf]  ;;  %v7290_v17 = vld [vmem:[%s6780_s15 + $0x34] sm:$0xf]  ;;  %v2868_v24 = vrot.slane %v2866_v10, 4 }
  0xb2   : > { %v5191_v21 = vcombine.low %v6579_v63, %v7290_v17  ;;  %v6581_v15 = vld [vmem:[%s6780_s15 + $0x5c] sm:$0x1]  ;;  %v5425_v51 = vld [vmem:[%s6780_s15 + $0x90] sm:$0xe]  ;;  %v7307_v52 = vld [vmem:[%s6780_s15 + $0x6c] sm:$0xe] }
  0xb3   : > { %6040 = vmatmul.mubr.msk.bf16.vlgmr.msra.gmra.mrb[0].mxu0 %vm710_vm4, %v5448_v59  ;;  %v2861_v59 = vrot.slane %v2859_v62, 4  ;;  %v2869_v3 = vrot.slane %v6581_v15, 5  ;;  %v6582_v63 = vld [vmem:[%s6780_s15 + $0x3c] sm:$0xf]  ;;  %v6584_v44 = vld [vmem:[%s6780_s15 + $0x64] sm:$0xf] }
  0xb4   : > { %6072 = vmatpush3.bf16.msra.mxu0 %v3392_v11  ;;  %6043 = vmatprep.mubr.msk.bf16.mxu0 %vm710_vm4, %v5449_v22  ;;  %v2853_v11 = vsel %vm7209_vm7, %v5434_v48, %v2852_v19  ;;  %v5436_v22 = vrot.slane %v5420_v20, 9  ;;  %v5192_v19 = vcombine.low %v6582_v63, %v7303_v49  ;;  %v5437_v48 = vrot.slane %v5421_v38, 9  ;;  %v6585_v63 = vld [vmem:[%s6780_s15 + $0x48] sm:$0xf]  ;;  %v7319_v38 = vld [vmem:[%s6780_s15 + $0x4c] sm:$0xf] }
  0xb5   : > { %6456 = vmatprep.subr.msk.bf16.mxu0 %vm759_vm0, %v7273_v30  ;;  %v5451_v13 = vcombine.low %v2853_v11, %v2856_v2  ;;  %v2860_v20 = vsel %vm7209_vm7, %v5435_v14, %v2859_v62  ;;  %v2863_v34 = vsel %vm7209_vm7, %v2861_v59, %v2862_v55  ;;  %v2873_v15 = vrot.slane %v6584_v44, 5  ;;  %8973 = vst [vmem:[#allocation9_spill] sm:$0xff] %v7319_v38  ;;  %v7325_v11 = vld [vmem:[%s6780_s15 + $0x54] sm:$0xf]  ;;  %v7328_v62 = vld [vmem:[%s6780_s15 + $0x58] sm:$0xf] }
  0xb6   : > { %v5193_v6 = vcombine.low %v6585_v63, %v7319_v38  ;;  %v5441_v59 = vrot.slane %v5425_v51, 9  ;;  %v2870_v55 = vsel %vm7209_vm7, %v2868_v24, %v2869_v3  ;;  %v7336_v44 = vld [vmem:[%s6780_s15 + $0x60] sm:$0xf]  ;;  %v5452_v63 = vcombine.low %v2860_v20, %v2863_v34  ;;  %v5427_v3 = vld [vmem:[%s6780_s15 + $0xa8] sm:$0xe] }
  0xb7   : > { %v7344_v38 = vsel %vm7209_vm7, %v5437_v48, %v2873_v15  ;;  %v2901_v51 = vrot.slane %v7034_v12, 5  ;;  %v2904_v24 = vrot.slane %v7043_v31, 5  ;;  %v2875_v14 = vrot.slane %v2873_v15, 4 }
  0xb8   : > { %5908 = vmatmul.mubr.msk.bf16.gmra.mrb[4].mxu1 %vm710_vm4, %v5190_v36  ;;  %v2867_v36 = vsel %vm7209_vm7, %v5436_v22, %v2866_v10  ;;  %v5438_v22 = vrot.slane %v7307_v52, 9  ;;  %v5442_v10 = vrot.slane %v5426_v18, 9  ;;  %v2908_v52 = vrot.slane %v7068_v16, 5 }
  0xb9   : > { %5911 = vmatprep.mubr.msk.bf16.mxu1 %vm710_vm4, %v5191_v21  ;;  %v6589_v21 = vld [vmem:[%s6780_s15 + $0x68] sm:$0x1]  ;;  %v5453_v20 = vcombine.low %v2867_v36, %v2870_v55  ;;  %v2880_v34 = vrot.slane %v6941_v58, 5  ;;  %v7356_v48 = vsel %vm7209_vm7, %v5441_v59, %v2901_v51  ;;  %v2903_v12 = vrot.slane %v2901_v51, 4  ;;  %v5429_v59 = vld [vmem:[%s6780_s15 + $0xc0] sm:$0xe] }
  0xba   : > { %v2876_v2 = vrot.slane %v6589_v21, 5  ;;  %v5428_v21 = vld [vmem:[%s6780_s15 + $0xb4] sm:$0xe]  ;;  %v7360_v31 = vsel %vm7209_vm7, %v5442_v10, %v2908_v52  ;;  %v5443_v15 = vrot.slane %v5427_v3, 9  ;;  %v2915_v18 = vrot.slane %v7104_v27, 5 }
  0xbb   : > { %6044 = vmatmul.mubr.msk.bf16.gmra.mrb[4].mxu0 %vm710_vm4, %v5450_v29  ;;  %v2911_v29 = vrot.slane %v7074_v26, 5  ;;  %v2883_v16 = vrot.slane %v6946_v1, 5  ;;  %v7366_v26 = vsel %vm7209_vm7, %v2903_v12, %v2904_v24  ;;  %v2918_v58 = vrot.slane %v7107_v39, 5 }
  0xbc   : > { %6047 = vmatprep.mubr.msk.bf16.mxu0 %vm710_vm4, %v5451_v13  ;;  %v2910_v13 = vrot.slane %v2908_v52, 4  ;;  %v5444_v36 = vrot.slane %v5428_v21, 9  ;;  %v5458_v55 = vcombine.low %v7356_v48, %v7366_v26  ;;  %v7379_v1 = vsel %vm7209_vm7, %v5443_v15, %v2915_v18  ;;  %v1217_v48 = vld [vmem:[%s6780_s15 + $0xc] sm:$0xe] }
  0xbd   : > { %v2917_v27 = vrot.slane %v2915_v18, 4  ;;  %v2882_v51 = vrot.slane %v2880_v34, 4  ;;  %v2925_v24 = vrot.slane %v7141_v54, 5  ;;  %v5445_v21 = vrot.slane %v5429_v59, 9 }
  0xbe   : > { %v7375_v10 = vsel %vm7209_vm7, %v2910_v13, %v2911_v29  ;;  %v2929_v52 = vrot.slane %v7171_v60, 5  ;;  %v2932_v29 = vrot.slane %v7176_v23, 5  ;;  %v1478_v60 = vsel %vm759_vm0, %v7185_v4, 0  ;;  %v5423_v4 = vld [vmem:[%s6780_s15 + $0x78] sm:$0xe] }
  0xbf   : > { %v5459_v39 = vcombine.low %v7360_v31, %v7375_v10  ;;  %v7388_v3 = vsel %vm7209_vm7, %v2917_v27, %v2918_v58  ;;  %v2877_v23 = vsel %vm7209_vm7, %v2875_v14, %v2876_v2  ;;  %v2887_v31 = vrot.slane %v6978_v42, 5  ;;  %5936 = vmatpush3.bf16.msra.mxu1 %v1478_v60  ;;  %v5424_v42 = vld [vmem:[%s6780_s15 + $0x84] sm:$0xe] }
  0xc0   : > { %5912 = vmatmul.mubr.msk.bf16.gmra.mrb[8].mxu1 %vm710_vm4, %v5192_v19  ;;  %v2922_v19 = vrot.slane %v7138_v47, 5  ;;  %v5460_v47 = vcombine.low %v7379_v1, %v7388_v3  ;;  %v2931_v13 = vrot.slane %v2929_v52, 4  ;;  %v2881_v15 = vsel %vm7209_vm7, %v5438_v22, %v2880_v34 }
  0xc1   : > { %5915 = vmatprep.mubr.msk.bf16.mxu1 %vm710_vm4, %v5193_v6  ;;  %v7395_v6 = vld [vmem:[%s8922_s1 + $0x6] sm:$0x3]  ;;  %v2884_v18 = vsel %vm7209_vm7, %v2882_v51, %v2883_v16  ;;  %v5454_v34 = vcombine.low %v7344_v38, %v2877_v23  ;;  %v8974_v16 = vcombine.low %v7325_v11, %v7328_v62  ;;  %v2889_v59 = vrot.slane %v2887_v31, 4  ;;  %v6591_v11 = vld [vmem:[%s6780_s15 + $0x6c] sm:$0xf] }
  0xc2   : > { %v7402_v54 = vsel %vm7209_vm7, %v5444_v36, %v2922_v19  ;;  %v2924_v12 = vrot.slane %v2922_v19, 4  ;;  %6452 = vmatprep.subr.msk.bf16.mxu1 %vm759_vm0, %v7395_v6  ;;  %v7431_v22 = vsel %vm7209_vm7, %v2931_v13, %v2932_v29  ;;  %v5455_v58 = vcombine.low %v2881_v15, %v2884_v18  ;;  %v1216_v23 = vld [vmem:[%s6780_s15] sm:$0xe]  ;;  %v6594_v15 = vld [vmem:[%s6780_s15 + $0x14] sm:$0x1] }
  0xc3   : > { %6048 = vmatmul.mubr.msk.bf16.gmra.mrb[8].mxu0 %vm710_vm4, %v5452_v63  ;;  %v7412_v63 = vsel %vm7209_vm7, %v5445_v21, %v2929_v52  ;;  %v5439_v36 = vrot.slane %v5423_v4, 9  ;;  %v2890_v10 = vrot.slane %v6986_v53, 5  ;;  %v8975_v27 = vcombine.low %v7336_v44, %v6929_v33 }
  0xc4   : > { %6051 = vmatprep.mubr.msk.bf16.mxu0 %vm710_vm4, %v5453_v20  ;;  %v2894_v20 = vrot.slane %v7009_v28, 5  ;;  %v7422_v14 = vsel %vm7209_vm7, %v2924_v12, %v2925_v24  ;;  %v5462_v28 = vcombine.low %v7412_v63, %v7431_v22  ;;  %v5440_v51 = vrot.slane %v5424_v42, 9  ;;  %v7450_v24 = vld [vmem:[%s6780_s15 + $0x70] sm:$0xf] }
  0xc5   : > { %v5461_v2 = vcombine.low %v7402_v54, %v7422_v14  ;;  %v2897_v19 = vrot.slane %v7012_v35, 5  ;;  %v5196_v21 = vcombine.low %v6591_v11, %v7450_v24  ;;  %v2888_v53 = vsel %vm7209_vm7, %v5439_v36, %v2887_v31  ;;  %v1221_v36 = vld [vmem:[%s6780_s15 + $0x3c] sm:$0xe] }
  0xc6   : > { %v2896_v38 = vrot.slane %v2894_v20, 4  ;;  %v2891_v33 = vsel %vm7209_vm7, %v2889_v59, %v2890_v10  ;;  %v5197_v44 = vcombine.low %v6990_v61, %v6993_v5  ;;  %v2895_v35 = vsel %vm7209_vm7, %v5440_v51, %v2894_v20  ;;  %v1220_v20 = vld [vmem:[%s6780_s15 + $0x30] sm:$0xe] }
  0xc7   : > { %v5456_v29 = vcombine.low %v2888_v53, %v2891_v33  ;;  %v5198_v61 = vcombine.low %v7015_v40, %v7021_v46  ;;  %v5199_v5 = vcombine.low %v7046_v32, %v7053_v45  ;;  %v1269_v60 = vrot.slane %v7206_v0, 5  ;;  %v6593_v46 = vld [vmem:[%s6780_s15 + $0x8] sm:$0x1]  ;;  %v6518_v33 = vld [vmem:[%s6780_s15 + $0x18] sm:$0xff]  }
  0xc8   : > { %5916 = vmatmul.mubr.msk.bf16.gmra.mrb[12].mxu1 %vm710_vm4, %v8974_v16  ;;  %v2898_v52 = vsel %vm7209_vm7, %v2896_v38, %v2897_v19  ;;  %v5200_v40 = vcombine.low %v7079_v37, %v7082_v43  ;;  %v1272_v32 = vrot.slane %v6593_v46, 5  ;;  %v5201_v45 = vcombine.low %v7110_v41, %v7114_v50  ;;  %v1219_v41 = vld [vmem:[%s6780_s15 + $0x24] sm:$0xe]  ;;  %v6595_v16 = vld [vmem:[%s6780_s15 + $0x20] sm:$0x1] }
  0xc9   : > { %5919 = vmatprep.mubr.msk.bf16.mxu1 %vm710_vm4, %v8975_v27  ;;  %v5457_v12 = vcombine.low %v2895_v35, %v2898_v52  ;;  %v5219_v31 = vrot.slane %v1216_v23, 9  ;;  %v1271_v0 = vrot.slane %v1269_v60, 4  ;;  %v1276_v13 = vrot.slane %v7244_v9, 5  ;;  %v6597_v38 = vld [vmem:[%s6780_s15 + $0x38] sm:$0x1] }
  0xca   : > { %v1283_v26 = vrot.slane %v7251_v25, 5  ;;  %v1297_v9 = vrot.slane %v7290_v17, 5  ;;  %v1279_v25 = vrot.slane %v6594_v15, 5  ;;  %v5220_v18 = vrot.slane %v1217_v48, 9  ;;  %v1225_v48 = vld [vmem:[%s6780_s15 + $0x6c] sm:$0xe] }
  0xcb   : > { %6052 = vmatmul.mubr.msk.bf16.gmra.mrb[12].mxu0 %vm710_vm4, %v5454_v34  ;;  %v1270_v37 = vsel %vm7209_vm7, %v5219_v31, %v1269_v60  ;;  %v1273_v43 = vsel %vm7209_vm7, %v1271_v0, %v1272_v32  ;;  %v1278_v4 = vrot.slane %v1276_v13, 4  ;;  %v5202_v17 = vcombine.low %v7145_v8, %v7151_v7  ;;  %v8976_v32 = vld [vmem:[#allocation9_spill] sm:$0xff] }
  0xcc   : > { %6055 = vmatprep.mubr.msk.bf16.mxu0 %vm710_vm4, %v5455_v58  ;;  %v1285_v34 = vrot.slane %v1283_v26, 4  ;;  %v1286_v58 = vrot.slane %v6595_v16, 5  ;;  %v5236_v1 = vcombine.low %v1270_v37, %v1273_v43  ;;  %v5222_v3 = vrot.slane %v1219_v41, 9  ;;  %v1224_v31 = vld [vmem:[%s6780_s15 + $0x60] sm:$0xe]  ;;  %v6520_v16 = vld [vmem:[%s6780_s15 + $0x30] sm:$0xff]  }
  0xcd   : > { %v5223_v27 = vrot.slane %v1220_v20, 9  ;;  %v1299_v51 = vrot.slane %v1297_v9, 4  ;;  %v1300_v19 = vrot.slane %v6597_v38, 5  ;;  %v1280_v54 = vsel %vm7209_vm7, %v1278_v4, %v1279_v25  ;;  %v6599_v0 = vld [vmem:[%s6780_s15 + $0x64] sm:$0xf] }
  0xce   : > { %v5224_v14 = vrot.slane %v1221_v36, 9  ;;  %v6601_v43 = vld [vmem:[%s6780_s15 + $0x5c] sm:$0x1]  ;;  %v1227_v4 = vld [vmem:[%s6780_s15 + $0x84] sm:$0xe] }
  0xcf   : > { %v7537_v52 = vsel %vm7209_vm7, %v5223_v27, %v1297_v9  ;;  %v1321_v41 = vrot.slane %v6601_v43, 5  ;;  %v6602_v9 = vld [vmem:[%s6780_s15 + $0x7c] sm:$0xf]  ;;  %v6603_v20 = vld [vmem:[%s6780_s15 + $0x88] sm:$0xf] }
  0xd0   : > { %5920 = vmatmul.mubr.msk.bf16.gmra.mrb[16].mxu1 %vm710_vm4, %v5196_v21  ;;  %v6598_v21 = vld [vmem:[%s6780_s15 + $0x44] sm:$0x1]  ;;  %v1339_v15 = vrot.slane %v6602_v9, 5 }
  0xd1   : > { %5923 = vmatprep.mubr.msk.bf16.mxu1 %vm710_vm4, %v5197_v44  ;;  %v1307_v53 = vrot.slane %v6598_v21, 5 }
  0xd2   : > { %v1341_v38 = vrot.slane %v1339_v15, 4 }
  0xd3   : > { %6056 = vmatmul.mubr.msk.bf16.gmra.mrb[16].mxu0 %vm710_vm4, %v5456_v29  ;;  %v7541_v29 = vsel %vm7209_vm7, %v1299_v51, %v1300_v19  ;;  %v1228_v51 = vld [vmem:[%s6780_s15 + $0x90] sm:$0xe]  ;;  %v6606_v19 = vld [vmem:[%s6780_s15 + $0x80] sm:$0x1] }
  0xd4   : > { %6059 = vmatprep.mubr.msk.bf16.mxu0 %vm710_vm4, %v5457_v12  ;;  %v1222_v12 = vld [vmem:[%s6780_s15 + $0x48] sm:$0xe]  ;;  %v5240_v22 = vcombine.low %v7537_v52, %v7541_v29 }
  0xd8   : > { %5924 = vmatmul.mubr.msk.bf16.gmra.mrb[20].mxu1 %vm710_vm4, %v5198_v61 }
  0xd9   : > { %5927 = vmatprep.mubr.msk.bf16.mxu1 %vm710_vm4, %v5199_v5  ;;  %v7546_v5 = vsel %vm759_vm0, %v7273_v30, 0  ;;  %v1311_v30 = vrot.slane %v8976_v32, 5 }
  0xdb   : > { %6060 = vmatmul.mubr.msk.bf16.gmra.mrb[20].mxu0 %vm710_vm4, %v5458_v55  ;;  %v1218_v55 = vld [vmem:[%s6780_s15 + $0x18] sm:$0xe] }
  0xdc   : > { %6063 = vmatprep.mubr.msk.bf16.mxu0 %vm710_vm4, %v5459_v39  ;;  %v1290_v39 = vrot.slane %v7278_v56, 5  ;;  %v5221_v42 = vrot.slane %v1218_v55, 9  ;;  %v1304_v56 = vrot.slane %v7303_v49, 5  ;;  %v1277_v49 = vsel %vm7209_vm7, %v5220_v18, %v1276_v13 }
  0xdd   : > { %v5237_v61 = vcombine.low %v1277_v49, %v1280_v54  ;;  %v1325_v13 = vrot.slane %v6599_v0, 5  ;;  %v5227_v18 = vrot.slane %v1224_v31, 9  ;;  %v1342_v49 = vrot.slane %v6606_v19, 5 }
  0xde   : > { %v1292_v10 = vrot.slane %v1290_v39, 4  ;;  %v1284_v8 = vsel %vm7209_vm7, %v5221_v42, %v1283_v26  ;;  %v1306_v11 = vrot.slane %v1304_v56, 4  ;;  %v7529_v44 = vsel %vm7209_vm7, %v5222_v3, %v1290_v39  ;;  %v1226_v39 = vld [vmem:[%s6780_s15 + $0x78] sm:$0xe] }
  0xdf   : > { %v7550_v23 = vsel %vm7209_vm7, %v5224_v14, %v1304_v56  ;;  %v1332_v26 = vrot.slane %v7450_v24, 5  ;;  %v1346_v42 = vrot.slane %v6603_v20, 5  ;;  %v1837_v24 = vsel %vm759_vm0, %v7395_v6, 0  ;;  %v1229_v14 = vld [vmem:[%s6780_s15 + $0x9c] sm:$0xe] }
  0xe0   : > { %5928 = vmatmul.mubr.msk.bf16.gmra.mrb[24].mxu1 %vm710_vm4, %v5200_v40  ;;  %v1223_v40 = vld [vmem:[%s6780_s15 + $0x54] sm:$0xe]  ;;  %v7559_v46 = vsel %vm7209_vm7, %v1306_v11, %v1307_v53  ;;  %v1327_v56 = vrot.slane %v1325_v13, 4  ;;  %v5228_v3 = vrot.slane %v1225_v48, 9  ;;  %v5229_v27 = vrot.slane %v1226_v39, 9 }
  0xe1   : > { %5931 = vmatprep.mubr.msk.bf16.mxu1 %vm710_vm4, %v5201_v45  ;;  %v1318_v45 = vrot.slane %v7328_v62, 5  ;;  %v6600_v62 = vld [vmem:[%s6780_s15 + $0x50] sm:$0x1]  ;;  %v5226_v37 = vrot.slane %v1223_v40, 9  ;;  %v5241_v25 = vcombine.low %v7550_v23, %v7559_v46  ;;  %v5230_v54 = vrot.slane %v1227_v4, 9 }
  0xe2   : > { %v1314_v55 = vrot.slane %v6600_v62, 5  ;;  %v6607_v11 = vld [vmem:[%s6780_s15 + $0x8c] sm:$0x1]  ;;  %v6608_v53 = vld [vmem:[%s6780_s15 + $0x94] sm:$0xf]  ;;  %v7617_v40 = vsel %vm7209_vm7, %v5227_v18, %v1325_v13  ;;  %v7636_v0 = vsel %vm7209_vm7, %v5229_v27, %v1339_v15  ;;  %v5231_v13 = vrot.slane %v1228_v51, 9 }
  0xe3   : > { %6064 = vmatmul.mubr.msk.bf16.gmra.mrb[24].mxu0 %vm710_vm4, %v5460_v47  ;;  %v6596_v47 = vld [vmem:[%s6780_s15 + $0x2c] sm:$0x1]  ;;  %v1320_v36 = vrot.slane %v1318_v45, 4  ;;  %v1349_v21 = vrot.slane %v6607_v11, 5  ;;  %v7645_v48 = vsel %vm7209_vm7, %v5230_v54, %v1346_v42  ;;  %v6521_v15 = vld [vmem:[%s6780_s15 + $0x3c] sm:$0xff]  }
  0xe4   : > { %6067 = vmatprep.mubr.msk.bf16.mxu0 %vm710_vm4, %v5461_v2  ;;  %v1293_v59 = vrot.slane %v6596_v47, 5  ;;  %v1287_v2 = vsel %vm7209_vm7, %v1285_v34, %v1286_v58  ;;  %v6519_v34 = vld [vmem:[%s6780_s15 + $0x24] sm:$0xff]   ;;  %v1313_v58 = vrot.slane %v1311_v30, 4  ;;  %v1334_v47 = vrot.slane %v1332_v26, 4  ;;  %v7698_v27 = vld [vmem:[%s6780_s15 + $0x34] sm:$0xf] }
  0xe5   : > { %v5238_v60 = vcombine.low %v1284_v8, %v1287_v2  ;;  %v7597_v8 = vsel %vm7209_vm7, %v5226_v37, %v1318_v45  ;;  %v1348_v2 = vrot.slane %v1346_v42, 4  ;;  %v7628_v45 = vsel %vm7209_vm7, %v5228_v3, %v1332_v26  ;;  %v6609_v26 = vld [vmem:[%s6780_s15 + $0x98] sm:$0x1]  ;;  %v5546_v51 = vld [vmem:[%s6780_s15 + $0x20] sm:$0x1] }
  0xe6   : > { %v7533_v35 = vsel %vm7209_vm7, %v1292_v10, %v1293_v59  ;;  %v6605_v59 = vld [vmem:[%s6780_s15 + $0x74] sm:$0x1]  ;;  %v1356_v62 = vrot.slane %v6609_v26, 5  ;;  %v1231_v26 = vld [vmem:[%s6780_s15 + $0xb4] sm:$0xe] }
  0xe7   : > { %v5239_v63 = vcombine.low %v7529_v44, %v7533_v35  ;;  %v1335_v10 = vrot.slane %v6605_v59, 5  ;;  %v7652_v37 = vsel %vm7209_vm7, %v1348_v2, %v1349_v21  ;;  %v5550_v59 = vld [vmem:[%s6780_s15 + $0x30] sm:$0xf]  ;;  %v7734_v23 = vld [vmem:[%s6780_s15 + $0x40] sm:$0xf] }
  0xe8   : > { %5932 = vmatmul.mubr.msk.bf16.gmra.mrb[28].mxu1 %vm710_vm4, %v5202_v17  ;;  %v6604_v17 = vld [vmem:[%s6780_s15 + $0x68] sm:$0x1]  ;;  %v5247_v35 = vcombine.low %v7645_v48, %v7652_v37  ;;  %v3684_v2 = vshrl.u32 %v5550_v59, 16  ;;  %v3687_v11 = vshll.u32 %v5550_v59, 16  ;;  %v7912_v48 = vld [vmem:[%s6780_s15 + $0x74] sm:$0x1] }
  0xe9   : > { %5937 = vmatprep.mubr.msk.bf16.mxu1 %vm710_vm4, %v5236_v1  ;;  %v1328_v1 = vrot.slane %v6604_v17, 5  ;;  %v7632_v31 = vsel %vm7209_vm7, %v1334_v47, %v1335_v10  ;;  %v5547_v17 = vld [vmem:[%s6780_s15 + $0x24] sm:$0xf]  ;;  %v5548_v47 = vld [vmem:[%s6780_s15 + $0x28] sm:$0xf] }
  0xea   : > { %v3660_v19 = vshrl.u32 %v5547_v17, 16  ;;  %v3669_v54 = vshll.u32 %v5548_v47, 16 }
  0xeb   : > { %6068 = vmatmul.mubr.msk.bf16.gmra.mrb[28].mxu0 %vm710_vm4, %v5462_v28  ;;  %v5225_v28 = vrot.slane %v1222_v12, 9  ;;  %v7604_v12 = vld [vmem:[%s8922_s1 + $0x10] sm:$0x3]  ;;  %v7621_v32 = vsel %vm7209_vm7, %v1327_v56, %v1328_v1 }
  0xec   : > { %6073 = vmatprep.mubr.msk.bf16.mxu0 %vm710_vm4, %v6518_v33  ;;  %v1353_v33 = vrot.slane %v6608_v53, 5 }
  0xed   : > { %v7591_v6 = vsel %vm7209_vm7, %v5225_v28, %v1311_v30  ;;  %v5544_v30 = vld [vmem:[%s6780_s15 + $0x18] sm:$0xf]  ;;  %v5545_v28 = vld [vmem:[%s6780_s15 + $0x1c] sm:$0xf] }
  0xee   : > { %v1355_v43 = vrot.slane %v1353_v33, 4  ;;  %v3636_v39 = vshrl.u32 %v5544_v30, 16  ;;  %v3639_v9 = vshll.u32 %v5544_v30, 16  ;;  %v3645_v20 = vshll.u32 %v5545_v28, 16 }
  0xef   : > { %v3649_v42 = vshrl.u32 %v5545_v28, 16  ;;  %v1367_v30 = vrot.slane %v7114_v50, 5  ;;  %v7722_v50 = vld [vmem:[%s6780_s15 + $0x2c] sm:$0x1] }
  0xf0   : > { %5938 = vmatmul.mubr.msk.bf16.vlgmr.msra.gmra.mrb[0].mxu1 %vm710_vm4, %v5237_v61  ;;  %v7609_v61 = vsel %vm7209_vm7, %v1313_v58, %v1314_v55  ;;  %v5232_v55 = vrot.slane %v1229_v14, 9  ;;  %v7673_v58 = vsel %vm7209_vm7, %v5231_v13, %v1353_v33  ;;  %v7691_v10 = vsel %vm7209_vm7, %v1355_v43, %v1356_v62  ;;  %v8978_v13 = vld [vmem:[#allocation7_spill] sm:$0xff]  ;;  %8979 = vst [vmem:[#allocation9_spill] sm:$0xff] %v7722_v50 }
  0xf1   : > { %5941 = vmatprep.mubr.msk.bf16.mxu1 %vm710_vm4, %v5238_v60  ;;  %5970 = vmatpush3.bf16.msra.mxu1 %v1837_v24  ;;  %v7613_v60 = vsel %vm7209_vm7, %v1320_v36, %v1321_v41  ;;  %v7655_v41 = vld [vmem:[%s6780_s15 + $0xa8] sm:$0xe]  ;;  %v5242_v18 = vcombine.low %v7591_v6, %v7609_v61  ;;  %v6610_v36 = vld [vmem:[%s6780_s15 + $0xa0] sm:$0xf]  ;;  %v3638_v29 = vrot.slane %v3636_v39, 4  ;;  %v7702_v6 = vrot.slane %v3645_v20, 5 }
  0xf2   : > { %v5243_v4 = vcombine.low %v7597_v8, %v7613_v60  ;;  %v6522_v24 = vld [vmem:[%s6780_s15 + $0x48] sm:$0xff]   ;;  %v1360_v56 = vrot.slane %v6610_v36, 5  ;;  %v5233_v3 = vrot.slane %v7655_v41, 9  ;;  %v3673_v14 = vshrl.u32 %v5548_v47, 16  ;;  %v6523_v43 = vld [vmem:[%s6780_s15 + $0x54] sm:$0xff]   ;;  %v6524_v39 = vld [vmem:[%s6780_s15 + $0x60] sm:$0xff]  }
  0xf3   : > { %6074 = vmatmul.mubr.msk.bf16.vlgmr.msra.gmra.mrb[0].mxu0 %vm710_vm4, %v6519_v34  ;;  %v5244_v34 = vcombine.low %v7617_v40, %v7621_v32  ;;  %v5248_v21 = vcombine.low %v7673_v58, %v7691_v10  ;;  %v3693_v33 = vshll.u32 %v7698_v27, 16  ;;  %v3697_v61 = vshrl.u32 %v7698_v27, 16  ;;  %v5556_v41 = vld [vmem:[%s6780_s15 + $0x48] sm:$0xf]  ;;  %v7788_v8 = vld [vmem:[%s6780_s15 + $0x44] sm:$0x1] }
  0xf4   : > { %6106 = vmatpush3.bf16.msra.mxu0 %v7546_v5  ;;  %6077 = vmatprep.mubr.msk.bf16.mxu0 %vm710_vm4, %v6520_v16  ;;  %v7641_v5 = vsel %vm7209_vm7, %v1341_v38, %v1342_v49  ;;  %v5245_v16 = vcombine.low %v7628_v45, %v7632_v31  ;;  %v7695_v52 = vsel %vm7209_vm7, %v5232_v55, %v1360_v56  ;;  %v3651_v38 = vrot.slane %v3649_v42, 4  ;;  %v7919_v10 = vld [vmem:[%s6780_s15 + $0x80] sm:$0x1] }
  0xf5   : > { %6457 = vmatprep.subr.msk.bf16.mxu0 %vm759_vm0, %v7604_v12  ;;  %v5246_v44 = vcombine.low %v7636_v0, %v7641_v5  ;;  %v3663_v49 = vshll.u32 %v5547_v17, 16  ;;  %v1362_v53 = vrot.slane %v1360_v56, 4  ;;  %v1370_v28 = vrot.slane %v8978_v13, 5  ;;  %v7866_v5 = vld [vmem:[%s6780_s15 + $0x5c] sm:$0x1] }
  0xf6   : > { %v1374_v62 = vrot.slane %v7151_v7, 5  ;;  %v3655_v55 = vshll.u32 %v5546_v51, 16  ;;  %v3662_v20 = vrot.slane %v3660_v19, 4  ;;  %v7724_v36 = vrot.slane %v3669_v54, 5  ;;  %v7738_v51 = vld [vmem:[%s6780_s15 + $0x38] sm:$0x1] }
  0xf7   : > { %v3665_v42 = vrot.slane %v3663_v49, 5  ;;  %v3675_v7 = vrot.slane %v3673_v14, 4  ;;  %v3686_v56 = vrot.slane %v3684_v2, 4  ;;  %v3689_v17 = vrot.slane %v3687_v11, 5 }
  0xf8   : > { %5942 = vmatmul.mubr.msk.bf16.gmra.mrb[4].mxu1 %vm710_vm4, %v5239_v63  ;;  %v8977_v63 = vld [vmem:[#allocation6_spill] sm:$0xff]  ;;  %v5234_v47 = vrot.slane %v1231_v26, 9  ;;  %v7731_v59 = vrot.slane %v3693_v33, 5  ;;  %v1369_v46 = vrot.slane %v1367_v30, 4  ;;  %v3679_v54 = vshll.u32 %v7722_v50, 16 }
  0xf9   : > { %5945 = vmatprep.mubr.msk.bf16.mxu1 %vm710_vm4, %v5240_v22  ;;  %v1363_v1 = vrot.slane %v8977_v63, 5  ;;  %v3641_v22 = vrot.slane %v3639_v9, 5  ;;  %v3666_v2 = vor.u32 %v3665_v42, %v3662_v20  ;;  %v3676_v11 = vor.u32 %v3675_v7, %v7724_v36  ;;  %v6526_v7 = vld [vmem:[%s6780_s15 + $0x78] sm:$0xff]  }
  0xfa   : > { %v7748_v33 = vsel %vm7209_vm7, %v5233_v3, %v1367_v30  ;;  %v3703_v13 = vshll.u32 %v7738_v51, 16  ;;  %v3717_v26 = vshll.u32 %v7734_v23, 16  ;;  %v7762_v3 = vsel %vm7209_vm7, %v1369_v46, %v1370_v28 }
  0xfb   : > { %6078 = vmatmul.mubr.msk.bf16.gmra.mrb[4].mxu0 %vm710_vm4, %v6521_v15  ;;  %v3642_v9 = vor.u32 %v3641_v22, %v3638_v29  ;;  %v3652_v15 = vor.u32 %v3651_v38, %v7702_v6  ;;  %v7729_v63 = vsel %vm7209_vm7, %v1362_v53, %v1363_v1  ;;  %v3699_v29 = vrot.slane %v3697_v61, 4 }
  0xfc   : > { %6081 = vmatprep.mubr.msk.bf16.mxu0 %vm710_vm4, %v6522_v24  ;;  %v5553_v24 = vld [vmem:[%s6780_s15 + $0x3c] sm:$0xf]  ;;  %v3657_v1 = vrot.slane %v3655_v55, 5  ;;  %v3690_v53 = vor.u32 %v3689_v17, %v3686_v56  ;;  %v7755_v55 = vsel %vm7209_vm7, %v5234_v47, %v1374_v62  ;;  %v3681_v42 = vrot.slane %v3679_v54, 5 }
  0xfd   : > { %v3708_v38 = vshrl.u32 %v5553_v24, 16  ;;  %v3711_v19 = vshll.u32 %v5553_v24, 16  ;;  %v3643_v49 = vrot.slane %v3642_v9, 4  ;;  %v3653_v14 = vrot.slane %v3652_v15, 4  ;;  %v6525_v15 = vld [vmem:[%s6780_s15 + $0x6c] sm:$0xff]  }
  0xfe   : > { %v3700_v61 = vor.u32 %v3699_v29, %v7731_v59  ;;  %v3721_v9 = vshrl.u32 %v7734_v23, 16  ;;  %v7772_v24 = vld [vmem:[%s6780_s15 + $0x4c] sm:$0xf]  ;;  %v3667_v56 = vrot.slane %v3666_v2, 4  ;;  %v3677_v17 = vrot.slane %v3676_v11, 4 }
  0xff   : > { %v3658_v28 = vsel %vm6798_vm3, %v3653_v14, %v3657_v1  ;;  %v3691_v47 = vrot.slane %v3690_v53, 4  ;;  %v3705_v29 = vrot.slane %v3703_v13, 5  ;;  %v7785_v46 = vrot.slane %v3717_v26, 5  ;;  %v7812_v14 = vld [vmem:[%s6780_s15 + $0x50] sm:$0x1] }
 0x100   : > { %5946 = vmatmul.mubr.msk.bf16.gmra.mrb[8].mxu1 %vm710_vm4, %v5241_v25  ;;  %v8980_v25 = vld [vmem:[#allocation8_spill] sm:$0xff]  ;;  %v3682_v1 = vsel %vm6798_vm3, %v3677_v17, %v3681_v42  ;;  %v7809_v54 = vsel %vm759_vm0, %v7604_v12, 0  ;;  %v5559_v2 = vld [vmem:[%s6780_s15 + $0x54] sm:$0xf]  ;;  %v5562_v26 = vld [vmem:[%s6780_s15 + $0x60] sm:$0xf] }
 0x101   : > { %5949 = vmatprep.mubr.msk.bf16.mxu1 %vm710_vm4, %v5242_v18  ;;  %v1377_v22 = vrot.slane %v8980_v25, 5  ;;  %v1376_v18 = vrot.slane %v1374_v62, 4  ;;  %v3648_v62 = vsel %vm6798_vm3, %v3643_v49, %v7702_v6  ;;  %v3701_v6 = vrot.slane %v3700_v61, 4  ;;  %v7824_v13 = vld [vmem:[%s6780_s15 + $0x58] sm:$0xf] }
 0x102   : > { %v3732_v25 = vshrl.u32 %v5556_v41, 16  ;;  %v3672_v49 = vsel %vm6798_vm3, %v3667_v56, %v7724_v36  ;;  %v3696_v11 = vsel %vm6798_vm3, %v3691_v47, %v7731_v59  ;;  %v3727_v36 = vshll.u32 %v7788_v8, 16  ;;  %v6527_v59 = vld [vmem:[%s6780_s15 + $0x84] sm:$0xff]  }
 0x103   : > { %6082 = vmatmul.mubr.msk.bf16.gmra.mrb[8].mxu0 %vm710_vm4, %v6523_v43  ;;  %v3710_v43 = vrot.slane %v3708_v38, 4  ;;  %v7766_v30 = vsel %vm7209_vm7, %v1376_v18, %v1377_v22  ;;  %v3735_v22 = vshll.u32 %v5556_v41, 16  ;;  %v3741_v38 = vshll.u32 %v7772_v24, 16  ;;  %v7833_v41 = vld [vmem:[%s6780_s15 + $0x64] sm:$0xf] }
 0x104   : > { %6085 = vmatprep.mubr.msk.bf16.mxu0 %vm710_vm4, %v6524_v39  ;;  %v3713_v39 = vrot.slane %v3711_v19, 5  ;;  %v3745_v19 = vshrl.u32 %v7772_v24, 16  ;;  %v7800_v18 = vcombine.low %v3648_v62, %v3658_v28  ;;  %v3706_v53 = vsel %vm6798_vm3, %v3701_v6, %v3705_v29  ;;  %v6528_v28 = vld [vmem:[%s6780_s15 + $0x90] sm:$0xff]  }
 0x105   : > { %v7821_v61 = vrot.slane %v3732_v25, 4  ;;  %v3751_v62 = vshll.u32 %v7812_v14, 16  ;;  %v3756_v42 = vshrl.u32 %v5559_v2, 16  ;;  %v3765_v56 = vshll.u32 %v7824_v13, 16 }
 0x106   : > { %v3714_v60 = vor.u32 %v3713_v39, %v3710_v43  ;;  %v3737_v39 = vrot.slane %v3735_v22, 5  ;;  %v3769_v17 = vshrl.u32 %v7824_v13, 16  ;;  %v3780_v47 = vshrl.u32 %v5562_v26, 16  ;;  %v7870_v22 = vld [vmem:[%s6780_s15 + $0x70] sm:$0xf] }
 0x107   : > { %v3783_v6 = vshll.u32 %v5562_v26, 16  ;;  %v7850_v29 = vcombine.low %v3672_v49, %v3682_v1  ;;  %v7852_v45 = vrot.slane %v3727_v36, 5  ;;  %v3789_v31 = vshll.u32 %v7833_v41, 16  ;;  %v7882_v26 = vld [vmem:[%s6780_s15 + $0x7c] sm:$0xf] }
 0x108   : > { %5950 = vmatmul.mubr.msk.bf16.gmra.mrb[12].mxu1 %vm710_vm4, %v5243_v4  ;;  %v3723_v4 = vrot.slane %v3721_v9, 4  ;;  %v7827_v12 = vrot.slane %v3714_v60, 4  ;;  %v7830_v9 = vrot.slane %v3741_v38, 5  ;;  %v7856_v25 = vcombine.low %v3696_v11, %v3706_v53 }
 0x109   : > { %5953 = vmatprep.mubr.msk.bf16.mxu1 %vm710_vm4, %v5244_v34  ;;  %v3738_v0 = vor.u32 %v3737_v39, %v7821_v61  ;;  %v3758_v49 = vrot.slane %v3756_v42, 4  ;;  %v7879_v11 = vrot.slane %v3765_v56, 5  ;;  %v3771_v53 = vrot.slane %v3769_v17, 4  ;;  %v6529_v17 = vld [vmem:[%s6780_s15 + $0x9c] sm:$0xff]  }
 0x10a   : > { %v3724_v43 = vor.u32 %v3723_v4, %v7785_v46  ;;  %8982 = vst [vmem:[#allocation6_spill] sm:$0xff] %v7856_v25  ;;  %v3782_v36 = vrot.slane %v3780_v47, 4  ;;  %v3785_v61 = vrot.slane %v3783_v6, 5  ;;  %v7887_v39 = vrot.slane %v3789_v31, 5 }
 0x10b   : > { %6086 = vmatmul.mubr.msk.bf16.gmra.mrb[12].mxu0 %vm710_vm4, %v6525_v15  ;;  %v7836_v15 = vrot.slane %v3745_v19, 4  ;;  %v7875_v19 = vrot.slane %v3751_v62, 5  ;;  %v3813_v42 = vshll.u32 %v7870_v22, 16  ;;  %v3775_v6 = vshll.u32 %v7866_v5, 16 }
 0x10c   : > { %6089 = vmatprep.mubr.msk.bf16.mxu0 %vm710_vm4, %v6526_v7  ;;  %v3759_v7 = vshll.u32 %v5559_v2, 16  ;;  %v7862_v4 = vrot.slane %v3724_v43, 4  ;;  %v5568_v2 = vld [vmem:[%s6780_s15 + $0x78] sm:$0xf]  ;;  %v7885_v43 = vld [vmem:[%s6780_s15 + $0x68] sm:$0x1]  ;;  %v3772_v34 = vor.u32 %v3771_v53, %v7879_v11  ;;  %v3786_v60 = vor.u32 %v3785_v61, %v3782_v36 }
 0x10d   : > { %v3748_v38 = vor.u32 %v7836_v15, %v7830_v9  ;;  %v3831_v56 = vshll.u32 %v5568_v2, 16  ;;  %v3837_v31 = vshll.u32 %v7882_v26, 16  ;;  %v3799_v47 = vshll.u32 %v7885_v43, 16  ;;  %v5571_v36 = vld [vmem:[%s6780_s15 + $0x84] sm:$0xf] }
 0x10e   : > { %v3761_v1 = vrot.slane %v3759_v7, 5  ;;  %v3817_v7 = vshrl.u32 %v7870_v22, 16  ;;  %v3739_v32 = vrot.slane %v3738_v0, 4  ;;  %v7914_v50 = vrot.slane %v3813_v42, 5 }
 0x10f   : > { %v3833_v53 = vrot.slane %v3831_v56, 5  ;;  %v3749_v61 = vrot.slane %v3748_v38, 4  ;;  %v3777_v58 = vrot.slane %v3775_v6, 5  ;;  %v3801_v42 = vrot.slane %v3799_v47, 5 }
 0x110   : > { %5954 = vmatmul.mubr.msk.bf16.gmra.mrb[16].mxu1 %vm710_vm4, %v5245_v16  ;;  %v3793_v16 = vshrl.u32 %v7833_v41, 16  ;;  %v3823_v56 = vshll.u32 %v7912_v48, 16  ;;  %v3852_v38 = vshrl.u32 %v5571_v36, 16 }
 0x111   : > { %5957 = vmatprep.mubr.msk.bf16.mxu1 %vm710_vm4, %v5246_v44  ;;  %v5565_v44 = vld [vmem:[%s6780_s15 + $0x6c] sm:$0xf] }
 0x112   : > { %v3804_v15 = vshrl.u32 %v5565_v44, 16  ;;  %v3807_v62 = vshll.u32 %v5565_v44, 16  ;;  %v6530_v44 = vld [vmem:[%s6780_s15 + $0xa8] sm:$0xff]  }
 0x113   : > { %6090 = vmatmul.mubr.msk.bf16.gmra.mrb[16].mxu0 %vm710_vm4, %v6527_v59  ;;  %v3795_v59 = vrot.slane %v3793_v16, 4  ;;  %v3841_v16 = vshrl.u32 %v7882_v26, 16 }
 0x114   : > { %6093 = vmatprep.mubr.msk.bf16.mxu0 %vm710_vm4, %v6528_v28  ;;  %v3828_v28 = vshrl.u32 %v5568_v2, 16  ;;  %v3762_v2 = vor.u32 %v3761_v1, %v3758_v49  ;;  %v3806_v37 = vrot.slane %v3804_v15, 4  ;;  %v3819_v49 = vrot.slane %v3817_v7, 4  ;;  %v7925_v7 = vld [vmem:[%s6780_s15 + $0x88] sm:$0xf] }
 0x115   : > { %v3796_v40 = vor.u32 %v3795_v59, %v7887_v39  ;;  %v3843_v0 = vrot.slane %v3841_v16, 4  ;;  %v3773_v15 = vrot.slane %v3772_v34, 4  ;;  %v3847_v16 = vshll.u32 %v7919_v10, 16 }
 0x116   : > { %v3830_v1 = vrot.slane %v3828_v28, 4  ;;  %v3763_v59 = vrot.slane %v3762_v2, 4  ;;  %v3744_v34 = vsel %vm6798_vm3, %v3739_v32, %v7830_v9  ;;  %v3861_v47 = vshll.u32 %v7925_v7, 16 }
 0x117   : > { %v3797_v6 = vrot.slane %v3796_v40, 4  ;;  %v3865_v2 = vshrl.u32 %v7925_v7, 16  ;;  %v8983_v40 = vcombine.low %v7695_v52, %v7729_v63  ;;  %v3778_v9 = vsel %vm6798_vm3, %v3773_v15, %v3777_v58  ;;  %v7954_v52 = vld [vmem:[%s6780_s15 + $0x8c] sm:$0x1] }
 0x118   : > { %5958 = vmatmul.mubr.msk.bf16.gmra.mrb[20].mxu1 %vm710_vm4, %v5247_v35  ;;  %v3809_v35 = vrot.slane %v3807_v62, 5  ;;  %v3787_v62 = vrot.slane %v3786_v60, 4  ;;  %v3834_v25 = vor.u32 %v3833_v53, %v3830_v1  ;;  %v3768_v32 = vsel %vm6798_vm3, %v3763_v59, %v7879_v11 }
 0x119   : > { %5961 = vmatprep.mubr.msk.bf16.mxu1 %vm710_vm4, %v5248_v21  ;;  %v7921_v21 = vrot.slane %v3837_v31, 5  ;;  %v3820_v31 = vor.u32 %v3819_v49, %v7914_v50  ;;  %v8984_v63 = vcombine.low %v7748_v33, %v7762_v3  ;;  %v3854_v53 = vrot.slane %v3852_v38, 4  ;;  %v7974_v33 = vld [vmem:[%s6780_s15 + $0x94] sm:$0xf] }
 0x11a   : > { %v3810_v28 = vor.u32 %v3809_v35, %v3806_v37  ;;  %v6532_v37 = vld [vmem:[%s6780_s15 + $0xc0] sm:$0xff]   ;;  %v3754_v35 = vsel %vm6798_vm3, %v3749_v61, %v7875_v19  ;;  %v3792_v49 = vsel %vm6798_vm3, %v3787_v62, %v7887_v39  ;;  %v7962_v19 = vrot.slane %v3823_v56, 5 }
 0x11b   : > { %6094 = vmatmul.mubr.msk.bf16.gmra.mrb[20].mxu0 %vm710_vm4, %v6529_v17  ;;  %v3855_v17 = vshll.u32 %v5571_v36, 16  ;;  %v3844_v60 = vor.u32 %v3843_v0, %v7921_v21  ;;  %v5574_v36 = vld [vmem:[%s6780_s15 + $0x90] sm:$0xf]  ;;  %v3802_v61 = vsel %vm6798_vm3, %v3797_v6, %v3801_v42  ;;  %v7967_v39 = vrot.slane %v3820_v31, 4 }
 0x11c   : > { %6097 = vmatprep.mubr.msk.bf16.mxu0 %vm710_vm4, %v6530_v44  ;;  %v6531_v44 = vld [vmem:[%s6780_s15 + $0xb4] sm:$0xff]   ;;  %v7960_v1 = vrot.slane %v3810_v28, 4  ;;  %v7969_v58 = vrot.slane %v3834_v25, 4  ;;  %v7971_v0 = vrot.slane %v3847_v16, 5  ;;  %v7979_v59 = vrot.slane %v3861_v47, 5  ;;  %v6534_v31 = vld [vmem:[%s6780_s15 + $0xc] sm:$0xff]  }
 0x11d   : > { %v3857_v11 = vrot.slane %v3855_v17, 5  ;;  %v7977_v3 = vrot.slane %v3844_v60, 4  ;;  %v7981_v15 = vrot.slane %v3865_v2, 4  ;;  %v3871_v62 = vshll.u32 %v7954_v52, 16  ;;  %v5627_v6 = vld [vmem:[%s6780_s15 + $0x30] sm:$0xe] }
 0x11e   : > { %v8985_v25 = vsel %vm6798_vm3, %v7862_v4, %v7852_v45  ;;  %v8986_v42 = vsel %vm6798_vm3, %v7827_v12, %v7785_v46  ;;  %v7997_v56 = vcombine.low %v3744_v34, %v3754_v35  ;;  %v3876_v38 = vshrl.u32 %v5574_v36, 16  ;;  %v5628_v47 = vld [vmem:[%s6780_s15 + $0x3c] sm:$0xe]  ;;  %v6533_v2 = vld [vmem:[%s6780_s15 + $0xcc] sm:$0xff]   ;;  %v8225_v12 = vld [vmem:[%s6780_s15 + $0xc4] sm:$0xf] }
 0x11f   : > { %v7995_v28 = vcombine.low %v8986_v42, %v8985_v25  ;;  %v3879_v17 = vshll.u32 %v5574_v36, 16  ;;  %v8001_v16 = vcombine.low %v3768_v32, %v3778_v9  ;;  %v3858_v60 = vor.u32 %v3857_v11, %v3854_v53  ;;  %v5629_v36 = vld [vmem:[%s6780_s15 + $0x48] sm:$0xe] }
 0x120   : > { %5962 = vmatmul.mubr.msk.bf16.gmra.mrb[24].mxu1 %vm710_vm4, %v8983_v40  ;;  %v3885_v45 = vshll.u32 %v7974_v33, 16  ;;  %v3889_v34 = vshrl.u32 %v7974_v33, 16  ;;  %v8027_v35 = vrot.slane %v3871_v62, 5  ;;  %v5643_v32 = vrot.slane %v5627_v6, 9  ;;  %v5639_v40 = vld [vmem:[%s6780_s15 + $0xc0] sm:$0xe] }
 0x121   : > { %5965 = vmatprep.mubr.msk.bf16.mxu1 %vm710_vm4, %v8984_v63  ;;  %v8987_v9 = vcombine.low %v7755_v55, %v7766_v30  ;;  %v8035_v63 = vrot.slane %v3879_v17, 5  ;;  %v4393_v53 = vrot.slane %v7698_v27, 5  ;;  %v4396_v11 = vrot.slane %v7738_v51, 5  ;;  %v5630_v30 = vld [vmem:[%s6780_s15 + $0x54] sm:$0xe] }
 0x122   : > { %v8043_v62 = vrot.slane %v3885_v45, 5  ;;  %v5644_v25 = vrot.slane %v5628_v47, 9  ;;  %v4400_v55 = vrot.slane %v7734_v23, 5  ;;  %v8047_v42 = vrot.slane %v3889_v34, 4 }
 0x123   : > { %6098 = vmatmul.mubr.msk.bf16.gmra.mrb[24].mxu0 %vm710_vm4, %v6531_v44  ;;  %v8003_v44 = vcombine.low %v3792_v49, %v3802_v61  ;;  %v8033_v49 = vrot.slane %v3876_v38, 4  ;;  %v8041_v61 = vrot.slane %v3858_v60, 4  ;;  %v8051_v27 = vsel %vm7209_vm7, %v5643_v32, %v4393_v53  ;;  %v6535_v60 = vld [vmem:[%s6780_s15 + $0x18] sm:$0xff]   ;;  %v6536_v32 = vld [vmem:[%s6780_s15 + $0x24] sm:$0xff]  }
 0x124   : > { %6101 = vmatprep.mubr.msk.bf16.mxu0 %vm710_vm4, %v6532_v37  ;;  %v4395_v51 = vrot.slane %v4393_v53, 4  ;;  %v4403_v38 = vrot.slane %v7788_v8, 5  ;;  %v8057_v17 = vsel %vm7209_vm7, %v5644_v25, %v4400_v55  ;;  %v4402_v23 = vrot.slane %v4400_v55, 4  ;;  %v8228_v37 = vld [vmem:[%s6780_s15 + $0xc8] sm:$0x1] }
 0x125   : > { %v5645_v6 = vrot.slane %v5629_v36, 9  ;;  %v4410_v8 = vrot.slane %v7812_v14, 5  ;;  %v5646_v34 = vrot.slane %v5630_v30, 9  ;;  %v4414_v47 = vrot.slane %v7824_v13, 5  ;;  %v5632_v14 = vld [vmem:[%s6780_s15 + $0x6c] sm:$0xe] }
 0x126   : > { %v8065_v45 = vsel %vm7209_vm7, %v4395_v51, %v4396_v11  ;;  %v4417_v25 = vrot.slane %v7866_v5, 5  ;;  %v4421_v51 = vrot.slane %v7833_v41, 5  ;;  %v5648_v5 = vrot.slane %v5632_v14, 9  ;;  %v8164_v41 = vld [vmem:[%s6780_s15 + $0xa4] sm:$0x1] }
 0x127   : > { %v8086_v11 = vsel %vm7209_vm7, %v5646_v34, %v4414_v47  ;;  %v4416_v36 = vrot.slane %v4414_v47, 4  ;;  %v4428_v34 = vrot.slane %v7870_v22, 5  ;;  %v4431_v47 = vrot.slane %v7912_v48, 5 }
 0x128   : > { %5966 = vmatmul.mubr.msk.bf16.gmra.mrb[28].mxu1 %vm710_vm4, %v8987_v9  ;;  %v4438_v48 = vrot.slane %v7919_v10, 5 }
 0x129   : > { %5971 = vmatprep.mubr.msk.bf16.mxu1 %vm710_vm4, %v6534_v31  ;;  %v4407_v31 = vrot.slane %v7772_v24, 5  ;;  %v8075_v24 = vsel %vm7209_vm7, %v4402_v23, %v4403_v38  ;;  %v4424_v38 = vrot.slane %v7885_v43, 5  ;;  %v5633_v23 = vld [vmem:[%s6780_s15 + $0x78] sm:$0xe]  ;;  %v4430_v22 = vrot.slane %v4428_v34, 4 }
 0x12b   : > { %6102 = vmatmul.mubr.msk.bf16.gmra.mrb[28].mxu0 %vm710_vm4, %v6533_v2  ;;  %v5631_v2 = vld [vmem:[%s6780_s15 + $0x60] sm:$0xe]  ;;  %v4409_v53 = vrot.slane %v4407_v31, 4 }
 0x12c   : > { %6107 = vmatprep.mubr.msk.bf16.mxu0 %vm710_vm4, %v7800_v18  ;;  %v8079_v18 = vsel %vm7209_vm7, %v5645_v6, %v4407_v31  ;;  %v5647_v30 = vrot.slane %v5631_v2, 9  ;;  %v8101_v31 = vsel %vm7209_vm7, %v4416_v36, %v4417_v25  ;;  %v8115_v2 = vsel %vm7209_vm7, %v5648_v5, %v4428_v34  ;;  %v8144_v5 = vld [vmem:[%s6780_s15 + $0x98] sm:$0x1]  ;;  %v8147_v34 = vld [vmem:[%s6780_s15 + $0xa0] sm:$0xf] }
 0x12d   : > { %v8091_v55 = vsel %vm7209_vm7, %v4409_v53, %v4410_v8  ;;  %v5634_v8 = vld [vmem:[%s6780_s15 + $0x84] sm:$0xe]  ;;  %v5649_v53 = vrot.slane %v5633_v23, 9  ;;  %v4442_v25 = vrot.slane %v7925_v7, 5  ;;  %v6538_v23 = vld [vmem:[%s6780_s15 + $0x3c] sm:$0xff]   ;;  %v9007_v57 = vcombine.low %v8086_v11, %v8101_v31 }
 0x12e   : > { %v8110_v43 = vsel %vm7209_vm7, %v5647_v30, %v4421_v51  ;;  %v5650_v36 = vrot.slane %v5634_v8, 9  ;;  %v5635_v30 = vld [vmem:[%s6780_s15 + $0x90] sm:$0xe]  ;;  %v5637_v8 = vld [vmem:[%s6780_s15 + $0xa8] sm:$0xe] }
 0x12f   : > { %v5653_v6 = vrot.slane %v5637_v8, 9  ;;  %v5577_v8 = vld [vmem:[%s6780_s15 + $0x9c] sm:$0xf] }
 0x130   : > { %5972 = vmatmul.mubr.msk.bf16.vlgmr.msra.gmra.mrb[0].mxu1 %vm710_vm4, %v6535_v60  ;;  %v4423_v60 = vrot.slane %v4421_v51, 4  ;;  %v8988_v51 = vld [vmem:[#allocation6_spill] sm:$0xff] }
 0x131   : > { %5975 = vmatprep.mubr.msk.bf16.mxu1 %vm710_vm4, %v6536_v32  ;;  %v4435_v32 = vrot.slane %v7882_v26, 5  ;;  %v6537_v26 = vld [vmem:[%s6780_s15 + $0x30] sm:$0xff]  }
 0x132   : > { %v8122_v14 = vsel %vm7209_vm7, %v4423_v60, %v4424_v38  ;;  %v8136_v38 = vsel %vm7209_vm7, %v4430_v22, %v4431_v47  ;;  %v8153_v60 = vsel %vm7209_vm7, %v5650_v36, %v4442_v25  ;;  %v4444_v47 = vrot.slane %v4442_v25, 4 }
 0x133   : > { %6108 = vmatmul.mubr.msk.bf16.vlgmr.msra.gmra.mrb[0].mxu0 %vm710_vm4, %v7850_v29  ;;  %v8140_v10 = vsel %vm7209_vm7, %v5649_v53, %v4435_v32  ;;  %v4437_v7 = vrot.slane %v4435_v32, 4  ;;  %8990 = vst [vmem:[#allocation8_spill] sm:$0xff] %v8153_v60  ;;  %v4445_v22 = vrot.slane %v7954_v52, 5  ;;  %v5651_v32 = vrot.slane %v5635_v30, 9  ;;  %v8179_v30 = vld [vmem:[%s6780_s15 + $0xb8] sm:$0xf] }
 0x134   : > { %6140 = vmatpush3.bf16.msra.mxu0 %v7809_v54  ;;  %6111 = vmatprep.mubr.msk.bf16.mxu0 %vm710_vm4, %v8988_v51  ;;  %8989 = vst [vmem:[#allocation7_spill] sm:$0xff] %v8140_v10  ;;  %v5636_v54 = vld [vmem:[%s6780_s15 + $0x9c] sm:$0xe]  ;;  %v4449_v51 = vrot.slane %v7974_v33, 5  ;;  %v4452_v29 = vrot.slane %v8144_v5, 5  ;;  %v4470_v4 = vrot.slane %v8179_v30, 5 }
 0x135   : > { %v8158_v53 = vsel %vm7209_vm7, %v4437_v7, %v4438_v48  ;;  %v8170_v25 = vsel %vm7209_vm7, %v4444_v47, %v4445_v22  ;;  %v5652_v52 = vrot.slane %v5636_v54, 9  ;;  %v4456_v48 = vrot.slane %v8147_v34, 5  ;;  %v5638_v7 = vld [vmem:[%s6780_s15 + $0xb4] sm:$0xe]  ;;  %v8176_v33 = vld [vmem:[%s6780_s15 + $0xac] sm:$0xf] }
 0x136   : > { %8991 = vst [vmem:[#allocation5_spill] sm:$0xff] %v8158_v53  ;;  %8992 = vst [vmem:[#allocation6_spill] sm:$0xff] %v8170_v25  ;;  %v8185_v36 = vsel %vm7209_vm7, %v5651_v32, %v4449_v51  ;;  %v4451_v54 = vrot.slane %v4449_v51, 4  ;;  %v4459_v47 = vrot.slane %v8164_v41, 5  ;;  %v4463_v9 = vrot.slane %v8176_v33, 5 }
 0x137   : > { %8993 = vst [vmem:[#allocation10_spill] sm:$0xff] %v8185_v36  ;;  %v8194_v22 = vsel %vm7209_vm7, %v5652_v52, %v4456_v48  ;;  %v4458_v13 = vrot.slane %v4456_v48, 4  ;;  %v6539_v52 = vld [vmem:[%s6780_s15 + $0x48] sm:$0xff]   ;;  %v8209_v48 = vld [vmem:[%s6780_s15 + $0xbc] sm:$0x1]  ;;  %v5655_v36 = vrot.slane %v5639_v40, 9 }
 0x138   : > { %5976 = vmatmul.mubr.msk.bf16.gmra.mrb[4].mxu1 %vm710_vm4, %v6537_v26  ;;  %v8190_v26 = vld [vmem:[%s6780_s15 + $0xb0] sm:$0x1]  ;;  %8994 = vst [vmem:[#allocation11_spill] sm:$0xff] %v8194_v22  ;;  %v8199_v32 = vsel %vm7209_vm7, %v4451_v54, %v4452_v29  ;;  %v4465_v46 = vrot.slane %v4463_v9, 4  ;;  %v4477_v25 = vrot.slane %v8225_v12, 5  ;;  %v4480_v60 = vrot.slane %v8228_v37, 5 }
 0x139   : > { %5979 = vmatprep.mubr.msk.bf16.mxu1 %vm710_vm4, %v6538_v23  ;;  %8995 = vst [vmem:[#allocation12_spill] sm:$0xff] %v8199_v32  ;;  %v4466_v51 = vrot.slane %v8190_v26, 5  ;;  %v5654_v23 = vrot.slane %v5638_v7, 9  ;;  %v8215_v54 = vsel %vm7209_vm7, %v4458_v13, %v4459_v47  ;;  %v8219_v7 = vsel %vm7209_vm7, %v5653_v6, %v4463_v9  ;;  %v6540_v9 = vld [vmem:[%s6780_s15 + $0x54] sm:$0xff]   ;;  %v8239_v32 = vld [vmem:[%s6780_s15 + $0xd0] sm:$0xf] }
 0x13a   : > { %8996 = vst [vmem:[#allocation13_spill] sm:$0xff] %v8215_v54  ;;  %v4472_v6 = vrot.slane %v4470_v4, 4  ;;  %v4473_v47 = vrot.slane %v8209_v48, 5  ;;  %v8248_v29 = vld [vmem:[%s6780_s15 + $0xd4] sm:$0x1]  ;;  %v4484_v22 = vrot.slane %v8239_v32, 5  ;;  %v8262_v40 = vsel %vm7209_vm7, %v5655_v36, %v4477_v25 }
 0x13b   : > { %6112 = vmatmul.mubr.msk.bf16.gmra.mrb[4].mxu0 %vm710_vm4, %v7995_v28  ;;  %v5640_v28 = vld [vmem:[%s6780_s15 + $0xcc] sm:$0xe]  ;;  %v8234_v13 = vsel %vm7209_vm7, %v5654_v23, %v4470_v4  ;;  %v5580_v53 = vld [vmem:[%s6780_s15 + $0xa8] sm:$0xf]  ;;  %v4487_v10 = vrot.slane %v8248_v29, 5  ;;  %v3900_v23 = vshrl.u32 %v5577_v8, 16 }
 0x13c   : > { %6115 = vmatprep.mubr.msk.bf16.mxu0 %vm710_vm4, %v7997_v56  ;;  %v8243_v56 = vsel %vm7209_vm7, %v4465_v46, %v4466_v51  ;;  %v8254_v4 = vsel %vm7209_vm7, %v4472_v6, %v4473_v47  ;;  %v5656_v54 = vrot.slane %v5640_v28, 9  ;;  %v4479_v51 = vrot.slane %v4477_v25, 4 }
 0x13d   : > { %8997 = vst [vmem:[#allocation14_spill] sm:$0xff] %v8243_v56  ;;  %v3903_v56 = vshll.u32 %v5577_v8, 16  ;;  %v4486_v6 = vrot.slane %v4484_v22, 4  ;;  %v8998_v47 = vor.u32 %v7981_v15, %v7979_v59  ;;  %v3909_v25 = vshll.u32 %v8147_v34, 16 }
 0x13e   : > { %v8268_v28 = vsel %vm7209_vm7, %v5656_v54, %v4484_v22  ;;  %v3913_v46 = vshrl.u32 %v8147_v34, 16  ;;  %v3924_v8 = vshrl.u32 %v5580_v53, 16  ;;  %v3927_v54 = vshll.u32 %v5580_v53, 16  ;;  %v9016_v31 = vld [vmem:[#allocation10_spill] sm:$0xff] }
 0x13f   : > { %v3869_v36 = vrot.slane %v8998_v47, 4  ;;  %v3882_v15 = vor.u32 %v8035_v63, %v8033_v49  ;;  %v3933_v34 = vshll.u32 %v8176_v33, 16  ;;  %v3905_v47 = vrot.slane %v3903_v56, 5 }
 0x140   : > { %5980 = vmatmul.mubr.msk.bf16.gmra.mrb[8].mxu1 %vm710_vm4, %v6539_v52  ;;  %v8278_v52 = vsel %vm7209_vm7, %v4479_v51, %v4480_v60  ;;  %v3937_v60 = vshrl.u32 %v8176_v33, 16  ;;  %v6541_v51 = vld [vmem:[%s6780_s15 + $0x60] sm:$0xff]   ;;  %v8999_v49 = vsel %vm6798_vm3, %v7967_v39, %v7962_v19  ;;  %v9000_v63 = vsel %vm6798_vm3, %v7960_v1, %v7914_v50  ;;  %v6542_v33 = vld [vmem:[%s6780_s15 + $0x6c] sm:$0xff]  }
 0x141   : > { %5983 = vmatprep.mubr.msk.bf16.mxu1 %vm710_vm4, %v6540_v9  ;;  %v5672_v22 = vcombine.low %v8262_v40, %v8278_v52  ;;  %v8284_v9 = vsel %vm7209_vm7, %v4486_v6, %v4487_v10  ;;  %v3892_v10 = vor.u32 %v8047_v42, %v8043_v62  ;;  %v3902_v6 = vrot.slane %v3900_v23, 4  ;;  %v6553_v40 = vld [vmem:[%s8924_s3 + $0x18] sm:$0xff]   ;;  %v6554_v52 = vld [vmem:[%s8924_s3 + $0x20] sm:$0xff]  }
 0x142   : > { %v5673_v53 = vcombine.low %v8268_v28, %v8284_v9  ;;  %v3864_v42 = vsel %vm6798_vm3, %v8041_v61, %v7979_v59  ;;  %v8318_v56 = vrot.slane %v3909_v25, 5  ;;  %v3915_v23 = vrot.slane %v3913_v46, 4 }
 0x143   : > { %6116 = vmatmul.mubr.msk.bf16.gmra.mrb[8].mxu0 %vm710_vm4, %v8001_v16  ;;  %v3895_v16 = vshll.u32 %v8144_v5, 16  ;;  %v3874_v5 = vsel %vm6798_vm3, %v3869_v36, %v8027_v35  ;;  %v3926_v19 = vrot.slane %v3924_v8, 4  ;;  %v3929_v39 = vrot.slane %v3927_v54, 5  ;;  %v5583_v36 = vld [vmem:[%s6780_s15 + $0xb4] sm:$0xf] }
 0x144   : > { %6119 = vmatprep.mubr.msk.bf16.mxu0 %vm710_vm4, %v8003_v44  ;;  %v5600_v44 = vcombine.low %v9000_v63, %v8999_v49  ;;  %v9001_v50 = vsel %vm6798_vm3, %v7977_v3, %v7971_v0  ;;  %v9002_v1 = vsel %vm6798_vm3, %v7969_v58, %v7921_v21  ;;  %v3883_v61 = vrot.slane %v3882_v15, 4 }
 0x145   : > { %v5601_v59 = vcombine.low %v9002_v1, %v9001_v50  ;;  %v8330_v49 = vrot.slane %v3933_v34, 5  ;;  %v3939_v35 = vrot.slane %v3937_v60, 4  ;;  %v3893_v46 = vrot.slane %v3892_v10, 4  ;;  %v5586_v34 = vld [vmem:[%s6780_s15 + $0xc0] sm:$0xf] }
 0x146   : > { %v3897_v25 = vrot.slane %v3895_v16, 5  ;;  %v3906_v8 = vor.u32 %v3905_v47, %v3902_v6  ;;  %v3919_v0 = vshll.u32 %v8164_v41, 16  ;;  %v5602_v3 = vcombine.low %v3864_v42, %v3874_v5  ;;  %v6543_v16 = vld [vmem:[%s6780_s15 + $0x78] sm:$0xff]  }
 0x147   : > { %v3916_v21 = vor.u32 %v3915_v23, %v8318_v56  ;;  %v3930_v58 = vor.u32 %v3929_v39, %v3926_v19  ;;  %v3943_v54 = vshll.u32 %v8190_v26, 16  ;;  %v3948_v15 = vshrl.u32 %v5583_v36, 16 }
 0x148   : > { %5984 = vmatmul.mubr.msk.bf16.gmra.mrb[12].mxu1 %vm710_vm4, %v6541_v51  ;;  %v3940_v60 = vor.u32 %v3939_v35, %v8330_v49  ;;  %v3951_v51 = vshll.u32 %v5583_v36, 16  ;;  %v3957_v10 = vshll.u32 %v8179_v30, 16  ;;  %v3961_v41 = vshrl.u32 %v8179_v30, 16 }
 0x149   : > { %5987 = vmatprep.mubr.msk.bf16.mxu1 %vm710_vm4, %v6542_v33  ;;  %v3888_v6 = vsel %vm6798_vm3, %v3883_v61, %v8043_v62  ;;  %v3898_v26 = vsel %vm6798_vm3, %v3893_v46, %v3897_v25  ;;  %v3907_v47 = vrot.slane %v3906_v8, 4  ;;  %v3921_v63 = vrot.slane %v3919_v0, 5 }
 0x14a   : > { %v3972_v33 = vshrl.u32 %v5586_v34, 16  ;;  %v3975_v42 = vshll.u32 %v5586_v34, 16  ;;  %v3981_v5 = vshll.u32 %v8225_v12, 16  ;;  %v3985_v23 = vshrl.u32 %v8225_v12, 16  ;;  %v5589_v12 = vld [vmem:[%s6780_s15 + $0xcc] sm:$0xf] }
 0x14b   : > { %6120 = vmatmul.mubr.msk.bf16.gmra.mrb[12].mxu0 %vm710_vm4, %v5600_v44  ;;  %v6544_v44 = vld [vmem:[%s6780_s15 + $0x84] sm:$0xff]   ;;  %v3917_v30 = vrot.slane %v3916_v21, 4  ;;  %v3931_v19 = vrot.slane %v3930_v58, 4  ;;  %v3945_v39 = vrot.slane %v3943_v54, 5  ;;  %v3950_v50 = vrot.slane %v3948_v15, 4 }
 0x14c   : > { %6123 = vmatprep.mubr.msk.bf16.mxu0 %vm710_vm4, %v5601_v59  ;;  %v3941_v1 = vrot.slane %v3940_v60, 4  ;;  %v3953_v59 = vrot.slane %v3951_v51, 5  ;;  %v3959_v62 = vrot.slane %v3957_v10, 5  ;;  %v3963_v61 = vrot.slane %v3961_v41, 4  ;;  %v6545_v51 = vld [vmem:[%s6780_s15 + $0x90] sm:$0xff]  }
 0x14d   : > { %v5603_v35 = vcombine.low %v3888_v6, %v3898_v26  ;;  %v3974_v36 = vrot.slane %v3972_v33, 4  ;;  %v3977_v46 = vrot.slane %v3975_v42, 5  ;;  %v3983_v25 = vrot.slane %v3981_v5, 5 }
 0x14e   : > { %v3987_v8 = vrot.slane %v3985_v23, 4  ;;  %v3912_v0 = vsel %vm6798_vm3, %v3907_v47, %v8318_v56  ;;  %v3922_v21 = vsel %vm6798_vm3, %v3917_v30, %v3921_v63  ;;  %v3967_v58 = vshll.u32 %v8209_v48, 16 }
 0x14f   : > { %v3936_v54 = vsel %vm6798_vm3, %v3931_v19, %v8330_v49  ;;  %v3946_v15 = vsel %vm6798_vm3, %v3941_v1, %v3945_v39  ;;  %v3954_v34 = vor.u32 %v3953_v59, %v3950_v50  ;;  %v3964_v60 = vor.u32 %v3963_v61, %v3959_v62  ;;  %v6547_v50 = vld [vmem:[%s6780_s15 + $0xa8] sm:$0xff]  }
 0x150   : > { %5988 = vmatmul.mubr.msk.bf16.gmra.mrb[16].mxu1 %vm710_vm4, %v6543_v16  ;;  %v3996_v56 = vshrl.u32 %v5589_v12, 16  ;;  %v3999_v10 = vshll.u32 %v5589_v12, 16  ;;  %v4005_v41 = vshll.u32 %v8239_v32, 16  ;;  %v4009_v48 = vshrl.u32 %v8239_v32, 16  ;;  %v6546_v16 = vld [vmem:[%s6780_s15 + $0x9c] sm:$0xff]  }
 0x151   : > { %5991 = vmatprep.mubr.msk.bf16.mxu1 %vm710_vm4, %v6544_v44  ;;  %v3988_v6 = vor.u32 %v3987_v8, %v3983_v25  ;;  %v3991_v26 = vshll.u32 %v8228_v37, 16  ;;  %v5604_v49 = vcombine.low %v3912_v0, %v3922_v21  ;;  %v5605_v47 = vcombine.low %v3936_v54, %v3946_v15  ;;  %v6611_v12 = vld [vmem:[%s6780_s15 + $0x1c] sm:$0xf]  ;;  %v5625_v0 = vld [vmem:[%s6780_s15 + $0x18] sm:$0xe] }
 0x152   : > { %v3955_v63 = vrot.slane %v3954_v34, 4  ;;  %v3965_v44 = vrot.slane %v3964_v60, 4  ;;  %v3969_v33 = vrot.slane %v3967_v58, 5  ;;  %v3998_v42 = vrot.slane %v3996_v56, 4  ;;  %v6612_v60 = vld [vmem:[%s6780_s15 + $0x20] sm:$0x1] }
 0x153   : > { %6124 = vmatmul.mubr.msk.bf16.gmra.mrb[16].mxu0 %vm710_vm4, %v5602_v3  ;;  %v3978_v3 = vor.u32 %v3977_v46, %v3974_v36  ;;  %v4001_v5 = vrot.slane %v3999_v10, 5  ;;  %v4007_v23 = vrot.slane %v4005_v41, 5  ;;  %v4011_v30 = vrot.slane %v4009_v48, 4  ;;  %v6548_v36 = vld [vmem:[%s6780_s15 + $0xb4] sm:$0xff]   ;;  %v6549_v56 = vld [vmem:[%s6780_s15 + $0xc0] sm:$0xff]  }
 0x154   : > { %6127 = vmatprep.mubr.msk.bf16.mxu0 %vm710_vm4, %v5603_v35  ;;  %v3989_v19 = vrot.slane %v3988_v6, 4  ;;  %v3993_v37 = vrot.slane %v3991_v26, 5  ;;  %v3960_v39 = vsel %vm6798_vm3, %v3955_v63, %v3959_v62  ;;  %v3970_v1 = vsel %vm6798_vm3, %v3965_v44, %v3969_v33  ;;  %v6613_v48 = vld [vmem:[%s6780_s15 + $0x28] sm:$0xf]  ;;  %v5626_v26 = vld [vmem:[%s6780_s15 + $0x24] sm:$0xe] }
 0x155   : > { %v3979_v32 = vrot.slane %v3978_v3, 4  ;;  %v4002_v59 = vor.u32 %v4001_v5, %v3998_v42  ;;  %v4012_v61 = vor.u32 %v4011_v30, %v4007_v23  ;;  %v4015_v35 = vshll.u32 %v8248_v29, 16  ;;  %v9003_v33 = vld [vmem:[#allocation9_spill] sm:$0xff] }
 0x156   : > { %v3994_v8 = vsel %vm6798_vm3, %v3989_v19, %v3993_v37  ;;  %v4379_v62 = vrot.slane %v6611_v12, 5  ;;  %v5606_v21 = vcombine.low %v3960_v39, %v3970_v1  ;;  %v5641_v34 = vrot.slane %v5625_v0, 9  ;;  %v9014_v37 = vld [vmem:[#allocation6_spill] sm:$0xff]  ;;  %v9017_v39 = vld [vmem:[#allocation12_spill] sm:$0xff] }
 0x157   : > { %v3984_v46 = vsel %vm6798_vm3, %v3979_v32, %v3983_v25  ;;  %v4003_v54 = vrot.slane %v4002_v59, 4  ;;  %v4013_v15 = vrot.slane %v4012_v61, 4  ;;  %v4017_v29 = vrot.slane %v4015_v35, 5  ;;  %v6555_v12 = vld [vmem:[%s8924_s3 + $0x28] sm:$0xff]  }
 0x158   : > { %5992 = vmatmul.mubr.msk.bf16.gmra.mrb[20].mxu1 %vm710_vm4, %v6545_v51  ;;  %v5607_v58 = vcombine.low %v3984_v46, %v3994_v8  ;;  %v4381_v25 = vrot.slane %v4379_v62, 4  ;;  %v4382_v51 = vrot.slane %v6612_v60, 5  ;;  %v4380_v3 = vsel %vm7209_vm7, %v5641_v34, %v4379_v62 }
 0x159   : > { %5995 = vmatprep.mubr.msk.bf16.mxu1 %vm710_vm4, %v6546_v16  ;;  %v4008_v10 = vsel %vm6798_vm3, %v4003_v54, %v4007_v23  ;;  %v4018_v41 = vsel %vm6798_vm3, %v4013_v15, %v4017_v29  ;;  %v4386_v16 = vrot.slane %v6613_v48, 5  ;;  %v5642_v63 = vrot.slane %v5626_v26, 9  ;;  %v6557_v15 = vld [vmem:[%s8924_s3 + $0x38] sm:$0xff]  }
 0x15a   : > { %v4383_v6 = vsel %vm7209_vm7, %v4381_v25, %v4382_v51  ;;  %v4389_v42 = vrot.slane %v9003_v33, 5  ;;  %v9004_v30 = vcombine.low %v8051_v27, %v8065_v45  ;;  %v9005_v32 = vcombine.low %v8057_v17, %v8075_v24  ;;  %v9010_v45 = vld [vmem:[#allocation7_spill] sm:$0xff]  ;;  %v9011_v24 = vld [vmem:[#allocation5_spill] sm:$0xff] }
 0x15b   : > { %6128 = vmatmul.mubr.msk.bf16.gmra.mrb[20].mxu0 %vm710_vm4, %v5604_v49  ;;  %v5608_v49 = vcombine.low %v4008_v10, %v4018_v41  ;;  %v4388_v44 = vrot.slane %v4386_v16, 4  ;;  %v4387_v20 = vsel %vm7209_vm7, %v5642_v63, %v4386_v16  ;;  %v9006_v19 = vcombine.low %v8079_v18, %v8091_v55  ;;  %v9013_v55 = vld [vmem:[#allocation8_spill] sm:$0xff] }
 0x15c   : > { %6131 = vmatprep.mubr.msk.bf16.mxu0 %vm710_vm4, %v5605_v47  ;;  %v5658_v47 = vcombine.low %v4380_v3, %v4383_v6  ;;  %v9008_v27 = vcombine.low %v8110_v43, %v8122_v14  ;;  %v9009_v17 = vcombine.low %v8115_v2, %v8136_v38  ;;  %v9012_v18 = vcombine.low %v9010_v45, %v9011_v24  ;;  %v9019_v14 = vld [vmem:[#allocation11_spill] sm:$0xff]  ;;  %v9022_v38 = vld [vmem:[#allocation14_spill] sm:$0xff] }
 0x15d   : > { %v4390_v5 = vsel %vm7209_vm7, %v4388_v44, %v4389_v42  ;;  %v9015_v11 = vcombine.low %v9013_v55, %v9014_v37  ;;  %v9018_v43 = vcombine.low %v9016_v31, %v9017_v39  ;;  %v9023_v1 = vcombine.low %v8219_v7, %v9022_v38  ;;  %v6550_v7 = vld [vmem:[%s8924_s3] sm:$0xff]  }
 0x15e   : > { %v5659_v23 = vcombine.low %v4387_v20, %v4390_v5  ;;  %v9024_v59 = vcombine.low %v8234_v13, %v8254_v4  ;;  %v6678_v61 = vmov 0.0   ;;  %v6551_v13 = vld [vmem:[%s8924_s3 + $0x8] sm:$0xff]   ;;  %v6552_v4 = vld [vmem:[%s8924_s3 + $0x10] sm:$0xff]  }
 0x15f   : > { %6173 = vmatprep.subr.bf16.mxu1 %v6678_v61 }
 0x160   : > { %5996 = vmatmul.mubr.msk.bf16.gmra.mrb[24].mxu1 %vm710_vm4, %v6547_v50  ;;  %v9020_v50 = vld [vmem:[#allocation13_spill] sm:$0xff] }
 0x161   : > { %5999 = vmatprep.mubr.msk.bf16.mxu1 %vm710_vm4, %v6548_v36  ;;  %v9021_v2 = vcombine.low %v9019_v14, %v9020_v50  ;;  %6174 = vmatpush3.bf16.msra.mxu1 %v6550_v7 }
 0x162   : > { %6175 = vmatprep.subr.bf16.mxu1 %v6678_v61 }
 0x163   : > { %6132 = vmatmul.mubr.msk.bf16.gmra.mrb[24].mxu0 %vm710_vm4, %v5606_v21  ;;  %v6556_v21 = vld [vmem:[%s8924_s3 + $0x30] sm:$0xff]  }
 0x164   : > { %6135 = vmatprep.mubr.msk.bf16.mxu0 %vm710_vm4, %v5607_v58 }
 0x165   : > { %6176 = vmatpush3.bf16.msra.mxu1 %v6551_v13 }
 0x166   : > { %6177 = vmatprep.subr.bf16.mxu1 %v6678_v61 }
 0x168   : > { %6000 = vmatmul.mubr.msk.bf16.gmra.mrb[28].mxu1 %vm710_vm4, %v6549_v56 }
 0x169   : > { %6178 = vmatpush3.bf16.msra.mxu1 %v6552_v4  ;;  %6189 = vmatprep.mubr.msk.bf16.mxu1 %vm6679_vm8, %v6678_v61 }
 0x16a   : > { %6179 = vmatprep.subr.bf16.mxu1 %v6678_v61 }
 0x16b   : > { %6136 = vmatmul.mubr.msk.bf16.gmra.mrb[28].mxu0 %vm710_vm4, %v5608_v49 }
 0x16c   : > { %6141 = vmatprep.mubr.msk.bf16.mxu0 %vm710_vm4, %v5658_v47 }
 0x16d   : > { %6180 = vmatpush3.bf16.msra.mxu1 %v6553_v40 }
 0x16e   : > { %6181 = vmatprep.subr.bf16.mxu1 %v6678_v61 }
 0x171   : > { %6182 = vmatpush3.bf16.msra.mxu1 %v6554_v52 }
 0x172   : > { %6183 = vmatprep.subr.bf16.mxu1 %v6678_v61 }
 0x173   : > { %6142 = vmatmul.mubr.msk.bf16.vlgmr.msra.gmra.mrb[0].mxu0 %vm710_vm4, %v5659_v23 }
 0x174   : > { %6145 = vmatprep.mubr.msk.bf16.mxu0 %vm710_vm4, %v9004_v30  ;;  %v8547_v30 = vld [vmem:[%s8923_s2] ss:$0 sm:$0xff] }
 0x175   : > { %6184 = vmatpush3.bf16.msra.mxu1 %v6555_v12 }
 0x176   : > { %6185 = vmatprep.subr.bf16.mxu1 %v6678_v61 }
 0x179   : > { %6186 = vmatpush3.bf16.msra.mxu1 %v6556_v21 }
 0x17a   : > { %6187 = vmatprep.subr.bf16.mxu1 %v6678_v61 }
 0x17b   : > { %6146 = vmatmul.mubr.msk.bf16.gmra.mrb[4].mxu0 %vm710_vm4, %v9005_v32 }
 0x17c   : > { %6149 = vmatprep.mubr.msk.bf16.mxu0 %vm710_vm4, %v9006_v19 }
 0x17d   : > { %6188 = vmatpush3.bf16.msra.mxu1 %v6557_v15 }
 0x183   : > { %6150 = vmatmul.mubr.msk.bf16.gmra.mrb[8].mxu0 %vm710_vm4, %v9007_v57 }
 0x184   : > { %6153 = vmatprep.mubr.msk.bf16.mxu0 %vm710_vm4, %v9008_v27 }
 0x18b   : > { %6154 = vmatmul.mubr.msk.bf16.gmra.mrb[12].mxu0 %vm710_vm4, %v9009_v17 }
 0x18c   : > { %6157 = vmatprep.mubr.msk.bf16.mxu0 %vm710_vm4, %v9012_v18 }
 0x193   : > { %6158 = vmatmul.mubr.msk.bf16.gmra.mrb[16].mxu0 %vm710_vm4, %v9015_v11 }
 0x194   : > { %6161 = vmatprep.mubr.msk.bf16.mxu0 %vm710_vm4, %v9018_v43 }
 0x19b   : > { %6162 = vmatmul.mubr.msk.bf16.gmra.mrb[20].mxu0 %vm710_vm4, %v9021_v2 }
 0x19c   : > { %6165 = vmatprep.mubr.msk.bf16.mxu0 %vm710_vm4, %v9023_v1 }
 0x1a3   : > { %6166 = vmatmul.mubr.msk.bf16.gmra.mrb[24].mxu0 %vm710_vm4, %v9024_v59 }
 0x1a4   : > { %6169 = vmatprep.mubr.msk.bf16.mxu0 %vm710_vm4, %v5672_v22 }
 0x1ab   : > { %6170 = vmatmul.mubr.msk.bf16.gmra.mrb[28].mxu0 %vm710_vm4, %v5673_v53 }
 0x203   : > { %v5973_v28 = vpop.f32.mrb[0].mxu1 }
 0x204   : > { %v1873_v22 = vpop.f32.mrb[1].mxu1 }
 0x205   : > { %v5974_v9 = vpop.f32.mrb[2].mxu1 }
 0x206   : > { %v1876_v53 = vpop.f32.mrb[3].mxu1 }
 0x20b   : > { %v5977_v35 = vpop.f32.mrb[4].mxu1 }
 0x20c   : > { %v1889_v36 = vpop.f32.mrb[5].mxu1 }
 0x20d   : > { %v5978_v46 = vpop.f32.mrb[6].mxu1 }
 0x20e   : > { %v1892_v8 = vpop.f32.mrb[7].mxu1 }
 0x213   : > { %v8490_v62 = vpop.f32.mrb[8].mxu1 }
 0x214   : > { %v8492_v0 = vpop.f32.mrb[9].mxu1 }
 0x215   : > { %v8497_v58 = vpop.f32.mrb[10].mxu1 }
 0x216   : > { %v8499_v54 = vpop.f32.mrb[11].mxu1 }
 0x21b   : > { %v8504_v29 = vpop.f32.mrb[12].mxu1 }
 0x21c   : > { %v8506_v34 = vpop.f32.mrb[13].mxu1 }
 0x21d   : > { %v8508_v25 = vpop.f32.mrb[14].mxu1 }
 0x21e   : > { %v8510_v60 = vpop.f32.mrb[15].mxu1 }
 0x223   : > { %v8512_v51 = vpop.f32.mrb[16].mxu1 }
 0x224   : > { %v8514_v56 = vpop.f32.mrb[17].mxu1 }
 0x225   : > { %v8516_v10 = vpop.f32.mrb[18].mxu1 }
 0x226   : > { %v8518_v41 = vpop.f32.mrb[19].mxu1 }
 0x22b   : > { %v8520_v48 = vpop.f32.mrb[20].mxu1 }
 0x22c   : > { %v8522_v16 = vpop.f32.mrb[21].mxu1 }
 0x22d   : > { %v8524_v3 = vpop.f32.mrb[22].mxu1 }
 0x22e   : > { %v8526_v6 = vpop.f32.mrb[23].mxu1 }
 0x233   : > { %v8528_v26 = vpop.f32.mrb[24].mxu1 }
 0x234   : > { %v8530_v49 = vpop.f32.mrb[25].mxu1 }
 0x235   : > { %v8532_v47 = vpop.f32.mrb[26].mxu1 }
 0x236   : > { %v8534_v63 = vpop.f32.mrb[27].mxu1 }
 0x23b   : > { %v8536_v44 = vpop.f32.mrb[28].mxu1 }
 0x23c   : > { %v8538_v33 = vpop.f32.mrb[29].mxu1 }
 0x23d   : > { %v8540_v42 = vpop.f32.mrb[30].mxu1 }
 0x23e   : > { %v8542_v20 = vpop.f32.mrb[31].mxu1 }
 0x246   : > { %v6143_v5 = vpop.f32.mrb[0].mxu0 }
 0x247   : > { %v6193_v23 = vadd.f32 %v6143_v5, %v5973_v28  ;;  %v4624_v32 = vpop.f32.mrb[1].mxu0 }
 0x248   : > { %v6194_v19 = vadd.f32 %v4624_v32, %v1873_v22  ;;  %v6144_v57 = vpop.f32.mrb[2].mxu0 }
 0x249   : > { %v6195_v27 = vadd.f32 %v6144_v57, %v5974_v9  ;;  %v4627_v17 = vpop.f32.mrb[3].mxu0  ;;  %v8553_v18 = vadd.f32 %v6193_v23, %v8547_v30 }
 0x24a   : > { %v8550_v45 = vadd.f32 %v6194_v19, %v8547_v30  ;;  %v6196_v24 = vadd.f32 %v4627_v17, %v1876_v53 }
 0x24b   : > { %v8560_v11 = vadd.f32 %v6195_v27, %v8547_v30  ;;  %v4824_v50 = vmax.f32 %v8553_v18, 0.0 }
 0x24c   : > { %v8556_v55 = vadd.f32 %v6196_v24, %v8547_v30  ;;  %v4822_v37 = vmax.f32 %v8550_v45, 0.0 }
 0x24d   : > { %v4825_v7 = vmax.f32 %v8560_v11, 0.0 }
 0x24e   : > { %v4823_v31 = vmax.f32 %v8556_v55, 0.0  ;;  %v6147_v39 = vpop.f32.mrb[4].mxu0 }
 0x24f   : > { %v6197_v43 = vadd.f32 %v6147_v39, %v5977_v35  ;;  %v4640_v14 = vpop.f32.mrb[5].mxu0 }
 0x250   : > { %v4854_v2 = vadd.f32 %v4823_v31, %v4822_v37  ;;  %v6198_v38 = vadd.f32 %v4640_v14, %v1889_v36  ;;  %v6148_v1 = vpop.f32.mrb[6].mxu0 }
 0x251   : > { %v6199_v59 = vadd.f32 %v6148_v1, %v5978_v46  ;;  %v4643_v61 = vpop.f32.mrb[7].mxu0  ;;  %v8575_v28 = vadd.f32 %v6197_v43, %v8547_v30 }
 0x252   : > { %v4855_v13 = vadd.f32 %v4854_v2, %v4824_v50  ;;  %v8572_v4 = vadd.f32 %v6198_v38, %v8547_v30  ;;  %v6200_v40 = vadd.f32 %v4643_v61, %v1892_v8 }
 0x253   : > { %v8586_v35 = vadd.f32 %v6199_v59, %v8547_v30  ;;  %v4828_v21 = vmax.f32 %v8575_v28, 0.0 }
 0x254   : > { %v4826_v52 = vmax.f32 %v8572_v4, 0.0  ;;  %v4856_v22 = vadd.f32 %v4855_v13, %v4825_v7  ;;  %v8581_v9 = vadd.f32 %v6200_v40, %v8547_v30 }
 0x255   : > { %v4829_v57 = vmax.f32 %v8586_v35, 0.0 }
 0x256   : > { %v4857_v53 = vadd.f32 %v4856_v22, %v4826_v52  ;;  %v4827_v36 = vmax.f32 %v8581_v9, 0.0  ;;  %v6151_v46 = vpop.f32.mrb[8].mxu0 }
 0x257   : > { %v6201_v8 = vadd.f32 %v6151_v46, %v8490_v62  ;;  %v4656_v12 = vpop.f32.mrb[9].mxu0 }
 0x258   : > { %v4858_v15 = vadd.f32 %v4857_v53, %v4827_v36  ;;  %v6202_v5 = vadd.f32 %v4656_v12, %v8492_v0  ;;  %v6152_v23 = vpop.f32.mrb[10].mxu0 }
 0x259   : > { %v6203_v32 = vadd.f32 %v6152_v23, %v8497_v58  ;;  %v4659_v19 = vpop.f32.mrb[11].mxu0  ;;  %v8603_v24 = vadd.f32 %v6201_v8, %v8547_v30 }
 0x25a   : > { %v4859_v27 = vadd.f32 %v4858_v15, %v4828_v21  ;;  %v8599_v17 = vadd.f32 %v6202_v5, %v8547_v30  ;;  %v6204_v62 = vadd.f32 %v4659_v19, %v8499_v54 }
 0x25b   : > { %v8614_v14 = vadd.f32 %v6203_v32, %v8547_v30  ;;  %v4832_v59 = vmax.f32 %v8603_v24, 0.0 }
 0x25c   : > { %v4830_v39 = vmax.f32 %v8599_v17, 0.0  ;;  %v4860_v0 = vadd.f32 %v4859_v27, %v4829_v57  ;;  %v8609_v58 = vadd.f32 %v6204_v62, %v8547_v30 }
 0x25d   : > { %v4833_v46 = vmax.f32 %v8614_v14, 0.0 }
 0x25e   : > { %v4861_v43 = vadd.f32 %v4860_v0, %v4830_v39  ;;  %v4831_v2 = vmax.f32 %v8609_v58, 0.0  ;;  %v6155_v54 = vpop.f32.mrb[12].mxu0 }
 0x25f   : > { %v6205_v38 = vadd.f32 %v6155_v54, %v8504_v29  ;;  %v4672_v1 = vpop.f32.mrb[13].mxu0 }
 0x260   : > { %v4862_v61 = vadd.f32 %v4861_v43, %v4831_v2  ;;  %v6206_v13 = vadd.f32 %v4672_v1, %v8506_v34  ;;  %v6156_v40 = vpop.f32.mrb[14].mxu0 }
 0x261   : > { %v6207_v22 = vadd.f32 %v6156_v40, %v8508_v25  ;;  %v4675_v53 = vpop.f32.mrb[15].mxu0  ;;  %v8631_v15 = vadd.f32 %v6205_v38, %v8547_v30 }
 0x262   : > { %v4863_v8 = vadd.f32 %v4862_v61, %v4832_v59  ;;  %v8627_v12 = vadd.f32 %v6206_v13, %v8547_v30  ;;  %v6208_v29 = vadd.f32 %v4675_v53, %v8510_v60 }
 0x263   : > { %v8642_v32 = vadd.f32 %v6207_v22, %v8547_v30  ;;  %v4836_v0 = vmax.f32 %v8631_v15, 0.0 }
 0x264   : > { %v4834_v5 = vmax.f32 %v8627_v12, 0.0  ;;  %v4864_v34 = vadd.f32 %v4863_v8, %v4833_v46  ;;  %v8637_v25 = vadd.f32 %v6208_v29, %v8547_v30 }
 0x265   : > { %v4837_v13 = vmax.f32 %v8642_v32, 0.0 }
 0x266   : > { %v4865_v23 = vadd.f32 %v4864_v34, %v4834_v5  ;;  %v4835_v19 = vmax.f32 %v8637_v25, 0.0  ;;  %v6159_v60 = vpop.f32.mrb[16].mxu0 }
 0x267   : > { %v6209_v27 = vadd.f32 %v6159_v60, %v8512_v51  ;;  %v4688_v62 = vpop.f32.mrb[17].mxu0 }
 0x268   : > { %v4866_v43 = vadd.f32 %v4865_v23, %v4835_v19  ;;  %v6210_v54 = vadd.f32 %v4688_v62, %v8514_v56  ;;  %v6160_v38 = vpop.f32.mrb[18].mxu0 }
 0x269   : > { %v6211_v1 = vadd.f32 %v6160_v38, %v8516_v10  ;;  %v4691_v61 = vpop.f32.mrb[19].mxu0  ;;  %v8659_v53 = vadd.f32 %v6209_v27, %v8547_v30 }
 0x26a   : > { %v4867_v40 = vadd.f32 %v4866_v43, %v4836_v0  ;;  %v8655_v22 = vadd.f32 %v6210_v54, %v8547_v30  ;;  %v6212_v51 = vadd.f32 %v4691_v61, %v8518_v41 }
 0x26b   : > { %v8670_v34 = vadd.f32 %v6211_v1, %v8547_v30  ;;  %v8944_v62 = vmax.f32 %v8659_v53, 0.0 }
 0x26c   : > { %v8957_v8 = vmax.f32 %v8655_v22, 0.0  ;;  %v4868_v56 = vadd.f32 %v4867_v40, %v4837_v13  ;;  %v8665_v10 = vadd.f32 %v6212_v51, %v8547_v30  ;;  %v9025_v28 = vmax.f32 %v8655_v22, 0.0 }
 0x26d   : > { %v8943_v1 = vmax.f32 %v8670_v34, 0.0 }
 0x26e   : > { %v4869_v29 = vadd.f32 %v4868_v56, %v8957_v8  ;;  %v8946_v23 = vmax.f32 %v8665_v10, 0.0  ;;  %v6163_v41 = vpop.f32.mrb[20].mxu0  ;;  %v9026_v9 = vmax.f32 %v8665_v10, 0.0 }
 0x26f   : > { %v6213_v60 = vadd.f32 %v6163_v41, %v8520_v48  ;;  %v4704_v27 = vpop.f32.mrb[21].mxu0 }
 0x270   : > { %v4870_v43 = vadd.f32 %v4869_v29, %v8946_v23  ;;  %v6214_v54 = vadd.f32 %v4704_v27, %v8522_v16  ;;  %v6164_v38 = vpop.f32.mrb[22].mxu0 }
 0x271   : > { %v6215_v61 = vadd.f32 %v6164_v38, %v8524_v3  ;;  %v4707_v40 = vpop.f32.mrb[23].mxu0  ;;  %v8687_v41 = vadd.f32 %v6213_v60, %v8547_v30 }
 0x272   : > { %v4871_v51 = vadd.f32 %v4870_v43, %v8944_v62  ;;  %v8683_v56 = vadd.f32 %v6214_v54, %v8547_v30  ;;  %v6216_v48 = vadd.f32 %v4707_v40, %v8526_v6 }
 0x273   : > { %v8698_v43 = vadd.f32 %v6215_v61, %v8547_v30  ;;  %v8948_v40 = vmax.f32 %v8687_v41, 0.0 }
 0x274   : > { %v8945_v29 = vmax.f32 %v8683_v56, 0.0  ;;  %v4872_v16 = vadd.f32 %v4871_v51, %v8943_v1  ;;  %v8693_v3 = vadd.f32 %v6216_v48, %v8547_v30  ;;  %v9029_v24 = vmax.f32 %v8683_v56, 0.0 }
 0x275   : > { %v8947_v61 = vmax.f32 %v8698_v43, 0.0 }
 0x276   : > { %v4873_v27 = vadd.f32 %v4872_v16, %v8945_v29  ;;  %v8950_v54 = vmax.f32 %v8693_v3, 0.0  ;;  %v6167_v6 = vpop.f32.mrb[24].mxu0  ;;  %v9030_v58 = vmax.f32 %v8693_v3, 0.0 }
 0x277   : > { %v6217_v60 = vadd.f32 %v6167_v6, %v8528_v26  ;;  %v4720_v38 = vpop.f32.mrb[25].mxu0 }
 0x278   : > { %v4874_v51 = vadd.f32 %v4873_v27, %v8950_v54  ;;  %v6218_v48 = vadd.f32 %v4720_v38, %v8530_v49  ;;  %v6168_v1 = vpop.f32.mrb[26].mxu0 }
 0x279   : > { %v6219_v62 = vadd.f32 %v6168_v1, %v8532_v47  ;;  %v4723_v16 = vpop.f32.mrb[27].mxu0  ;;  %v8715_v6 = vadd.f32 %v6217_v60, %v8547_v30 }
 0x27a   : > { %v4875_v29 = vadd.f32 %v4874_v51, %v8948_v40  ;;  %v8711_v23 = vadd.f32 %v6218_v48, %v8547_v30  ;;  %v6220_v26 = vadd.f32 %v4723_v16, %v8534_v63 }
 0x27b   : > { %v8726_v38 = vadd.f32 %v6219_v62, %v8547_v30  ;;  %v8953_v16 = vmax.f32 %v8715_v6, 0.0 }
 0x27c   : > { %v8949_v27 = vmax.f32 %v8711_v23, 0.0  ;;  %v4876_v49 = vadd.f32 %v4875_v29, %v8947_v61  ;;  %v8721_v47 = vadd.f32 %v6220_v26, %v8547_v30  ;;  %v9033_v15 = vmax.f32 %v8711_v23, 0.0 }
 0x27d   : > { %v8952_v62 = vmax.f32 %v8726_v38, 0.0 }
 0x27e   : > { %v4877_v1 = vadd.f32 %v4876_v49, %v8949_v27  ;;  %v8954_v51 = vmax.f32 %v8721_v47, 0.0  ;;  %v6171_v63 = vpop.f32.mrb[28].mxu0  ;;  %v9034_v25 = vmax.f32 %v8721_v47, 0.0 }
 0x27f   : > { %v6221_v60 = vadd.f32 %v6171_v63, %v8536_v44  ;;  %v4736_v48 = vpop.f32.mrb[29].mxu0 }
 0x280   : > { %v4878_v29 = vadd.f32 %v4877_v1, %v8954_v51  ;;  %v6222_v26 = vadd.f32 %v4736_v48, %v8538_v33  ;;  %v6172_v61 = vpop.f32.mrb[30].mxu0 }
 0x281   : > { %v6223_v40 = vadd.f32 %v6172_v61, %v8540_v42  ;;  %v4739_v49 = vpop.f32.mrb[31].mxu0  ;;  %v8743_v63 = vadd.f32 %v6221_v60, %v8547_v30 }
 0x282   : > { %v4879_v27 = vadd.f32 %v4878_v29, %v8953_v16  ;;  %v8739_v54 = vadd.f32 %v6222_v26, %v8547_v30  ;;  %v6224_v44 = vadd.f32 %v4739_v49, %v8542_v20 }
 0x283   : > { %v8754_v48 = vadd.f32 %v6223_v40, %v8547_v30  ;;  %v8956_v20 = vmax.f32 %v8743_v63, 0.0  ;;  %v9039_v56 = vmax.f32 %v8743_v63, 0.0 }
 0x284   : > { %v8951_v1 = vmax.f32 %v8739_v54, 0.0  ;;  %v4880_v33 = vadd.f32 %v4879_v27, %v8952_v62  ;;  %v8749_v42 = vadd.f32 %v6224_v44, %v8547_v30 }
 0x285   : > { %v8958_v26 = vmax.f32 %v8754_v48, 0.0  ;;  %v9040_v3 = vmax.f32 %v8754_v48, 0.0 }
 0x286   : > { %v4881_v61 = vadd.f32 %v4880_v33, %v8951_v1  ;;  %v8955_v29 = vmax.f32 %v8749_v42, 0.0 }
 0x288   : > { %v4882_v60 = vadd.f32 %v4881_v61, %v8955_v29  ;;  %v4909_v61 = vld [vmem:[%s8925_s4] sm:$0x1] }
 0x28a   : > { %v4883_v27 = vadd.f32 %v4882_v60, %v8956_v20 }
 0x28c   : > { %v4884_v49 = vadd.f32 %v4883_v27, %v8958_v26 }
 0x28e   : > { %v4885_v44 = vrot.slane %v4884_v49, 4 }
 0x290   : > { %v4886_v33 = vadd.f32 %v4885_v44, %v4884_v49 }
 0x292   : > { %v4887_v1 = vrot.slane %v4886_v33, 2 }
 0x294   : > { %v4888_v30 = vadd.f32 %v4887_v1, %v4886_v33  ;;  %v5004_v33 = vlaneseq }
 0x296   : > { %v4889_v40 = vrot.slane %v4888_v30, 1 }
 0x298   : > { %v4890_v62 = vadd.f32 %v4889_v40, %v4888_v30 }
 0x29a   : > { %v4891_v16 = vmul.f32 0.00390625, %v4890_v62 }
 0x29c   : > { %v4892_v51 = vpack.c.bf16 %v4891_v16, %v4891_v16  ;;  %v5005_v16 = vshrl.u32 %v5004_v33, 7 }
 0x29e   : > { %6190 = vmatmul.mubr.bf16.vlgmr.msra.gmra.mrb[32].mxu1 %v4892_v51  ;;  %v5006_v51 = vsub.s32 0, %v5005_v16 }
 0x371   : > { %v4992_v29 = vpop.f32.mrb[32].mxu1 }
 0x372   : > { %v4993_v60 = vadd.f32 %v4992_v29, %v4909_v61  ;;  %v6191_v20 = vpop.f32.mrb[33].mxu1 }
 0x373   : > { %v4995_v8 = vpop.f32.mrb[34].mxu1 }
 0x374   : > { %v4998_v27 = vsub.f32 0.0, %v4993_v60  ;;  %v6192_v26 = vpop.f32.mrb[35].mxu1 }
 0x376   : > { %v4999_v49 = vmul.f32 1.442695, %v4998_v27 }
 0x378   : > { %6558 = vpow2.f32 %v4999_v49 }
 0x382   : > { %v6559_v1 = vpop.eup %6558 }
 0x383   : > { %v5001_v44 = vadd.f32 1.0, %v6559_v1 }
 0x385   : > { %6560 = vrcp.f32 %v5001_v44 }
 0x38f   : > { %v6561_v62 = vpop.eup %6560 }
 0x390   : > { %v5007_v30 = vrot.slane %v6561_v62, %v5006_v51 }
 0x392   : > { %v5008_v29 = vmul.f32 %v5007_v30, %v4822_v37  ;;  %v5009_v8 = vmul.f32 %v5007_v30, %v4823_v31  ;;  %v5010_v20 = vmul.f32 %v5007_v30, %v4824_v50  ;;  %v5011_v26 = vmul.f32 %v5007_v30, %v4825_v7 }
 0x393   : > { %v5012_v40 = vmul.f32 %v5007_v30, %v4826_v52  ;;  %v5013_v61 = vmul.f32 %v5007_v30, %v4827_v36  ;;  %v5014_v60 = vmul.f32 %v5007_v30, %v4828_v21  ;;  %v5015_v45 = vmul.f32 %v5007_v30, %v4829_v57 }
 0x394   : > { %v5016_v55 = vmul.f32 %v5007_v30, %v4830_v39  ;;  %v5017_v18 = vmul.f32 %v5007_v30, %v4831_v2  ;;  %v5018_v37 = vmul.f32 %v5007_v30, %v4832_v59  ;;  %v5019_v11 = vmul.f32 %v5007_v30, %v4833_v46  ;;  %5040 = vst [vmem:[%s8795_s23] sm:$0xff] %v5008_v29 }
 0x395   : > { %5041 = vst [vmem:[%s8795_s23 + $0x8] sm:$0xff] %v5009_v8  ;;  %5042 = vst [vmem:[%s8795_s23 + $0x10] sm:$0xff] %v5010_v20  ;;  %v5020_v31 = vmul.f32 %v5007_v30, %v4834_v5  ;;  %v5021_v50 = vmul.f32 %v5007_v30, %v4835_v19  ;;  %v5022_v7 = vmul.f32 %v5007_v30, %v4836_v0  ;;  %v9027_v36 = vmax.f32 %v8659_v53, 0.0 }
 0x396   : > { %5043 = vst [vmem:[%s8795_s23 + $0x18] sm:$0xff] %v5011_v26  ;;  %v5023_v4 = vmul.f32 %v5007_v30, %v4837_v13  ;;  %5044 = vst [vmem:[%s8795_s23 + $0x20] sm:$0xff] %v5012_v40  ;;  %v5024_v52 = vmul.f32 %v5007_v30, %v9025_v28  ;;  %v5025_v35 = vmul.f32 %v5007_v30, %v9026_v9  ;;  %v9028_v57 = vmax.f32 %v8670_v34, 0.0 }
 0x397   : > { %5045 = vst [vmem:[%s8795_s23 + $0x28] sm:$0xff] %v5013_v61  ;;  %5046 = vst [vmem:[%s8795_s23 + $0x30] sm:$0xff] %v5014_v60  ;;  %v5026_v21 = vmul.f32 %v5007_v30, %v9027_v36  ;;  %v5028_v39 = vmul.f32 %v5007_v30, %v9029_v24  ;;  %v5029_v14 = vmul.f32 %v5007_v30, %v9030_v58  ;;  %v9031_v2 = vmax.f32 %v8687_v41, 0.0 }
 0x398   : > { %5047 = vst [vmem:[%s8795_s23 + $0x38] sm:$0xff] %v5015_v45  ;;  %v5027_v17 = vmul.f32 %v5007_v30, %v9028_v57  ;;  %5048 = vst [vmem:[%s8795_s23 + $0x40] sm:$0xff] %v5016_v55  ;;  %v9032_v46 = vmax.f32 %v8698_v43, 0.0  ;;  %v5032_v5 = vmul.f32 %v5007_v30, %v9033_v15  ;;  %v5033_v32 = vmul.f32 %v5007_v30, %v9034_v25 }
 0x399   : > { %5049 = vst [vmem:[%s8795_s23 + $0x48] sm:$0xff] %v5017_v18  ;;  %5050 = vst [vmem:[%s8795_s23 + $0x50] sm:$0xff] %v5018_v37  ;;  %v5030_v59 = vmul.f32 %v5007_v30, %v9031_v2  ;;  %v9035_v19 = vmax.f32 %v8715_v6, 0.0  ;;  %v9036_v13 = vmax.f32 %v8726_v38, 0.0  ;;  %v9037_v53 = vmax.f32 %v8739_v54, 0.0 }
 0x39a   : > { %5051 = vst [vmem:[%s8795_s23 + $0x58] sm:$0xff] %v5019_v11  ;;  %v5031_v12 = vmul.f32 %v5007_v30, %v9032_v46  ;;  %5052 = vst [vmem:[%s8795_s23 + $0x60] sm:$0xff] %v5020_v31  ;;  %v9038_v34 = vmax.f32 %v8749_v42, 0.0  ;;  %v5038_v41 = vmul.f32 %v5007_v30, %v9039_v56  ;;  %v5039_v43 = vmul.f32 %v5007_v30, %v9040_v3 }
 0x39b   : > { %5053 = vst [vmem:[%s8795_s23 + $0x68] sm:$0xff] %v5021_v50  ;;  %5054 = vst [vmem:[%s8795_s23 + $0x70] sm:$0xff] %v5022_v7  ;;  %v5034_v0 = vmul.f32 %v5007_v30, %v9035_v19  ;;  %v5035_v22 = vmul.f32 %v5007_v30, %v9036_v13  ;;  %v5036_v10 = vmul.f32 %v5007_v30, %v9037_v53 }
 0x39c   : > { %5055 = vst [vmem:[%s8795_s23 + $0x78] sm:$0xff] %v5023_v4  ;;  %5056 = vst [vmem:[%s8795_s23 + $0x80] sm:$0xff] %v5024_v52  ;;  %v5037_v23 = vmul.f32 %v5007_v30, %v9038_v34 }
 0x39d   : > { %5057 = vst [vmem:[%s8795_s23 + $0x88] sm:$0xff] %v5025_v35  ;;  %5058 = vst [vmem:[%s8795_s23 + $0x90] sm:$0xff] %v5026_v21 }
 0x39e   : > { %5059 = vst [vmem:[%s8795_s23 + $0x98] sm:$0xff] %v5027_v17  ;;  %5060 = vst [vmem:[%s8795_s23 + $0xa0] sm:$0xff] %v5028_v39 }
 0x39f   : > { %5061 = vst [vmem:[%s8795_s23 + $0xa8] sm:$0xff] %v5029_v14  ;;  %5062 = vst [vmem:[%s8795_s23 + $0xb0] sm:$0xff] %v5030_v59 }
 0x3a0   : > { %5063 = vst [vmem:[%s8795_s23 + $0xb8] sm:$0xff] %v5031_v12  ;;  %5064 = vst [vmem:[%s8795_s23 + $0xc0] sm:$0xff] %v5032_v5 }
 0x3a1   : > { %5065 = vst [vmem:[%s8795_s23 + $0xc8] sm:$0xff] %v5033_v32  ;;  %5066 = vst [vmem:[%s8795_s23 + $0xd0] sm:$0xff] %v5034_v0 }
 0x3a2   : > { %5067 = vst [vmem:[%s8795_s23 + $0xd8] sm:$0xff] %v5035_v22  ;;  %5068 = vst [vmem:[%s8795_s23 + $0xe0] sm:$0xff] %v5036_v10 }
 0x3a3   : > { %5069 = vst [vmem:[%s8795_s23 + $0xe8] sm:$0xff] %v5037_v23  ;;  %5070 = vst [vmem:[%s8795_s23 + $0xf0] sm:$0xff] %v5038_v41 }
 0x3a4   : > { %5071 = vst [vmem:[%s8795_s23 + $0xf8] sm:$0xff] %v5039_v43 }
 0x3a5   : > { %6627 = shalt.err (!%p6624_p3)
}
 0x3a6   : > { %s6628_s12 = scalar_lea.hbm %s8854_s6, 4096  ;;  %s6632_s15 = scalar_lea.hbm %s8926_s5, 8192 }
 0x3a7   : > { %p6629_p4 = scmp.ne.s32.totalorder %s8854_s6, %s6628_s12  ;;  %p6633_p9 = scmp.lt.u32.totalorder %s8854_s6, %s8926_s5 }
 0x3a8   : > { %p6634_p10 = scmp.lt.u32.totalorder %s6632_s15, %s6628_s12  ;;  %p6636_p12 = scmp.lt.u32.totalorder %s6628_s12, %s8854_s6 }
 0x3a9   : > { %p6630_p7 = pnand %p6629_p4, %p6751_p5 }
 0x3aa   : > { %p6635_p11 = por %p6634_p10, %p6633_p9 }
 0x3ab   : > { %p6631_p8 = pneg %p6630_p7 }
 0x3ac   : > { %p6637_p13 = por %p6636_p12, %p6635_p11 }
 0x3ae   : > { %p6638_p0 = pnand %p6637_p13, %p6631_p8 }
 0x3b0   : > { %6641 = shalt.err (!%p6638_p0)
}
 0x3b1   : > { %s6681_s23 = smov 128   ;;  %s6682_s25 = smov 8  }
 0x3b2   : > { %6459 = dma.vmem_to_hbm [thread:$0]  (%p6751_p5), %s8856_s26, 4096, %s8854_s6, %s8880_s7, %s6681_s23, %s6681_s23, %s6682_s25  }
 0x3b3 PF: > { %p6465_p1 = scmp.ge.s32.totalorder %s6676_s21, 2  ;;  %s5101_s22 = sand.u32 1, %s6664_s18  }
 0x3b4   : > { %s5102_s30 = scalar_lea.sflag [#allocation3], %s5101_s22 }
 0x3b5   : > { %p6462_p2 = pnand %p6465_p1, %p6755_p6 }
 0x3b7   : > { %6659 = dma.done.wait (!%p6462_p2), %s5102_s30, 4096  }
 0x3b8   : > { %6661 = vsyncadd (!%p6462_p2), %s5102_s30, 4294963200  ;;  %p15_p3 = scmp.ge.s32.totalorder %s6738_s24, 4   ;;  %s9041_s18 = smov %s6668_s19 }
 0x3b9   : > { %s9042_s19 = smov %s6672_s20  ;;  %s9043_s20 = smov %s6749_s27 }
 0x3ba   : > { %s9044_s21 = smov %s6738_s24  ;;  %17 = sbr.rel (!%p15_p3) target bundleno = 3 (0x3), region = 85 }
 0x3c1   :  { %5107 = vsyncpa [#allocation3], 1 }
 0x3c2   :  { %5109 = vsyncpa [#allocation3 + $0x1], 1 }

</bundles_post_ra>
